<compile_context>
chip_gen: v6e
topology: v6e:2x2x1
jax: 0.10.0
libtpu: 0.0.40
codegen_flags: <defaults>
</compile_context>

<pallas_src>
import jax
import jax.numpy as jnp
import numpy as np
from jax import lax
from jax.experimental import pallas as pl
from jax.experimental.pallas import tpu as pltpu

EPS = 1e-5


# ----------------------------- Pallas kernels ------------------------------ #

def _make_conv_kernel(C, D, H, W, apply_affine, plane_out):
    """Conv3d(3x3x3, pad 1) for one (n, d) output depth slice, fused K = 27*C.

    Inputs : three padded-plane depth slabs (C, P2P) bf16 (depth-clamped),
             fused weights (C, 27C) bf16, wide validity mask (1, HWW),
             [optionally plane halo mask (1, P2P), BN1 scale/shift (C, 1)].
    Outputs: conv result bf16 in wide (C, HWW) or zero-framed plane (C, P2P)
             layout, plus masked partial BN stats (sum, centered sum-of-squares).
    Scratch: big-K operand (27C, HWW) bf16.
    """
    Wp = W + 2
    HWW = H * Wp
    inv_cnt = 1.0 / float(H * W)

    def kernel(*refs):
        if apply_affine:
            (s0_ref, s1_ref, s2_ref, w_ref, wmask_ref, pmask_ref,
             scale_ref, shift_ref, y_ref, ssum_ref, sm2_ref, xk_ref) = refs
        else:
            (s0_ref, s1_ref, s2_ref, w_ref, wmask_ref,
             y_ref, ssum_ref, sm2_ref, xk_ref) = refs

        d = pl.program_id(1)

        # Transform the three depth slabs (previous layer's BN+ReLU fused here
        # for conv2) and mask out-of-range / halo positions.
        slabs = []
        for kd, s_ref in enumerate((s0_ref, s1_ref, s2_ref)):
            s = s_ref[...]
            if apply_affine:
                s = jnp.maximum(
                    s.astype(jnp.float32) * scale_ref[...] + shift_ref[...],
                    0.0) * pmask_ref[...]
            if kd != 1:                       # depth-halo plane (clamped read)
                src = d + (kd - 1)
                valid = jnp.logical_and(src >= 0, src <= D - 1)
                s = jnp.where(valid, s, jnp.zeros_like(s))
            slabs.append(s.astype(jnp.bfloat16))
        xcat = jnp.concatenate(slabs, axis=0)          # (3C, P2P) bf16

        # Build the fused-K operand once per step: row block (kh*3+kw) is xcat
        # shifted by kh*Wp + kw (the lane shifts happen in this one-time copy).
        for kh in range(3):
            for kw in range(3):
                off = kh * Wp + kw
                xk_ref[pl.ds((kh * 3 + kw) * 3 * C, 3 * C), :] = (
                    xcat[:, off:off + HWW])

        # Single MXU matmul: (C, 27C) x (27C, HWW) -> (C, HWW) f32.
        res = jnp.dot(w_ref[...], xk_ref[...],
                      preferred_element_type=jnp.float32)

        # Masked partial BatchNorm statistics (valid output columns only).
        m = wmask_ref[...]                              # (1, HWW)
        tsum = jnp.sum(res * m, axis=1, keepdims=True)  # (C, 1)
        cen = (res - tsum * inv_cnt) * m
        ssum_ref[...] = tsum
        sm2_ref[...] = jnp.sum(cen * cen, axis=1, keepdims=True)

        # Single store of the conv result (bf16).
        resb = res.astype(y_ref.dtype)
        if plane_out:
            zpad = jnp.zeros((C, Wp + 1), y_ref.dtype)
            y_ref[...] = jnp.concatenate([zpad, resb, zpad], axis=1)
        else:
            y_ref[...] = resb

    return kernel


def _make_epilogue_kernel(Wp, HWW):
    """BN2 scale/shift + residual add + ReLU over a (Dt, C, HWW) block."""

    def kernel(y_ref, x_ref, scale_ref, shift_ref, o_ref):
        res = x_ref[:, :, Wp + 1:Wp + 1 + HWW].astype(jnp.float32)
        o_ref[...] = jnp.maximum(
            y_ref[...].astype(jnp.float32) * scale_ref[...] + shift_ref[...]
            + res, 0.0).astype(o_ref.dtype)

    return kernel


# ------------------------------- forward pass ------------------------------- #

def basic_block_forward(x_ncdhw, params):
    N, C, D, H, W = x_ncdhw.shape
    Wp = W + 2
    HWW = H * Wp                   # wide layout: col = h*Wp + w (2 junk cols/row)
    P2 = (H + 2) * Wp              # flattened zero-framed plane
    P2P = P2 + 2                   # +2 guard so every tap window stays in bounds
    R = N * D * H * W

    cparams = pltpu.CompilerParams(
        dimension_semantics=("parallel", "parallel"),
        vmem_limit_bytes=48 * 1024 * 1024)

    # ---- input: NCDHW f32 -> zero-framed plane layout (N, D, C, P2P) bf16 ----
    x_t = jnp.transpose(x_ncdhw, (0, 2, 1, 3, 4)).astype(jnp.bfloat16)
    xp = jnp.pad(x_t, ((0, 0), (0, 0), (0, 0), (1, 1), (1, 1)))
    xp = jnp.pad(xp.reshape(N, D, C, P2), ((0, 0), (0, 0), (0, 0), (0, 2)))

    # ---- fused-K weights: (O, I, kd, kh, kw) -> (C, 27C), K = (kh, kw, kd, ci)
    def weight_fused(w):
        wt = jnp.transpose(w, (0, 3, 4, 2, 1))          # (O, kh, kw, kd, I)
        return wt.reshape(C, 27 * C).astype(jnp.bfloat16)

    col = jnp.arange(HWW)
    wide_mask = ((col % Wp) < W).astype(jnp.float32).reshape(1, HWW)
    p = jnp.arange(P2P)
    hp, wq = p // Wp, p % Wp
    plane_mask = ((hp >= 1) & (hp <= H) & (wq >= 1) & (wq <= W)
                  & (p < P2)).astype(jnp.float32).reshape(1, P2P)

    # Depth-clamped slab views (out-of-range planes are masked in-kernel).
    slab_specs = [
        pl.BlockSpec(
            (None, None, C, P2P),
            lambda n, d, kd=kd: (
                n, jnp.minimum(jnp.maximum(d + kd - 1, 0), D - 1), 0, 0))
        for kd in range(3)]

    def conv_layer(act, w_big, scale=None, shift=None, plane_out=False):
        apply_affine = scale is not None
        in_specs = slab_specs + [
            pl.BlockSpec((C, 27 * C), lambda n, d: (0, 0)),   # resident weights
            pl.BlockSpec((1, HWW), lambda n, d: (0, 0)),      # resident mask
        ]
        inputs = [act, act, act, w_big, wide_mask]
        if apply_affine:
            in_specs += [pl.BlockSpec((1, P2P), lambda n, d: (0, 0)),
                         pl.BlockSpec((C, 1), lambda n, d: (0, 0)),
                         pl.BlockSpec((C, 1), lambda n, d: (0, 0))]
            inputs += [plane_mask, scale.reshape(C, 1), shift.reshape(C, 1)]
        ylen = P2P if plane_out else HWW
        out_specs = (
            pl.BlockSpec((None, None, C, ylen), lambda n, d: (n, d, 0, 0)),
            pl.BlockSpec((None, None, C, 1), lambda n, d: (n, d, 0, 0)),
            pl.BlockSpec((None, None, C, 1), lambda n, d: (n, d, 0, 0)))
        out_shape = (
            jax.ShapeDtypeStruct((N, D, C, ylen), jnp.bfloat16),
            jax.ShapeDtypeStruct((N, D, C, 1), jnp.float32),
            jax.ShapeDtypeStruct((N, D, C, 1), jnp.float32))
        return pl.pallas_call(
            _make_conv_kernel(C, D, H, W, apply_affine, plane_out),
            grid=(N, D),
            in_specs=in_specs, out_specs=out_specs, out_shape=out_shape,
            scratch_shapes=[pltpu.VMEM((27 * C, HWW), jnp.bfloat16)],
            compiler_params=cparams,
        )(*inputs)

    def stats_to_affine(ssum, sm2, gamma, beta):
        # Chan parallel-variance combine (numerically stable, global batch stats).
        tile_cnt = float(H * W)
        total = float(R)
        tsum = ssum[..., 0]                              # (N, D, C)
        tm2 = sm2[..., 0]
        mean = jnp.sum(tsum, axis=(0, 1)) / total        # (C,)
        tmean = tsum / tile_cnt
        m2 = jnp.sum(tm2, axis=(0, 1)) + tile_cnt * jnp.sum(
            jnp.square(tmean - mean), axis=(0, 1))
        var = m2 / total
        scale = gamma * lax.rsqrt(var + EPS)
        shift = beta - mean * scale
        return scale.astype(jnp.float32), shift.astype(jnp.float32)

    # ---- layer 1: conv1 (+ BN1 stats); BN1+ReLU is applied inside conv2 ----
    y1p, s1, q1 = conv_layer(xp, weight_fused(params["w1"]), plane_out=True)
    sc1, sh1 = stats_to_affine(s1, q1, params["gamma1"], params["beta1"])

    # ---- layer 2: (BN1+ReLU on read) conv2 (+ BN2 stats) ----
    y2, s2, q2 = conv_layer(y1p, weight_fused(params["w2"]),
                            scale=sc1, shift=sh1, plane_out=False)
    sc2, sh2 = stats_to_affine(s2, q2, params["gamma2"], params["beta2"])

    # ---- epilogue: BN2 + residual + ReLU, several depth slices per step ----
    Dt = max(t for t in range(1, min(D, 8) + 1) if D % t == 0)
    out_wide = pl.pallas_call(
        _make_epilogue_kernel(Wp, HWW),
        grid=(N, D // Dt),
        in_specs=[
            pl.BlockSpec((None, Dt, C, HWW), lambda n, t: (n, t, 0, 0)),
            pl.BlockSpec((None, Dt, C, P2P), lambda n, t: (n, t, 0, 0)),
            pl.BlockSpec((1, C, 1), lambda n, t: (0, 0, 0)),
            pl.BlockSpec((1, C, 1), lambda n, t: (0, 0, 0)),
        ],
        out_specs=pl.BlockSpec((None, Dt, C, HWW), lambda n, t: (n, t, 0, 0)),
        out_shape=jax.ShapeDtypeStruct((N, D, C, HWW), jnp.float32),
        compiler_params=cparams,
    )(y2, xp, sc2.reshape(1, C, 1), sh2.reshape(1, C, 1))

    out = out_wide.reshape(N, D, C, H, Wp)[..., :W]
    return jnp.transpose(out, (0, 2, 1, 3, 4))           # back to NCDHW


# ----------------------- Pure-JAX reference (NCDHW) ------------------------- #

def reference_forward(x, params):
    dn = ('NCDHW', 'OIDHW', 'NCDHW')

    def bn(y, gamma, beta):
        mean = jnp.mean(y, axis=(0, 2, 3, 4), keepdims=True)
        var = jnp.mean(jnp.square(y - mean), axis=(0, 2, 3, 4), keepdims=True)
        g = gamma.reshape(1, -1, 1, 1, 1)
        b = beta.reshape(1, -1, 1, 1, 1)
        return (y - mean) * lax.rsqrt(var + EPS) * g + b

    y = lax.conv_general_dilated(x, params["w1"], (1, 1, 1),
                                 [(1, 1), (1, 1), (1, 1)],
                                 dimension_numbers=dn)
    y = jax.nn.relu(bn(y, params["gamma1"], params["beta1"]))
    y = lax.conv_general_dilated(y, params["w2"], (1, 1, 1),
                                 [(1, 1), (1, 1), (1, 1)],
                                 dimension_numbers=dn)
    y = bn(y, params["gamma2"], params["beta2"]) + x
    return jax.nn.relu(y)


# ---------------------------------- main ------------------------------------ #

if __name__ == "__main__":
    N, C, D, H, W = 2, 32, 4, 4, 4          # inplanes = planes = 32 (module default)
    key = jax.random.PRNGKey(0)
    kx, kw1, kw2, kg1, kb1, kg2, kb2 = jax.random.split(key, 7)

    x = jax.random.normal(kx, (N, C, D, H, W), dtype=jnp.float32)

    fan_in = C * 27
    params = {
        "w1": jax.random.normal(kw1, (C, C, 3, 3, 3), jnp.float32) / np.sqrt(fan_in),
        "w2": jax.random.normal(kw2, (C, C, 3, 3, 3), jnp.float32) / np.sqrt(fan_in),
        "gamma1": 1.0 + 0.1 * jax.random.normal(kg1, (C,), jnp.float32),
        "beta1": 0.1 * jax.random.normal(kb1, (C,), jnp.float32),
        "gamma2": 1.0 + 0.1 * jax.random.normal(kg2, (C,), jnp.float32),
        "beta2": 0.1 * jax.random.normal(kb2, (C,), jnp.float32),
    }

    out = jax.jit(basic_block_forward)(x, params)
    out = jax.block_until_ready(out)

    ref = jax.block_until_ready(reference_forward(x, params))
    max_err = float(jnp.max(jnp.abs(out - ref)))
    assert out.shape == (N, C, D, H, W), out.shape
    # bf16 MXU operands / bf16 intermediate activations => loosened tolerance.
    assert max_err < 1e-1, f"max abs error too large: {max_err}"

    print("KERNEL_OK")
</pallas_src>

<mosaic_0001>
module attributes {stable_mosaic.version = 11 : i64} {
  func.func @kernel(%arg0: i32, %arg1: i32, %arg2: memref<1x1x32x38xbf16, #tpu.memory_space<vmem>>, %arg3: memref<1x1x32x38xbf16, #tpu.memory_space<vmem>>, %arg4: memref<1x1x32x38xbf16, #tpu.memory_space<vmem>>, %arg5: memref<32x864xbf16, #tpu.memory_space<vmem>>, %arg6: memref<1x24xf32, #tpu.memory_space<vmem>>, %arg7: memref<1x1x32x38xbf16, #tpu.memory_space<vmem>>, %arg8: memref<1x1x32x1xf32, #tpu.memory_space<vmem>>, %arg9: memref<1x1x32x1xf32, #tpu.memory_space<vmem>>, %arg10: memref<864x24xbf16, #tpu.memory_space<vmem>>) attributes {dimension_semantics = [#tpu.dimension_semantics<parallel>, #tpu.dimension_semantics<parallel>], iteration_bounds = array<i64: 2, 4>, scalar_prefetch = 0 : i64, scratch_operands = 1 : i64, tpu.core_type = #tpu.core_type<tc>, window_params = [{transform_indices = @transform_0, window_bounds = array<i64: 1, 1, 32, 38>}, {transform_indices = @transform_1, window_bounds = array<i64: 1, 1, 32, 38>}, {transform_indices = @transform_2, window_bounds = array<i64: 1, 1, 32, 38>}, {pipeline_mode = #tpu.pipeline_mode<synchronous>, transform_indices = @transform_3, window_bounds = array<i64: 32, 864>}, {pipeline_mode = #tpu.pipeline_mode<synchronous>, transform_indices = @transform_4, window_bounds = array<i64: 1, 24>}, {transform_indices = @transform_5, window_bounds = array<i64: 1, 1, 32, 38>}, {transform_indices = @transform_6, window_bounds = array<i64: 1, 1, 32, 1>}, {transform_indices = @transform_7, window_bounds = array<i64: 1, 1, 32, 1>}]} {
    %c0 = arith.constant 0 : index
    %c0_0 = arith.constant 0 : index
    %c0_1 = arith.constant 0 : index
    %c0_2 = arith.constant 0 : index
    %0 = vector.load %arg2[%c0, %c0_0, %c0_1, %c0_2] : memref<1x1x32x38xbf16, #tpu.memory_space<vmem>>, vector<1x1x32x38xbf16>
    %1 = vector.shape_cast %0 : vector<1x1x32x38xbf16> to vector<32x38xbf16>
    %c-1_i32 = arith.constant -1 : i32
    %2 = arith.addi %arg1, %c-1_i32 : i32
    %c0_i32 = arith.constant 0 : i32
    %3 = arith.cmpi sge, %2, %c0_i32 : i32
    %c3_i32 = arith.constant 3 : i32
    %4 = arith.cmpi sle, %2, %c3_i32 : i32
    %5 = arith.andi %3, %4 : i1
    %cst = arith.constant 0.000000e+00 : bf16
    %6 = vector.broadcast %cst : bf16 to vector<32x38xbf16>
    %7 = arith.select %5, %1, %6 : vector<32x38xbf16>
    %c0_3 = arith.constant 0 : index
    %c0_4 = arith.constant 0 : index
    %c0_5 = arith.constant 0 : index
    %c0_6 = arith.constant 0 : index
    %8 = vector.load %arg3[%c0_3, %c0_4, %c0_5, %c0_6] : memref<1x1x32x38xbf16, #tpu.memory_space<vmem>>, vector<1x1x32x38xbf16>
    %9 = vector.shape_cast %8 : vector<1x1x32x38xbf16> to vector<32x38xbf16>
    %c0_7 = arith.constant 0 : index
    %c0_8 = arith.constant 0 : index
    %c0_9 = arith.constant 0 : index
    %c0_10 = arith.constant 0 : index
    %10 = vector.load %arg4[%c0_7, %c0_8, %c0_9, %c0_10] : memref<1x1x32x38xbf16, #tpu.memory_space<vmem>>, vector<1x1x32x38xbf16>
    %11 = vector.shape_cast %10 : vector<1x1x32x38xbf16> to vector<32x38xbf16>
    %c1_i32 = arith.constant 1 : i32
    %12 = arith.addi %arg1, %c1_i32 : i32
    %c0_i32_11 = arith.constant 0 : i32
    %13 = arith.cmpi sge, %12, %c0_i32_11 : i32
    %c3_i32_12 = arith.constant 3 : i32
    %14 = arith.cmpi sle, %12, %c3_i32_12 : i32
    %15 = arith.andi %13, %14 : i1
    %cst_13 = arith.constant 0.000000e+00 : bf16
    %16 = vector.broadcast %cst_13 : bf16 to vector<32x38xbf16>
    %17 = arith.select %15, %11, %16 : vector<32x38xbf16>
    %18 = tpu.concatenate %7, %9, %17 in 0 : vector<32x38xbf16>, vector<32x38xbf16>, vector<32x38xbf16> -> vector<96x38xbf16>
    %19 = vector.extract_strided_slice %18 {offsets = [0, 0], sizes = [96, 24], strides = [1, 1]} : vector<96x38xbf16> to vector<96x24xbf16>
    %c0_14 = arith.constant 0 : index
    %c0_15 = arith.constant 0 : index
    %20 = vector.load %arg10[%c0_14, %c0_15] : memref<864x24xbf16, #tpu.memory_space<vmem>>, vector<96x24xbf16>
    tpu.vector_store %arg10[%c0_14, %c0_15], %19 {strides = array<i32>} : memref<864x24xbf16, #tpu.memory_space<vmem>>, vector<96x24xbf16>,
    %21 = vector.extract_strided_slice %18 {offsets = [0, 1], sizes = [96, 24], strides = [1, 1]} : vector<96x38xbf16> to vector<96x24xbf16>
    %c96 = arith.constant 96 : index
    %c0_16 = arith.constant 0 : index
    %22 = vector.load %arg10[%c96, %c0_16] : memref<864x24xbf16, #tpu.memory_space<vmem>>, vector<96x24xbf16>
    tpu.vector_store %arg10[%c96, %c0_16], %21 {strides = array<i32>} : memref<864x24xbf16, #tpu.memory_space<vmem>>, vector<96x24xbf16>,
    %23 = vector.extract_strided_slice %18 {offsets = [0, 2], sizes = [96, 24], strides = [1, 1]} : vector<96x38xbf16> to vector<96x24xbf16>
    %c192 = arith.constant 192 : index
    %c0_17 = arith.constant 0 : index
    %24 = vector.load %arg10[%c192, %c0_17] : memref<864x24xbf16, #tpu.memory_space<vmem>>, vector<96x24xbf16>
    tpu.vector_store %arg10[%c192, %c0_17], %23 {strides = array<i32>} : memref<864x24xbf16, #tpu.memory_space<vmem>>, vector<96x24xbf16>,
    %25 = vector.extract_strided_slice %18 {offsets = [0, 6], sizes = [96, 24], strides = [1, 1]} : vector<96x38xbf16> to vector<96x24xbf16>
    %c288 = arith.constant 288 : index
    %c0_18 = arith.constant 0 : index
    %26 = vector.load %arg10[%c288, %c0_18] : memref<864x24xbf16, #tpu.memory_space<vmem>>, vector<96x24xbf16>
    tpu.vector_store %arg10[%c288, %c0_18], %25 {strides = array<i32>} : memref<864x24xbf16, #tpu.memory_space<vmem>>, vector<96x24xbf16>,
    %27 = vector.extract_strided_slice %18 {offsets = [0, 7], sizes = [96, 24], strides = [1, 1]} : vector<96x38xbf16> to vector<96x24xbf16>
    %c384 = arith.constant 384 : index
    %c0_19 = arith.constant 0 : index
    %28 = vector.load %arg10[%c384, %c0_19] : memref<864x24xbf16, #tpu.memory_space<vmem>>, vector<96x24xbf16>
    tpu.vector_store %arg10[%c384, %c0_19], %27 {strides = array<i32>} : memref<864x24xbf16, #tpu.memory_space<vmem>>, vector<96x24xbf16>,
    %29 = vector.extract_strided_slice %18 {offsets = [0, 8], sizes = [96, 24], strides = [1, 1]} : vector<96x38xbf16> to vector<96x24xbf16>
    %c480 = arith.constant 480 : index
    %c0_20 = arith.constant 0 : index
    %30 = vector.load %arg10[%c480, %c0_20] : memref<864x24xbf16, #tpu.memory_space<vmem>>, vector<96x24xbf16>
    tpu.vector_store %arg10[%c480, %c0_20], %29 {strides = array<i32>} : memref<864x24xbf16, #tpu.memory_space<vmem>>, vector<96x24xbf16>,
    %31 = vector.extract_strided_slice %18 {offsets = [0, 12], sizes = [96, 24], strides = [1, 1]} : vector<96x38xbf16> to vector<96x24xbf16>
    %c576 = arith.constant 576 : index
    %c0_21 = arith.constant 0 : index
    %32 = vector.load %arg10[%c576, %c0_21] : memref<864x24xbf16, #tpu.memory_space<vmem>>, vector<96x24xbf16>
    tpu.vector_store %arg10[%c576, %c0_21], %31 {strides = array<i32>} : memref<864x24xbf16, #tpu.memory_space<vmem>>, vector<96x24xbf16>,
    %33 = vector.extract_strided_slice %18 {offsets = [0, 13], sizes = [96, 24], strides = [1, 1]} : vector<96x38xbf16> to vector<96x24xbf16>
    %c672 = arith.constant 672 : index
    %c0_22 = arith.constant 0 : index
    %34 = vector.load %arg10[%c672, %c0_22] : memref<864x24xbf16, #tpu.memory_space<vmem>>, vector<96x24xbf16>
    tpu.vector_store %arg10[%c672, %c0_22], %33 {strides = array<i32>} : memref<864x24xbf16, #tpu.memory_space<vmem>>, vector<96x24xbf16>,
    %35 = vector.extract_strided_slice %18 {offsets = [0, 14], sizes = [96, 24], strides = [1, 1]} : vector<96x38xbf16> to vector<96x24xbf16>
    %c768 = arith.constant 768 : index
    %c0_23 = arith.constant 0 : index
    %36 = vector.load %arg10[%c768, %c0_23] : memref<864x24xbf16, #tpu.memory_space<vmem>>, vector<96x24xbf16>
    tpu.vector_store %arg10[%c768, %c0_23], %35 {strides = array<i32>} : memref<864x24xbf16, #tpu.memory_space<vmem>>, vector<96x24xbf16>,
    %c0_24 = arith.constant 0 : index
    %c0_25 = arith.constant 0 : index
    %37 = vector.load %arg5[%c0_24, %c0_25] : memref<32x864xbf16, #tpu.memory_space<vmem>>, vector<32x864xbf16>
    %c0_26 = arith.constant 0 : index
    %c0_27 = arith.constant 0 : index
    %38 = vector.load %arg10[%c0_26, %c0_27] : memref<864x24xbf16, #tpu.memory_space<vmem>>, vector<864x24xbf16>
    %cst_28 = arith.constant dense<0.000000e+00> : vector<32x24xf32>
    %39 = tpu.matmul %37, %38, %cst_28 {dimension_numbers = #tpu.dot_dimension_numbers<[1], [0], [0], [1], [0, 0, 1, 1], [], []>} : vector<32x864xbf16>, vector<864x24xbf16>, vector<32x24xf32> -> vector<32x24xf32>
    %c0_29 = arith.constant 0 : index
    %c0_30 = arith.constant 0 : index
    %40 = vector.load %arg6[%c0_29, %c0_30] : memref<1x24xf32, #tpu.memory_space<vmem>>, vector<1x24xf32>
    %41 = vector.broadcast %40 : vector<1x24xf32> to vector<32x24xf32>
    %42 = arith.mulf %39, %41 : vector<32x24xf32>
    %cst_31 = arith.constant dense<0.000000e+00> : vector<32xf32>
    %43 = vector.multi_reduction <add>, %42, %cst_31 [1] : vector<32x24xf32> to vector<32xf32>
    %44 = vector.shape_cast %43 : vector<32xf32> to vector<32x1xf32>
    %cst_32 = arith.constant 6.250000e-02 : f32
    %45 = vector.broadcast %cst_32 : f32 to vector<32x1xf32>
    %46 = arith.mulf %44, %45 : vector<32x1xf32>
    %47 = vector.broadcast %46 : vector<32x1xf32> to vector<32x24xf32>
    %48 = arith.subf %39, %47 : vector<32x24xf32>
    %49 = vector.broadcast %40 : vector<1x24xf32> to vector<32x24xf32>
    %50 = arith.mulf %48, %49 : vector<32x24xf32>
    %c0_33 = arith.constant 0 : index
    %c0_34 = arith.constant 0 : index
    %c0_35 = arith.constant 0 : index
    %c0_36 = arith.constant 0 : index
    %51 = vector.load %arg8[%c0_33, %c0_34, %c0_35, %c0_36] : memref<1x1x32x1xf32, #tpu.memory_space<vmem>>, vector<1x1x32x1xf32>
    %52 = vector.shape_cast %51 : vector<1x1x32x1xf32> to vector<32x1xf32>
    %53 = vector.shape_cast %44 : vector<32x1xf32> to vector<1x1x32x1xf32>
    tpu.vector_store %arg8[%c0_33, %c0_34, %c0_35, %c0_36], %53 {strides = array<i32>} : memref<1x1x32x1xf32, #tpu.memory_space<vmem>>, vector<1x1x32x1xf32>,
    %54 = arith.mulf %50, %50 : vector<32x24xf32>
    %cst_37 = arith.constant dense<0.000000e+00> : vector<32xf32>
    %55 = vector.multi_reduction <add>, %54, %cst_37 [1] : vector<32x24xf32> to vector<32xf32>
    %56 = vector.shape_cast %55 : vector<32xf32> to vector<32x1xf32>
    %c0_38 = arith.constant 0 : index
    %c0_39 = arith.constant 0 : index
    %c0_40 = arith.constant 0 : index
    %c0_41 = arith.constant 0 : index
    %57 = vector.load %arg9[%c0_38, %c0_39, %c0_40, %c0_41] : memref<1x1x32x1xf32, #tpu.memory_space<vmem>>, vector<1x1x32x1xf32>
    %58 = vector.shape_cast %57 : vector<1x1x32x1xf32> to vector<32x1xf32>
    %59 = vector.shape_cast %56 : vector<32x1xf32> to vector<1x1x32x1xf32>
    tpu.vector_store %arg9[%c0_38, %c0_39, %c0_40, %c0_41], %59 {strides = array<i32>} : memref<1x1x32x1xf32, #tpu.memory_space<vmem>>, vector<1x1x32x1xf32>,
    %60 = arith.truncf %39 : vector<32x24xf32> to vector<32x24xbf16>
    %cst_42 = arith.constant 0.000000e+00 : bf16
    %61 = vector.broadcast %cst_42 : bf16 to vector<32x7xbf16>
    %62 = tpu.concatenate %61, %60, %61 in 1 : vector<32x7xbf16>, vector<32x24xbf16>, vector<32x7xbf16> -> vector<32x38xbf16>
    %c0_43 = arith.constant 0 : index
    %c0_44 = arith.constant 0 : index
    %c0_45 = arith.constant 0 : index
    %c0_46 = arith.constant 0 : index
    %63 = vector.load %arg7[%c0_43, %c0_44, %c0_45, %c0_46] : memref<1x1x32x38xbf16, #tpu.memory_space<vmem>>, vector<1x1x32x38xbf16>
    %64 = vector.shape_cast %63 : vector<1x1x32x38xbf16> to vector<32x38xbf16>
    %65 = vector.shape_cast %62 : vector<32x38xbf16> to vector<1x1x32x38xbf16>
    tpu.vector_store %arg7[%c0_43, %c0_44, %c0_45, %c0_46], %65 {strides = array<i32>} : memref<1x1x32x38xbf16, #tpu.memory_space<vmem>>, vector<1x1x32x38xbf16>,
    return
  }
  func.func @transform_0(%arg0: i32, %arg1: i32) -> (i32, i32, i32, i32) {
    %c0_i32 = arith.constant 0 : i32
    %0 = arith.addi %arg1, %c0_i32 : i32
    %c1_i32 = arith.constant 1 : i32
    %1 = arith.subi %0, %c1_i32 : i32
    %c0_i32_0 = arith.constant 0 : i32
    %2 = arith.maxsi %1, %c0_i32_0 : i32
    %c3_i32 = arith.constant 3 : i32
    %3 = arith.minsi %2, %c3_i32 : i32
    %c0_i32_1 = arith.constant 0 : i32
    %c0_i32_2 = arith.constant 0 : i32
    %c0_i32_3 = arith.constant 0 : i32
    return %arg0, %3, %c0_i32_1, %c0_i32_2 : i32, i32, i32, i32
  }
  func.func @transform_1(%arg0: i32, %arg1: i32) -> (i32, i32, i32, i32) {
    %c1_i32 = arith.constant 1 : i32
    %0 = arith.addi %arg1, %c1_i32 : i32
    %c1_i32_0 = arith.constant 1 : i32
    %1 = arith.subi %0, %c1_i32_0 : i32
    %c0_i32 = arith.constant 0 : i32
    %2 = arith.maxsi %1, %c0_i32 : i32
    %c3_i32 = arith.constant 3 : i32
    %3 = arith.minsi %2, %c3_i32 : i32
    %c0_i32_1 = arith.constant 0 : i32
    %c0_i32_2 = arith.constant 0 : i32
    %c0_i32_3 = arith.constant 0 : i32
    return %arg0, %3, %c0_i32_1, %c0_i32_2 : i32, i32, i32, i32
  }
  func.func @transform_2(%arg0: i32, %arg1: i32) -> (i32, i32, i32, i32) {
    %c2_i32 = arith.constant 2 : i32
    %0 = arith.addi %arg1, %c2_i32 : i32
    %c1_i32 = arith.constant 1 : i32
    %1 = arith.subi %0, %c1_i32 : i32
    %c0_i32 = arith.constant 0 : i32
    %2 = arith.maxsi %1, %c0_i32 : i32
    %c3_i32 = arith.constant 3 : i32
    %3 = arith.minsi %2, %c3_i32 : i32
    %c0_i32_0 = arith.constant 0 : i32
    %c0_i32_1 = arith.constant 0 : i32
    %c0_i32_2 = arith.constant 0 : i32
    return %arg0, %3, %c0_i32_0, %c0_i32_1 : i32, i32, i32, i32
  }
  func.func @transform_3(%arg0: i32, %arg1: i32) -> (i32, i32) {
    %c0_i32 = arith.constant 0 : i32
    %c0_i32_0 = arith.constant 0 : i32
    %c0_i32_1 = arith.constant 0 : i32
    return %c0_i32, %c0_i32_0 : i32, i32
  }
  func.func @transform_4(%arg0: i32, %arg1: i32) -> (i32, i32) {
    %c0_i32 = arith.constant 0 : i32
    %c0_i32_0 = arith.constant 0 : i32
    %c0_i32_1 = arith.constant 0 : i32
    return %c0_i32, %c0_i32_0 : i32, i32
  }
  func.func @transform_5(%arg0: i32, %arg1: i32) -> (i32, i32, i32, i32) {
    %c0_i32 = arith.constant 0 : i32
    %c0_i32_0 = arith.constant 0 : i32
    %c0_i32_1 = arith.constant 0 : i32
    return %arg0, %arg1, %c0_i32, %c0_i32_0 : i32, i32, i32, i32
  }
  func.func @transform_6(%arg0: i32, %arg1: i32) -> (i32, i32, i32, i32) {
    %c0_i32 = arith.constant 0 : i32
    %c0_i32_0 = arith.constant 0 : i32
    %c0_i32_1 = arith.constant 0 : i32
    return %arg0, %arg1, %c0_i32, %c0_i32_0 : i32, i32, i32, i32
  }
  func.func @transform_7(%arg0: i32, %arg1: i32) -> (i32, i32, i32, i32) {
    %c0_i32 = arith.constant 0 : i32
    %c0_i32_0 = arith.constant 0 : i32
    %c0_i32_1 = arith.constant 0 : i32
    return %arg0, %arg1, %c0_i32, %c0_i32_0 : i32, i32, i32, i32
  }
}

module attributes {stable_mosaic.version = 11 : i64} {
  func.func @kernel(%arg0: i32, %arg1: i32, %arg2: memref<1x1x32x38xbf16, #tpu.memory_space<vmem>>, %arg3: memref<1x1x32x38xbf16, #tpu.memory_space<vmem>>, %arg4: memref<1x1x32x38xbf16, #tpu.memory_space<vmem>>, %arg5: memref<32x864xbf16, #tpu.memory_space<vmem>>, %arg6: memref<1x24xf32, #tpu.memory_space<vmem>>, %arg7: memref<1x38xf32, #tpu.memory_space<vmem>>, %arg8: memref<32x1xf32, #tpu.memory_space<vmem>>, %arg9: memref<32x1xf32, #tpu.memory_space<vmem>>, %arg10: memref<1x1x32x24xbf16, #tpu.memory_space<vmem>>, %arg11: memref<1x1x32x1xf32, #tpu.memory_space<vmem>>, %arg12: memref<1x1x32x1xf32, #tpu.memory_space<vmem>>, %arg13: memref<864x24xbf16, #tpu.memory_space<vmem>>) attributes {dimension_semantics = [#tpu.dimension_semantics<parallel>, #tpu.dimension_semantics<parallel>], iteration_bounds = array<i64: 2, 4>, scalar_prefetch = 0 : i64, scratch_operands = 1 : i64, tpu.core_type = #tpu.core_type<tc>, window_params = [{transform_indices = @transform_0, window_bounds = array<i64: 1, 1, 32, 38>}, {transform_indices = @transform_1, window_bounds = array<i64: 1, 1, 32, 38>}, {transform_indices = @transform_2, window_bounds = array<i64: 1, 1, 32, 38>}, {pipeline_mode = #tpu.pipeline_mode<synchronous>, transform_indices = @transform_3, window_bounds = array<i64: 32, 864>}, {pipeline_mode = #tpu.pipeline_mode<synchronous>, transform_indices = @transform_4, window_bounds = array<i64: 1, 24>}, {pipeline_mode = #tpu.pipeline_mode<synchronous>, transform_indices = @transform_5, window_bounds = array<i64: 1, 38>}, {pipeline_mode = #tpu.pipeline_mode<synchronous>, transform_indices = @transform_6, window_bounds = array<i64: 32, 1>}, {pipeline_mode = #tpu.pipeline_mode<synchronous>, transform_indices = @transform_7, window_bounds = array<i64: 32, 1>}, {transform_indices = @transform_8, window_bounds = array<i64: 1, 1, 32, 24>}, {transform_indices = @transform_9, window_bounds = array<i64: 1, 1, 32, 1>}, {transform_indices = @transform_10, window_bounds = array<i64: 1, 1, 32, 1>}]} {
    %c0 = arith.constant 0 : index
    %c0_0 = arith.constant 0 : index
    %c0_1 = arith.constant 0 : index
    %c0_2 = arith.constant 0 : index
    %0 = vector.load %arg2[%c0, %c0_0, %c0_1, %c0_2] : memref<1x1x32x38xbf16, #tpu.memory_space<vmem>>, vector<1x1x32x38xbf16>
    %1 = vector.shape_cast %0 : vector<1x1x32x38xbf16> to vector<32x38xbf16>
    %2 = arith.extf %1 : vector<32x38xbf16> to vector<32x38xf32>
    %c0_3 = arith.constant 0 : index
    %c0_4 = arith.constant 0 : index
    %3 = vector.load %arg8[%c0_3, %c0_4] : memref<32x1xf32, #tpu.memory_space<vmem>>, vector<32x1xf32>
    %4 = vector.broadcast %3 : vector<32x1xf32> to vector<32x38xf32>
    %5 = arith.mulf %2, %4 : vector<32x38xf32>
    %c0_5 = arith.constant 0 : index
    %c0_6 = arith.constant 0 : index
    %6 = vector.load %arg9[%c0_5, %c0_6] : memref<32x1xf32, #tpu.memory_space<vmem>>, vector<32x1xf32>
    %7 = vector.broadcast %6 : vector<32x1xf32> to vector<32x38xf32>
    %8 = arith.addf %5, %7 : vector<32x38xf32>
    %cst = arith.constant 0.000000e+00 : f32
    %9 = vector.broadcast %cst : f32 to vector<32x38xf32>
    %10 = arith.maximumf %8, %9 : vector<32x38xf32>
    %c0_7 = arith.constant 0 : index
    %c0_8 = arith.constant 0 : index
    %11 = vector.load %arg7[%c0_7, %c0_8] : memref<1x38xf32, #tpu.memory_space<vmem>>, vector<1x38xf32>
    %12 = vector.broadcast %11 : vector<1x38xf32> to vector<32x38xf32>
    %13 = arith.mulf %10, %12 : vector<32x38xf32>
    %c-1_i32 = arith.constant -1 : i32
    %14 = arith.addi %arg1, %c-1_i32 : i32
    %c0_i32 = arith.constant 0 : i32
    %15 = arith.cmpi sge, %14, %c0_i32 : i32
    %c3_i32 = arith.constant 3 : i32
    %16 = arith.cmpi sle, %14, %c3_i32 : i32
    %17 = arith.andi %15, %16 : i1
    %cst_9 = arith.constant 0.000000e+00 : f32
    %18 = vector.broadcast %cst_9 : f32 to vector<32x38xf32>
    %19 = arith.select %17, %13, %18 : vector<32x38xf32>
    %20 = arith.truncf %19 : vector<32x38xf32> to vector<32x38xbf16>
    %c0_10 = arith.constant 0 : index
    %c0_11 = arith.constant 0 : index
    %c0_12 = arith.constant 0 : index
    %c0_13 = arith.constant 0 : index
    %21 = vector.load %arg3[%c0_10, %c0_11, %c0_12, %c0_13] : memref<1x1x32x38xbf16, #tpu.memory_space<vmem>>, vector<1x1x32x38xbf16>
    %22 = vector.shape_cast %21 : vector<1x1x32x38xbf16> to vector<32x38xbf16>
    %23 = arith.extf %22 : vector<32x38xbf16> to vector<32x38xf32>
    %c0_14 = arith.constant 0 : index
    %c0_15 = arith.constant 0 : index
    %24 = vector.load %arg8[%c0_14, %c0_15] : memref<32x1xf32, #tpu.memory_space<vmem>>, vector<32x1xf32>
    %25 = vector.broadcast %24 : vector<32x1xf32> to vector<32x38xf32>
    %26 = arith.mulf %23, %25 : vector<32x38xf32>
    %c0_16 = arith.constant 0 : index
    %c0_17 = arith.constant 0 : index
    %27 = vector.load %arg9[%c0_16, %c0_17] : memref<32x1xf32, #tpu.memory_space<vmem>>, vector<32x1xf32>
    %28 = vector.broadcast %27 : vector<32x1xf32> to vector<32x38xf32>
    %29 = arith.addf %26, %28 : vector<32x38xf32>
    %cst_18 = arith.constant 0.000000e+00 : f32
    %30 = vector.broadcast %cst_18 : f32 to vector<32x38xf32>
    %31 = arith.maximumf %29, %30 : vector<32x38xf32>
    %c0_19 = arith.constant 0 : index
    %c0_20 = arith.constant 0 : index
    %32 = vector.load %arg7[%c0_19, %c0_20] : memref<1x38xf32, #tpu.memory_space<vmem>>, vector<1x38xf32>
    %33 = vector.broadcast %32 : vector<1x38xf32> to vector<32x38xf32>
    %34 = arith.mulf %31, %33 : vector<32x38xf32>
    %35 = arith.truncf %34 : vector<32x38xf32> to vector<32x38xbf16>
    %c0_21 = arith.constant 0 : index
    %c0_22 = arith.constant 0 : index
    %c0_23 = arith.constant 0 : index
    %c0_24 = arith.constant 0 : index
    %36 = vector.load %arg4[%c0_21, %c0_22, %c0_23, %c0_24] : memref<1x1x32x38xbf16, #tpu.memory_space<vmem>>, vector<1x1x32x38xbf16>
    %37 = vector.shape_cast %36 : vector<1x1x32x38xbf16> to vector<32x38xbf16>
    %38 = arith.extf %37 : vector<32x38xbf16> to vector<32x38xf32>
    %c0_25 = arith.constant 0 : index
    %c0_26 = arith.constant 0 : index
    %39 = vector.load %arg8[%c0_25, %c0_26] : memref<32x1xf32, #tpu.memory_space<vmem>>, vector<32x1xf32>
    %40 = vector.broadcast %39 : vector<32x1xf32> to vector<32x38xf32>
    %41 = arith.mulf %38, %40 : vector<32x38xf32>
    %c0_27 = arith.constant 0 : index
    %c0_28 = arith.constant 0 : index
    %42 = vector.load %arg9[%c0_27, %c0_28] : memref<32x1xf32, #tpu.memory_space<vmem>>, vector<32x1xf32>
    %43 = vector.broadcast %42 : vector<32x1xf32> to vector<32x38xf32>
    %44 = arith.addf %41, %43 : vector<32x38xf32>
    %cst_29 = arith.constant 0.000000e+00 : f32
    %45 = vector.broadcast %cst_29 : f32 to vector<32x38xf32>
    %46 = arith.maximumf %44, %45 : vector<32x38xf32>
    %c0_30 = arith.constant 0 : index
    %c0_31 = arith.constant 0 : index
    %47 = vector.load %arg7[%c0_30, %c0_31] : memref<1x38xf32, #tpu.memory_space<vmem>>, vector<1x38xf32>
    %48 = vector.broadcast %47 : vector<1x38xf32> to vector<32x38xf32>
    %49 = arith.mulf %46, %48 : vector<32x38xf32>
    %c1_i32 = arith.constant 1 : i32
    %50 = arith.addi %arg1, %c1_i32 : i32
    %c0_i32_32 = arith.constant 0 : i32
    %51 = arith.cmpi sge, %50, %c0_i32_32 : i32
    %c3_i32_33 = arith.constant 3 : i32
    %52 = arith.cmpi sle, %50, %c3_i32_33 : i32
    %53 = arith.andi %51, %52 : i1
    %cst_34 = arith.constant 0.000000e+00 : f32
    %54 = vector.broadcast %cst_34 : f32 to vector<32x38xf32>
    %55 = arith.select %53, %49, %54 : vector<32x38xf32>
    %56 = arith.truncf %55 : vector<32x38xf32> to vector<32x38xbf16>
    %57 = tpu.concatenate %20, %35, %56 in 0 : vector<32x38xbf16>, vector<32x38xbf16>, vector<32x38xbf16> -> vector<96x38xbf16>
    %58 = vector.extract_strided_slice %57 {offsets = [0, 0], sizes = [96, 24], strides = [1, 1]} : vector<96x38xbf16> to vector<96x24xbf16>
    %c0_35 = arith.constant 0 : index
    %c0_36 = arith.constant 0 : index
    %59 = vector.load %arg13[%c0_35, %c0_36] : memref<864x24xbf16, #tpu.memory_space<vmem>>, vector<96x24xbf16>
    tpu.vector_store %arg13[%c0_35, %c0_36], %58 {strides = array<i32>} : memref<864x24xbf16, #tpu.memory_space<vmem>>, vector<96x24xbf16>,
    %60 = vector.extract_strided_slice %57 {offsets = [0, 1], sizes = [96, 24], strides = [1, 1]} : vector<96x38xbf16> to vector<96x24xbf16>
    %c96 = arith.constant 96 : index
    %c0_37 = arith.constant 0 : index
    %61 = vector.load %arg13[%c96, %c0_37] : memref<864x24xbf16, #tpu.memory_space<vmem>>, vector<96x24xbf16>
    tpu.vector_store %arg13[%c96, %c0_37], %60 {strides = array<i32>} : memref<864x24xbf16, #tpu.memory_space<vmem>>, vector<96x24xbf16>,
    %62 = vector.extract_strided_slice %57 {offsets = [0, 2], sizes = [96, 24], strides = [1, 1]} : vector<96x38xbf16> to vector<96x24xbf16>
    %c192 = arith.constant 192 : index
    %c0_38 = arith.constant 0 : index
    %63 = vector.load %arg13[%c192, %c0_38] : memref<864x24xbf16, #tpu.memory_space<vmem>>, vector<96x24xbf16>
    tpu.vector_store %arg13[%c192, %c0_38], %62 {strides = array<i32>} : memref<864x24xbf16, #tpu.memory_space<vmem>>, vector<96x24xbf16>,
    %64 = vector.extract_strided_slice %57 {offsets = [0, 6], sizes = [96, 24], strides = [1, 1]} : vector<96x38xbf16> to vector<96x24xbf16>
    %c288 = arith.constant 288 : index
    %c0_39 = arith.constant 0 : index
    %65 = vector.load %arg13[%c288, %c0_39] : memref<864x24xbf16, #tpu.memory_space<vmem>>, vector<96x24xbf16>
    tpu.vector_store %arg13[%c288, %c0_39], %64 {strides = array<i32>} : memref<864x24xbf16, #tpu.memory_space<vmem>>, vector<96x24xbf16>,
    %66 = vector.extract_strided_slice %57 {offsets = [0, 7], sizes = [96, 24], strides = [1, 1]} : vector<96x38xbf16> to vector<96x24xbf16>
    %c384 = arith.constant 384 : index
    %c0_40 = arith.constant 0 : index
    %67 = vector.load %arg13[%c384, %c0_40] : memref<864x24xbf16, #tpu.memory_space<vmem>>, vector<96x24xbf16>
    tpu.vector_store %arg13[%c384, %c0_40], %66 {strides = array<i32>} : memref<864x24xbf16, #tpu.memory_space<vmem>>, vector<96x24xbf16>,
    %68 = vector.extract_strided_slice %57 {offsets = [0, 8], sizes = [96, 24], strides = [1, 1]} : vector<96x38xbf16> to vector<96x24xbf16>
    %c480 = arith.constant 480 : index
    %c0_41 = arith.constant 0 : index
    %69 = vector.load %arg13[%c480, %c0_41] : memref<864x24xbf16, #tpu.memory_space<vmem>>, vector<96x24xbf16>
    tpu.vector_store %arg13[%c480, %c0_41], %68 {strides = array<i32>} : memref<864x24xbf16, #tpu.memory_space<vmem>>, vector<96x24xbf16>,
    %70 = vector.extract_strided_slice %57 {offsets = [0, 12], sizes = [96, 24], strides = [1, 1]} : vector<96x38xbf16> to vector<96x24xbf16>
    %c576 = arith.constant 576 : index
    %c0_42 = arith.constant 0 : index
    %71 = vector.load %arg13[%c576, %c0_42] : memref<864x24xbf16, #tpu.memory_space<vmem>>, vector<96x24xbf16>
    tpu.vector_store %arg13[%c576, %c0_42], %70 {strides = array<i32>} : memref<864x24xbf16, #tpu.memory_space<vmem>>, vector<96x24xbf16>,
    %72 = vector.extract_strided_slice %57 {offsets = [0, 13], sizes = [96, 24], strides = [1, 1]} : vector<96x38xbf16> to vector<96x24xbf16>
    %c672 = arith.constant 672 : index
    %c0_43 = arith.constant 0 : index
    %73 = vector.load %arg13[%c672, %c0_43] : memref<864x24xbf16, #tpu.memory_space<vmem>>, vector<96x24xbf16>
    tpu.vector_store %arg13[%c672, %c0_43], %72 {strides = array<i32>} : memref<864x24xbf16, #tpu.memory_space<vmem>>, vector<96x24xbf16>,
    %74 = vector.extract_strided_slice %57 {offsets = [0, 14], sizes = [96, 24], strides = [1, 1]} : vector<96x38xbf16> to vector<96x24xbf16>
    %c768 = arith.constant 768 : index
    %c0_44 = arith.constant 0 : index
    %75 = vector.load %arg13[%c768, %c0_44] : memref<864x24xbf16, #tpu.memory_space<vmem>>, vector<96x24xbf16>
    tpu.vector_store %arg13[%c768, %c0_44], %74 {strides = array<i32>} : memref<864x24xbf16, #tpu.memory_space<vmem>>, vector<96x24xbf16>,
    %c0_45 = arith.constant 0 : index
    %c0_46 = arith.constant 0 : index
    %76 = vector.load %arg5[%c0_45, %c0_46] : memref<32x864xbf16, #tpu.memory_space<vmem>>, vector<32x864xbf16>
    %c0_47 = arith.constant 0 : index
    %c0_48 = arith.constant 0 : index
    %77 = vector.load %arg13[%c0_47, %c0_48] : memref<864x24xbf16, #tpu.memory_space<vmem>>, vector<864x24xbf16>
    %cst_49 = arith.constant dense<0.000000e+00> : vector<32x24xf32>
    %78 = tpu.matmul %76, %77, %cst_49 {dimension_numbers = #tpu.dot_dimension_numbers<[1], [0], [0], [1], [0, 0, 1, 1], [], []>} : vector<32x864xbf16>, vector<864x24xbf16>, vector<32x24xf32> -> vector<32x24xf32>
    %c0_50 = arith.constant 0 : index
    %c0_51 = arith.constant 0 : index
    %79 = vector.load %arg6[%c0_50, %c0_51] : memref<1x24xf32, #tpu.memory_space<vmem>>, vector<1x24xf32>
    %80 = vector.broadcast %79 : vector<1x24xf32> to vector<32x24xf32>
    %81 = arith.mulf %78, %80 : vector<32x24xf32>
    %cst_52 = arith.constant dense<0.000000e+00> : vector<32xf32>
    %82 = vector.multi_reduction <add>, %81, %cst_52 [1] : vector<32x24xf32> to vector<32xf32>
    %83 = vector.shape_cast %82 : vector<32xf32> to vector<32x1xf32>
    %cst_53 = arith.constant 6.250000e-02 : f32
    %84 = vector.broadcast %cst_53 : f32 to vector<32x1xf32>
    %85 = arith.mulf %83, %84 : vector<32x1xf32>
    %86 = vector.broadcast %85 : vector<32x1xf32> to vector<32x24xf32>
    %87 = arith.subf %78, %86 : vector<32x24xf32>
    %88 = vector.broadcast %79 : vector<1x24xf32> to vector<32x24xf32>
    %89 = arith.mulf %87, %88 : vector<32x24xf32>
    %c0_54 = arith.constant 0 : index
    %c0_55 = arith.constant 0 : index
    %c0_56 = arith.constant 0 : index
    %c0_57 = arith.constant 0 : index
    %90 = vector.load %arg11[%c0_54, %c0_55, %c0_56, %c0_57] : memref<1x1x32x1xf32, #tpu.memory_space<vmem>>, vector<1x1x32x1xf32>
    %91 = vector.shape_cast %90 : vector<1x1x32x1xf32> to vector<32x1xf32>
    %92 = vector.shape_cast %83 : vector<32x1xf32> to vector<1x1x32x1xf32>
    tpu.vector_store %arg11[%c0_54, %c0_55, %c0_56, %c0_57], %92 {strides = array<i32>} : memref<1x1x32x1xf32, #tpu.memory_space<vmem>>, vector<1x1x32x1xf32>,
    %93 = arith.mulf %89, %89 : vector<32x24xf32>
    %cst_58 = arith.constant dense<0.000000e+00> : vector<32xf32>
    %94 = vector.multi_reduction <add>, %93, %cst_58 [1] : vector<32x24xf32> to vector<32xf32>
    %95 = vector.shape_cast %94 : vector<32xf32> to vector<32x1xf32>
    %c0_59 = arith.constant 0 : index
    %c0_60 = arith.constant 0 : index
    %c0_61 = arith.constant 0 : index
    %c0_62 = arith.constant 0 : index
    %96 = vector.load %arg12[%c0_59, %c0_60, %c0_61, %c0_62] : memref<1x1x32x1xf32, #tpu.memory_space<vmem>>, vector<1x1x32x1xf32>
    %97 = vector.shape_cast %96 : vector<1x1x32x1xf32> to vector<32x1xf32>
    %98 = vector.shape_cast %95 : vector<32x1xf32> to vector<1x1x32x1xf32>
    tpu.vector_store %arg12[%c0_59, %c0_60, %c0_61, %c0_62], %98 {strides = array<i32>} : memref<1x1x32x1xf32, #tpu.memory_space<vmem>>, vector<1x1x32x1xf32>,
    %99 = arith.truncf %78 : vector<32x24xf32> to vector<32x24xbf16>
    %c0_63 = arith.constant 0 : index
    %c0_64 = arith.constant 0 : index
    %c0_65 = arith.constant 0 : index
    %c0_66 = arith.constant 0 : index
    %100 = vector.load %arg10[%c0_63, %c0_64, %c0_65, %c0_66] : memref<1x1x32x24xbf16, #tpu.memory_space<vmem>>, vector<1x1x32x24xbf16>
    %101 = vector.shape_cast %100 : vector<1x1x32x24xbf16> to vector<32x24xbf16>
    %102 = vector.shape_cast %99 : vector<32x24xbf16> to vector<1x1x32x24xbf16>
    tpu.vector_store %arg10[%c0_63, %c0_64, %c0_65, %c0_66], %102 {strides = array<i32>} : memref<1x1x32x24xbf16, #tpu.memory_space<vmem>>, vector<1x1x32x24xbf16>,
    return
  }
  func.func @transform_0(%arg0: i32, %arg1: i32) -> (i32, i32, i32, i32) {
    %c0_i32 = arith.constant 0 : i32
    %0 = arith.addi %arg1, %c0_i32 : i32
    %c1_i32 = arith.constant 1 : i32
    %1 = arith.subi %0, %c1_i32 : i32
    %c0_i32_0 = arith.constant 0 : i32
    %2 = arith.maxsi %1, %c0_i32_0 : i32
    %c3_i32 = arith.constant 3 : i32
    %3 = arith.minsi %2, %c3_i32 : i32
    %c0_i32_1 = arith.constant 0 : i32
    %c0_i32_2 = arith.constant 0 : i32
    %c0_i32_3 = arith.constant 0 : i32
    return %arg0, %3, %c0_i32_1, %c0_i32_2 : i32, i32, i32, i32
  }
  func.func @transform_1(%arg0: i32, %arg1: i32) -> (i32, i32, i32, i32) {
    %c1_i32 = arith.constant 1 : i32
    %0 = arith.addi %arg1, %c1_i32 : i32
    %c1_i32_0 = arith.constant 1 : i32
    %1 = arith.subi %0, %c1_i32_0 : i32
    %c0_i32 = arith.constant 0 : i32
    %2 = arith.maxsi %1, %c0_i32 : i32
    %c3_i32 = arith.constant 3 : i32
    %3 = arith.minsi %2, %c3_i32 : i32
    %c0_i32_1 = arith.constant 0 : i32
    %c0_i32_2 = arith.constant 0 : i32
    %c0_i32_3 = arith.constant 0 : i32
    return %arg0, %3, %c0_i32_1, %c0_i32_2 : i32, i32, i32, i32
  }
  func.func @transform_2(%arg0: i32, %arg1: i32) -> (i32, i32, i32, i32) {
    %c2_i32 = arith.constant 2 : i32
    %0 = arith.addi %arg1, %c2_i32 : i32
    %c1_i32 = arith.constant 1 : i32
    %1 = arith.subi %0, %c1_i32 : i32
    %c0_i32 = arith.constant 0 : i32
    %2 = arith.maxsi %1, %c0_i32 : i32
    %c3_i32 = arith.constant 3 : i32
    %3 = arith.minsi %2, %c3_i32 : i32
    %c0_i32_0 = arith.constant 0 : i32
    %c0_i32_1 = arith.constant 0 : i32
    %c0_i32_2 = arith.constant 0 : i32
    return %arg0, %3, %c0_i32_0, %c0_i32_1 : i32, i32, i32, i32
  }
  func.func @transform_3(%arg0: i32, %arg1: i32) -> (i32, i32) {
    %c0_i32 = arith.constant 0 : i32
    %c0_i32_0 = arith.constant 0 : i32
    %c0_i32_1 = arith.constant 0 : i32
    return %c0_i32, %c0_i32_0 : i32, i32
  }
  func.func @transform_4(%arg0: i32, %arg1: i32) -> (i32, i32) {
    %c0_i32 = arith.constant 0 : i32
    %c0_i32_0 = arith.constant 0 : i32
    %c0_i32_1 = arith.constant 0 : i32
    return %c0_i32, %c0_i32_0 : i32, i32
  }
  func.func @transform_5(%arg0: i32, %arg1: i32) -> (i32, i32) {
    %c0_i32 = arith.constant 0 : i32
    %c0_i32_0 = arith.constant 0 : i32
    %c0_i32_1 = arith.constant 0 : i32
    return %c0_i32, %c0_i32_0 : i32, i32
  }
  func.func @transform_6(%arg0: i32, %arg1: i32) -> (i32, i32) {
    %c0_i32 = arith.constant 0 : i32
    %c0_i32_0 = arith.constant 0 : i32
    %c0_i32_1 = arith.constant 0 : i32
    return %c0_i32, %c0_i32_0 : i32, i32
  }
  func.func @transform_7(%arg0: i32, %arg1: i32) -> (i32, i32) {
    %c0_i32 = arith.constant 0 : i32
    %c0_i32_0 = arith.constant 0 : i32
    %c0_i32_1 = arith.constant 0 : i32
    return %c0_i32, %c0_i32_0 : i32, i32
  }
  func.func @transform_8(%arg0: i32, %arg1: i32) -> (i32, i32, i32, i32) {
    %c0_i32 = arith.constant 0 : i32
    %c0_i32_0 = arith.constant 0 : i32
    %c0_i32_1 = arith.constant 0 : i32
    return %arg0, %arg1, %c0_i32, %c0_i32_0 : i32, i32, i32, i32
  }
  func.func @transform_9(%arg0: i32, %arg1: i32) -> (i32, i32, i32, i32) {
    %c0_i32 = arith.constant 0 : i32
    %c0_i32_0 = arith.constant 0 : i32
    %c0_i32_1 = arith.constant 0 : i32
    return %arg0, %arg1, %c0_i32, %c0_i32_0 : i32, i32, i32, i32
  }
  func.func @transform_10(%arg0: i32, %arg1: i32) -> (i32, i32, i32, i32) {
    %c0_i32 = arith.constant 0 : i32
    %c0_i32_0 = arith.constant 0 : i32
    %c0_i32_1 = arith.constant 0 : i32
    return %arg0, %arg1, %c0_i32, %c0_i32_0 : i32, i32, i32, i32
  }
}

module attributes {stable_mosaic.version = 11 : i64} {
  func.func @kernel(%arg0: i32, %arg1: i32, %arg2: memref<1x4x32x24xbf16, #tpu.memory_space<vmem>>, %arg3: memref<1x4x32x38xbf16, #tpu.memory_space<vmem>>, %arg4: memref<1x32x1xf32, #tpu.memory_space<vmem>>, %arg5: memref<1x32x1xf32, #tpu.memory_space<vmem>>, %arg6: memref<1x4x32x24xf32, #tpu.memory_space<vmem>>) attributes {dimension_semantics = [#tpu.dimension_semantics<parallel>, #tpu.dimension_semantics<parallel>], iteration_bounds = array<i64: 2, 1>, scalar_prefetch = 0 : i64, scratch_operands = 0 : i64, tpu.core_type = #tpu.core_type<tc>, window_params = [{transform_indices = @transform_0, window_bounds = array<i64: 1, 4, 32, 24>}, {transform_indices = @transform_1, window_bounds = array<i64: 1, 4, 32, 38>}, {pipeline_mode = #tpu.pipeline_mode<synchronous>, transform_indices = @transform_2, window_bounds = array<i64: 1, 32, 1>}, {pipeline_mode = #tpu.pipeline_mode<synchronous>, transform_indices = @transform_3, window_bounds = array<i64: 1, 32, 1>}, {transform_indices = @transform_4, window_bounds = array<i64: 1, 4, 32, 24>}]} {
    %c0 = arith.constant 0 : index
    %c0_0 = arith.constant 0 : index
    %c0_1 = arith.constant 0 : index
    %c7 = arith.constant 7 : index
    %0 = vector.load %arg3[%c0, %c0_0, %c0_1, %c7] : memref<1x4x32x38xbf16, #tpu.memory_space<vmem>>, vector<1x4x32x24xbf16>
    %1 = vector.shape_cast %0 : vector<1x4x32x24xbf16> to vector<4x32x24xbf16>
    %2 = arith.extf %1 : vector<4x32x24xbf16> to vector<4x32x24xf32>
    %c0_2 = arith.constant 0 : index
    %c0_3 = arith.constant 0 : index
    %c0_4 = arith.constant 0 : index
    %c0_5 = arith.constant 0 : index
    %3 = vector.load %arg2[%c0_2, %c0_3, %c0_4, %c0_5] : memref<1x4x32x24xbf16, #tpu.memory_space<vmem>>, vector<1x4x32x24xbf16>
    %4 = vector.shape_cast %3 : vector<1x4x32x24xbf16> to vector<4x32x24xbf16>
    %5 = arith.extf %4 : vector<4x32x24xbf16> to vector<4x32x24xf32>
    %c0_6 = arith.constant 0 : index
    %c0_7 = arith.constant 0 : index
    %c0_8 = arith.constant 0 : index
    %6 = vector.load %arg4[%c0_6, %c0_7, %c0_8] : memref<1x32x1xf32, #tpu.memory_space<vmem>>, vector<1x32x1xf32>
    %7 = vector.broadcast %6 : vector<1x32x1xf32> to vector<4x32x24xf32>
    %8 = arith.mulf %5, %7 : vector<4x32x24xf32>
    %c0_9 = arith.constant 0 : index
    %c0_10 = arith.constant 0 : index
    %c0_11 = arith.constant 0 : index
    %9 = vector.load %arg5[%c0_9, %c0_10, %c0_11] : memref<1x32x1xf32, #tpu.memory_space<vmem>>, vector<1x32x1xf32>
    %10 = vector.broadcast %9 : vector<1x32x1xf32> to vector<4x32x24xf32>
    %11 = arith.addf %8, %10 : vector<4x32x24xf32>
    %12 = arith.addf %11, %2 : vector<4x32x24xf32>
    %cst = arith.constant 0.000000e+00 : f32
    %13 = vector.broadcast %cst : f32 to vector<4x32x24xf32>
    %14 = arith.maximumf %12, %13 : vector<4x32x24xf32>
    %c0_12 = arith.constant 0 : index
    %c0_13 = arith.constant 0 : index
    %c0_14 = arith.constant 0 : index
    %c0_15 = arith.constant 0 : index
    %15 = vector.load %arg6[%c0_12, %c0_13, %c0_14, %c0_15] : memref<1x4x32x24xf32, #tpu.memory_space<vmem>>, vector<1x4x32x24xf32>
    %16 = vector.shape_cast %15 : vector<1x4x32x24xf32> to vector<4x32x24xf32>
    %17 = vector.shape_cast %14 : vector<4x32x24xf32> to vector<1x4x32x24xf32>
    tpu.vector_store %arg6[%c0_12, %c0_13, %c0_14, %c0_15], %17 {strides = array<i32>} : memref<1x4x32x24xf32, #tpu.memory_space<vmem>>, vector<1x4x32x24xf32>,
    return
  }
  func.func @transform_0(%arg0: i32, %arg1: i32) -> (i32, i32, i32, i32) {
    %c0_i32 = arith.constant 0 : i32
    %c0_i32_0 = arith.constant 0 : i32
    %c0_i32_1 = arith.constant 0 : i32
    return %arg0, %arg1, %c0_i32, %c0_i32_0 : i32, i32, i32, i32
  }
  func.func @transform_1(%arg0: i32, %arg1: i32) -> (i32, i32, i32, i32) {
    %c0_i32 = arith.constant 0 : i32
    %c0_i32_0 = arith.constant 0 : i32
    %c0_i32_1 = arith.constant 0 : i32
    return %arg0, %arg1, %c0_i32, %c0_i32_0 : i32, i32, i32, i32
  }
  func.func @transform_2(%arg0: i32, %arg1: i32) -> (i32, i32, i32) {
    %c0_i32 = arith.constant 0 : i32
    %c0_i32_0 = arith.constant 0 : i32
    %c0_i32_1 = arith.constant 0 : i32
    %c0_i32_2 = arith.constant 0 : i32
    return %c0_i32, %c0_i32_0, %c0_i32_1 : i32, i32, i32
  }
  func.func @transform_3(%arg0: i32, %arg1: i32) -> (i32, i32, i32) {
    %c0_i32 = arith.constant 0 : i32
    %c0_i32_0 = arith.constant 0 : i32
    %c0_i32_1 = arith.constant 0 : i32
    %c0_i32_2 = arith.constant 0 : i32
    return %c0_i32, %c0_i32_0, %c0_i32_1 : i32, i32, i32
  }
  func.func @transform_4(%arg0: i32, %arg1: i32) -> (i32, i32, i32, i32) {
    %c0_i32 = arith.constant 0 : i32
    %c0_i32_0 = arith.constant 0 : i32
    %c0_i32_1 = arith.constant 0 : i32
    return %arg0, %arg1, %c0_i32, %c0_i32_0 : i32, i32, i32, i32
  }
}

</mosaic_0001>

<bundles_post_ra>
// kernel: basic_block_forward.5
= control target key start
LH: loop header
LB: loop body
LE: loop exit
PB: predicated region body
PF: predicated region fallthrough
CT: control target
= control target key end

     0   :  { %s884_s15 = smov 0   ;;  %s886_s16 = smov 0   ;;  %s1020_s0 = inlined_call_operand.vmem [shape: bf16[2,4,32,24], index: 0, kind: input, shape index: {}]   ;;  %s1021_s1 = inlined_call_operand.vmem [shape: bf16[2,4,32,38], index: 1, kind: input, shape index: {}]   ;;  %s1022_s2 = inlined_call_operand.vmem [shape: f32[1,32,1], index: 2, kind: input, shape index: {}]   ;;  %s1023_s3 = inlined_call_operand.vmem [shape: f32[1,32,1], index: 3, kind: input, shape index: {}]   ;;  %s1024_s4 = inlined_call_operand.vmem [shape: f32[2,4,32,24], index: 4, kind: output, shape index: {}]  }
   0x1   :  { %s888_s17 = smov 0  }
   0x2 LB: > { %s26_s18 = sadd.s32 1, %s851_s16  ;;  %p659_p0 = scmp.ge.s32.totalorder %s855_s17, 1  ;;  %s855_s17 = sphi %s888_s17, %s14_s17   ;;  %s851_s16 = sphi %s886_s16, %s1026_s16   ;;  %s847_s15 = sphi %s884_s15, %s1025_s15  }
   0x3   : > { %p28_p1 = scmp.ge.s32.totalorder %s26_s18, 2  ;;  %p202_p2 = scmp.lt.s32.totalorder %s855_s17, 3 }
   0x5   : > { %s1028_s18 = smov (%p28_p1, %s26_s18), 0  ;;  %p203_p3 = pnand %p659_p0, %p202_p2 }
   0x6   : > { %p249_p4 = scmp.lt.s32.totalorder (!%p203_p3), %s847_s15, 1  ;;  %s858_s13 = smov (!%p203_p3), 121  }
   0x7   : > { %206 = sbr.rel (%p203_p3) target bundleno = 172 (0xac), region = 36 }
   0xc   : > { %v347_v0 = vld [vmem:[%s1022_s2 + $0x10] sm:$0xff]  ;;  %v345_v1 = vld [vmem:[%s1022_s2] sm:$0xff]  ;;  %v857_v2 = vmov 0   ;;  %s1030_s15 = smov (!%p249_p4, %s847_s15), 1  ;;  %v348_v3 = vld [vmem:[%s1022_s2 + $0x18] sm:$0xff]  ;;  %vm521_vm0 = vcmask 195584  }
   0xd   : > { %776 = vset.pattern.permute.xlu1 %v857_v2  ;;  %775 = vset.pattern.permute.xlu0 %v857_v2  ;;  %v346_v4 = vld [vmem:[%s1022_s2 + $0x8] sm:$0xff]  ;;  %s668_s27 = sshll.u32 %s1030_s15, 6  ;;  %v385_v6 = vld [vmem:[%s1023_s3] sm:$0xff]  ;;  %v388_v14 = vld [vmem:[%s1023_s3 + $0x18] sm:$0xff]  ;;  %s670_s21 = sshll.u32 %s1030_s15, 7 }
   0xe   : > { %361 = vperm.xlu1 %776, %v347_v0   ;;  %351 = vperm.xlu0 %775, %v345_v1   ;;  %s922_s30 = scalar_lea.vmem %s1021_s1, %s668_s27  ;;  %v386_v5 = vld [vmem:[%s1023_s3 + $0x8] sm:$0xff]  ;;  %v387_v15 = vld [vmem:[%s1023_s3 + $0x10] sm:$0xff]  ;;  %s257_s20 = scalar_lea.vmem %s1020_s0, %s668_s27 }
   0xf   : > { %v735_v7 = vld [vmem:[%s922_s30 + $0x8] sm:$0xff]   ;;  %v672_v8 = vld [vmem:[%s922_s30] sm:$0xff]   ;;  %v737_v13 = vld [vmem:[%s922_s30 + $0x18] sm:$0xff]   ;;  %s965_s24 = scalar_lea.vmem %s1024_s4, %s670_s21 }
  0x10   : > { %v677_v9 = vunpack.c.l.bf16 %v735_v7  ;;  %v678_v10 = vunpack.c.h.bf16 %v735_v7  ;;  %v673_v11 = vunpack.c.l.bf16 %v672_v8  ;;  %v674_v12 = vunpack.c.h.bf16 %v672_v8  ;;  %v736_v16 = vld [vmem:[%s922_s30 + $0x10] sm:$0xff]   ;;  %v739_v23 = vld [vmem:[%s922_s30 + $0x28] sm:$0xff]   ;;  %v738_v24 = vld [vmem:[%s922_s30 + $0x20] sm:$0xff]  }
  0x11   : > { %v685_v17 = vunpack.c.l.bf16 %v737_v13  ;;  %v686_v18 = vunpack.c.h.bf16 %v737_v13  ;;  %v681_v21 = vunpack.c.l.bf16 %v736_v16  ;;  %v682_v22 = vunpack.c.h.bf16 %v736_v16  ;;  %v741_v31 = vld [vmem:[%s922_s30 + $0x38] sm:$0xff]   ;;  %v740_v32 = vld [vmem:[%s922_s30 + $0x30] sm:$0xff]   ;;  %v742_v45 = vld [vmem:[%s257_s20 + $0x8] sm:$0xff]  }
  0x12   : > { %366 = vperm.xlu1 %776, %v348_v3   ;;  %356 = vperm.xlu0 %775, %v346_v4   ;;  %v782_v19 = vpack.i.bf16 %v678_v10, %v677_v9  ;;  %v777_v20 = vpack.i.bf16 %v674_v12, %v673_v11  ;;  %v693_v25 = vunpack.c.l.bf16 %v739_v23  ;;  %v694_v26 = vunpack.c.h.bf16 %v739_v23  ;;  %v744_v46 = vld [vmem:[%s257_s20 + $0x18] sm:$0xff]   ;;  %v746_v47 = vld [vmem:[%s257_s20 + $0x28] sm:$0xff]   ;;  %v704_v49 = vld [vmem:[%s257_s20] sm:$0xff]  }
  0x13   : > { %v792_v27 = vpack.i.bf16 %v686_v18, %v685_v17  ;;  %v787_v28 = vpack.i.bf16 %v682_v22, %v681_v21  ;;  %v689_v29 = vunpack.c.l.bf16 %v738_v24  ;;  %v690_v30 = vunpack.c.h.bf16 %v738_v24  ;;  %v748_v48 = vld [vmem:[%s257_s20 + $0x38] sm:$0xff]   ;;  %v743_v50 = vld [vmem:[%s257_s20 + $0x10] sm:$0xff]   ;;  %v745_v51 = vld [vmem:[%s257_s20 + $0x20] sm:$0xff]  }
  0x14   : > { %v802_v33 = vpack.i.bf16 %v694_v26, %v693_v25  ;;  %v701_v34 = vunpack.c.l.bf16 %v741_v31  ;;  %v702_v36 = vunpack.c.h.bf16 %v741_v31  ;;  %v697_v37 = vunpack.c.l.bf16 %v740_v32  ;;  %v747_v53 = vld [vmem:[%s257_s20 + $0x30] sm:$0xff]  }
  0x15   : > { %v797_v35 = vpack.i.bf16 %v690_v30, %v689_v29  ;;  %v698_v38 = vunpack.c.h.bf16 %v740_v32  ;;  %v709_v52 = vunpack.c.l.bf16 %v742_v45  ;;  %v717_v56 = vunpack.c.l.bf16 %v744_v46 }
  0x16   : > { %396 = vperm.xlu1 %776, %v386_v5   ;;  %391 = vperm.xlu0 %775, %v385_v6   ;;  %v812_v39 = vpack.i.bf16 %v702_v36, %v701_v34  ;;  %v725_v57 = vunpack.c.l.bf16 %v746_v47  ;;  %v733_v58 = vunpack.c.l.bf16 %v748_v48  ;;  %v705_v59 = vunpack.c.l.bf16 %v704_v49 }
  0x17   : > { %v807_v40 = vpack.i.bf16 %v698_v38, %v697_v37  ;;  %v713_v60 = vunpack.c.l.bf16 %v743_v50  ;;  %v721_v61 = vunpack.c.l.bf16 %v745_v51  ;;  %v710_v62 = vunpack.c.h.bf16 %v742_v45 }
  0x18   : > { %v706_v63 = vunpack.c.h.bf16 %v704_v49  ;;  %v729_v0 = vunpack.c.l.bf16 %v747_v53  ;;  %v718_v1 = vunpack.c.h.bf16 %v744_v46  ;;  %v726_v2 = vunpack.c.h.bf16 %v746_v47 }
  0x19   : > { %v734_v3 = vunpack.c.h.bf16 %v748_v48  ;;  %v714_v4 = vunpack.c.h.bf16 %v743_v50  ;;  %v722_v5 = vunpack.c.h.bf16 %v745_v51  ;;  %v730_v6 = vunpack.c.h.bf16 %v747_v53 }
  0x1a   : > { %406 = vperm.xlu1 %776, %v388_v14   ;;  %401 = vperm.xlu0 %775, %v387_v15  }
  0x1e   : > { %783 = vrot.lane.b32.xlu1 %v782_v19, %s858_s13  ;;  %778 = vrot.lane.b32.xlu0 %v777_v20, %s858_s13 }
  0x22   : > { %793 = vrot.lane.b32.xlu1 %v792_v27, %s858_s13  ;;  %788 = vrot.lane.b32.xlu0 %v787_v28, %s858_s13 }
  0x26   : > { %803 = vrot.lane.b32.xlu1 %v802_v33, %s858_s13  ;;  %798 = vrot.lane.b32.xlu0 %v797_v35, %s858_s13 }
  0x2a   : > { %813 = vrot.lane.b32.xlu1 %v812_v39, %s858_s13  ;;  %808 = vrot.lane.b32.xlu0 %v807_v40, %s858_s13 }
  0x89   : > { %v362_v41 = vpop.permute.xlu1 %361  ;;  %v352_v42 = vpop.permute.xlu0 %351 }
  0x8a   : > { %v371_v9 = vmul.f32 %v709_v52, %v362_v41  ;;  %v375_v10 = vmul.f32 %v717_v56, %v362_v41  ;;  %v379_v11 = vmul.f32 %v725_v57, %v362_v41  ;;  %v383_v12 = vmul.f32 %v733_v58, %v362_v41 }
  0x8b   : > { %v369_v13 = vmul.f32 %v705_v59, %v352_v42  ;;  %v373_v14 = vmul.f32 %v713_v60, %v352_v42  ;;  %v377_v17 = vmul.f32 %v721_v61, %v352_v42  ;;  %v381_v18 = vmul.f32 %v729_v0, %v352_v42 }
  0x8d   : > { %v367_v43 = vpop.permute.xlu1 %366  ;;  %v357_v44 = vpop.permute.xlu0 %356 }
  0x8e   : > { %v372_v15 = vmul.f32 %v710_v62, %v367_v43  ;;  %v370_v16 = vmul.f32 %v706_v63, %v357_v44  ;;  %v376_v19 = vmul.f32 %v718_v1, %v367_v43  ;;  %v380_v20 = vmul.f32 %v726_v2, %v367_v43 }
  0x8f   : > { %v384_v27 = vmul.f32 %v734_v3, %v367_v43  ;;  %v374_v28 = vmul.f32 %v714_v4, %v357_v44  ;;  %v378_v29 = vmul.f32 %v722_v5, %v357_v44  ;;  %v382_v30 = vmul.f32 %v730_v6, %v357_v44 }
  0x91   : > { %v949_v54 = vpop.permute.xlu1 %396  ;;  %v951_v55 = vpop.permute.xlu0 %391 }
  0x92   : > { %v409_v25 = vadd.f32 %v951_v55, %v369_v13  ;;  %v410_v26 = vadd.f32 %v949_v54, %v370_v16  ;;  %v413_v39 = vadd.f32 %v951_v55, %v373_v14  ;;  %v414_v40 = vadd.f32 %v949_v54, %v374_v28 }
  0x93   : > { %v417_v47 = vadd.f32 %v951_v55, %v377_v17  ;;  %v418_v48 = vadd.f32 %v949_v54, %v378_v29  ;;  %v421_v5 = vadd.f32 %v951_v55, %v381_v18  ;;  %v422_v6 = vadd.f32 %v949_v54, %v382_v30 }
  0x95   : > { %v953_v7 = vpop.permute.xlu1 %406  ;;  %v955_v8 = vpop.permute.xlu0 %401 }
  0x96   : > { %v411_v22 = vadd.f32 %v955_v8, %v371_v9  ;;  %v412_v23 = vadd.f32 %v953_v7, %v372_v15  ;;  %v415_v36 = vadd.f32 %v955_v8, %v375_v10  ;;  %v416_v37 = vadd.f32 %v953_v7, %v376_v19 }
  0x97   : > { %v419_v45 = vadd.f32 %v955_v8, %v379_v11  ;;  %v420_v46 = vadd.f32 %v953_v7, %v380_v20  ;;  %v423_v2 = vadd.f32 %v955_v8, %v383_v12  ;;  %v424_v3 = vadd.f32 %v953_v7, %v384_v27 }
  0x99   : > { %v784_v21 = vpop.permute.xlu1 %783  ;;  %v779_v24 = vpop.permute.xlu0 %778 }
  0x9a   : > { %v817_v31 = vadd.low.f32.bf16 %v411_v22, %v784_v21  ;;  %v818_v32 = vadd.high.f32.bf16 %v412_v23, %v784_v21  ;;  %v819_v33 = vadd.low.f32.bf16 %v409_v25, %v779_v24  ;;  %v820_v34 = vadd.high.f32.bf16 %v410_v26, %v779_v24 }
  0x9c   : > { %v507_v41 = vmax.f32 %v817_v31, 0.0  ;;  %v508_v42 = vmax.f32 %v818_v32, 0.0  ;;  %v505_v43 = vmax.f32 %v819_v33, 0.0  ;;  %v506_v44 = vmax.f32 %v820_v34, 0.0 }
  0x9d   : > { %v794_v35 = vpop.permute.xlu1 %793  ;;  %v789_v38 = vpop.permute.xlu0 %788 }
  0x9e   : > { %524 = vst.msk [vmem:[%s965_s24 + $0x10] sm:$0xff] %vm521_vm0, %v507_v41  ;;  %525 = vst.msk [vmem:[%s965_s24 + $0x18] sm:$0xff] %vm521_vm0, %v508_v42  ;;  %v821_v49 = vadd.low.f32.bf16 %v415_v36, %v794_v35  ;;  %v822_v50 = vadd.high.f32.bf16 %v416_v37, %v794_v35  ;;  %v823_v51 = vadd.low.f32.bf16 %v413_v39, %v789_v38 }
  0x9f   : > { %522 = vst.msk [vmem:[%s965_s24] sm:$0xff] %vm521_vm0, %v505_v43  ;;  %523 = vst.msk [vmem:[%s965_s24 + $0x8] sm:$0xff] %vm521_vm0, %v506_v44  ;;  %v824_v52 = vadd.high.f32.bf16 %v414_v40, %v789_v38 }
  0xa0   : > { %v511_v57 = vmax.f32 %v821_v49, 0.0  ;;  %v512_v58 = vmax.f32 %v822_v50, 0.0  ;;  %v509_v59 = vmax.f32 %v823_v51, 0.0 }
  0xa1   : > { %v804_v53 = vpop.permute.xlu1 %803  ;;  %v799_v56 = vpop.permute.xlu0 %798  ;;  %v510_v60 = vmax.f32 %v824_v52, 0.0 }
  0xa2   : > { %v825_v61 = vadd.low.f32.bf16 %v419_v45, %v804_v53  ;;  %v826_v62 = vadd.high.f32.bf16 %v420_v46, %v804_v53  ;;  %v827_v63 = vadd.low.f32.bf16 %v417_v47, %v799_v56  ;;  %v828_v0 = vadd.high.f32.bf16 %v418_v48, %v799_v56  ;;  %528 = vst.msk [vmem:[%s965_s24 + $0x30] sm:$0xff] %vm521_vm0, %v511_v57 }
  0xa3   : > { %529 = vst.msk [vmem:[%s965_s24 + $0x38] sm:$0xff] %vm521_vm0, %v512_v58  ;;  %526 = vst.msk [vmem:[%s965_s24 + $0x20] sm:$0xff] %vm521_vm0, %v509_v59 }
  0xa4   : > { %527 = vst.msk [vmem:[%s965_s24 + $0x28] sm:$0xff] %vm521_vm0, %v510_v60  ;;  %v515_v9 = vmax.f32 %v825_v61, 0.0  ;;  %v516_v10 = vmax.f32 %v826_v62, 0.0  ;;  %v513_v11 = vmax.f32 %v827_v63, 0.0  ;;  %v514_v13 = vmax.f32 %v828_v0, 0.0 }
  0xa5   : > { %v814_v1 = vpop.permute.xlu1 %813  ;;  %v809_v4 = vpop.permute.xlu0 %808 }
  0xa6   : > { %532 = vst.msk [vmem:[%s965_s24 + $0x50] sm:$0xff] %vm521_vm0, %v515_v9  ;;  %533 = vst.msk [vmem:[%s965_s24 + $0x58] sm:$0xff] %vm521_vm0, %v516_v10  ;;  %v829_v7 = vadd.low.f32.bf16 %v423_v2, %v814_v1  ;;  %v830_v55 = vadd.high.f32.bf16 %v424_v3, %v814_v1  ;;  %v831_v8 = vadd.low.f32.bf16 %v421_v5, %v809_v4 }
  0xa7   : > { %530 = vst.msk [vmem:[%s965_s24 + $0x40] sm:$0xff] %vm521_vm0, %v513_v11  ;;  %531 = vst.msk [vmem:[%s965_s24 + $0x48] sm:$0xff] %vm521_vm0, %v514_v13  ;;  %v832_v54 = vadd.high.f32.bf16 %v422_v6, %v809_v4 }
  0xa8   : > { %v519_v12 = vmax.f32 %v829_v7, 0.0  ;;  %v520_v14 = vmax.f32 %v830_v55, 0.0  ;;  %v517_v15 = vmax.f32 %v831_v8, 0.0 }
  0xa9   : > { %v518_v16 = vmax.f32 %v832_v54, 0.0 }
  0xaa   : > { %536 = vst.msk [vmem:[%s965_s24 + $0x70] sm:$0xff] %vm521_vm0, %v519_v12  ;;  %537 = vst.msk [vmem:[%s965_s24 + $0x78] sm:$0xff] %vm521_vm0, %v520_v14 }
  0xab   : > { %534 = vst.msk [vmem:[%s965_s24 + $0x60] sm:$0xff] %vm521_vm0, %v517_v15  ;;  %535 = vst.msk [vmem:[%s965_s24 + $0x68] sm:$0xff] %vm521_vm0, %v518_v16 }
  0xac PF: > { %s14_s17 = sadd.s32 1, %s855_s17   ;;  %s1025_s15 = smov %s851_s16 }
  0xad   : > { %p11_p5 = scmp.ge.s32.totalorder %s14_s17, 4   ;;  %s1026_s16 = smov %s1028_s18 }
  0xaf   :  { %13 = sbr.rel (!%p11_p5) target bundleno = 2 (0x2), region = 69 }

// kernel: basic_block_forward.3
= control target key start
LH: loop header
LB: loop body
LE: loop exit
PB: predicated region body
PF: predicated region fallthrough
CT: control target
= control target key end

     0   :  { %s2569_s24 = smov 0   ;;  %s2571_s25 = smov 0   ;;  %s3078_s0 = inlined_call_operand.vmem [shape: bf16[2,4,32,38], index: 0, kind: input, shape index: {}, may-alias: {0,1,2}]   ;;  %s3079_s1 = inlined_call_operand.vmem [shape: bf16[2,4,32,38], index: 1, kind: input, shape index: {}, may-alias: {0,1,2}]   ;;  %s3080_s2 = inlined_call_operand.vmem [shape: bf16[2,4,32,38], index: 2, kind: input, shape index: {}, may-alias: {0,1,2}]   ;;  %s3081_s3 = inlined_call_operand.vmem [shape: bf16[32,864], index: 3, kind: input, shape index: {}]   ;;  %s3082_s4 = inlined_call_operand.vmem [shape: f32[1,24], index: 4, kind: input, shape index: {}]   ;;  %s3083_s5 = inlined_call_operand.vmem [shape: bf16[2,4,32,38], index: 5, kind: output, shape index: {0}]   ;;  %s3084_s6 = inlined_call_operand.vmem [shape: f32[2,4,32,1], index: 6, kind: output, shape index: {1}]   ;;  %s3085_s7 = inlined_call_operand.vmem [shape: f32[2,4,32,1], index: 7, kind: output, shape index: {2}]  }
   0x1   :  { %s2573_s26 = smov 0   ;;  %s2575_s27 = smov 0  }
   0x2   :  { %s2577_s28 = smov 0  }
   0x3 LB: > { %s27_s29 = sadd.s32 1, %s2510_s26  ;;  %s30_s30 = sadd.s32 1, %s2514_s27  ;;  %s2518_s28 = sphi %s2577_s28, %s18_s28   ;;  %s2514_s27 = sphi %s2575_s27, %s3090_s27   ;;  %s2510_s26 = sphi %s2573_s26, %s3089_s26   ;;  %s2506_s25 = sphi %s2571_s25, %s3088_s25   ;;  %s2502_s24 = sphi %s2569_s24, %s3087_s24  }
   0x4   : > { %p28_p0 = scmp.ge.s32.totalorder %s27_s29, 4  ;;  %p2103_p1 = scmp.ge.s32.totalorder %s2518_s28, 1 }
   0x5   : > { %p354_p2 = scmp.lt.s32.totalorder %s2518_s28, 9 }
   0x6   : > { %s3092_s29 = smov (%p28_p0, %s27_s29), 0  ;;  %s3094_s30 = smov (!%p28_p0, %s30_s30), %s2514_s27 }
   0x7   : > { %p355_p3 = pnand %p2103_p1, %p354_p2  ;;  %p32_p4 = scmp.ge.s32.totalorder %s3094_s30, 2 }
   0x8   : > { %p449_p5 = scmp.lt.s32.totalorder (!%p355_p3), %s2506_s25, 1  ;;  %p463_p6 = scmp.gt.s32.totalorder (!%p355_p3), %s2502_s24, 0 }
   0x9   : > { %s3096_s30 = smov (%p32_p4, %s3094_s30), 0  ;;  %358 = sbr.rel (%p355_p3) target bundleno = 848 (0x350), region = 40 }
   0xa   : > { %p2112_p7 = scmp.lt.s32.totalorder (!%p355_p3), %s2502_s24, 3  ;;  %s444_s10 = sadd.s32 (!%p355_p3), 4294967295, %s2502_s24 }
   0xb   : > { %p445_p8 = scmp.gt.s32.totalorder (!%p355_p3), %s444_s10, 0  ;;  %p2104_p9 = scmp.lt.s32.totalorder (!%p355_p3), %s444_s10, 3 }
   0xc   : > { %p532_p11 = scmp.ge.s32.totalorder (!%p355_p3), %s444_s10, 0  ;;  %p533_p12 = scmp.le.s32.totalorder (!%p355_p3), %s444_s10, 3 }
   0xd   : > { %s2520_s19 = smov (!%p355_p3), 126   ;;  %s480_s22 = sadd.s32 (!%p355_p3), 1, %s2502_s24 }
   0xe   : > { %s3098_s25 = smov (!%p449_p5, %s2506_s25), 1  ;;  %p2610_p0 = pnand %p533_p12, %p532_p11  ;;  %vm611_vm0 = vcmask 191488   ;;  %v2434_v30 = vld [vmem:[%s3081_s3 + $0x4] ss:$28 sps:$4 sm:$0xff]   ;;  %v2455_v53 = vld [vmem:[%s3081_s3 + $0xc] ss:$28 sps:$4 sm:$0xff]  }
   0xf   : > { %s464_s8 = scalar_select %p463_p6, %s2502_s24, 0  ;;  %1565 = vmatprep.mubr.bf16.mxu0 %v2434_v30  ;;  %1614 = vmatprep.mubr.bf16.mxu1 %v2455_v53  ;;  %vm1526_vm3 = vcmask 785408   ;;  %vm1740_vm4 = vcmask 195584   ;;  %vm1765_vm5 = vcmask 7168   ;;  %vm1798_vm6 = vcmask 56320  }
  0x10   : > { %s2604_s9 = sshll.u32 %s3098_s25, 4  ;;  %p481_p1 = scmp.gt.s32.totalorder %s480_s22, 0  ;;  %vm1804_vm7 = vcmask 252928   ;;  %vm1821_vm8 = vcmask 306176  }
  0x11   : > { %s3100_s8 = smov (!%p2112_p7, %s464_s8), 3  ;;  %p2120_p2 = scmp.lt.s32.totalorder %s480_s22, 3 }
  0x12   : > { %p469_p10 = scmp.lt.s32.totalorder %s3100_s8, 3  ;;  %p552_p3 = scmp.ge.s32.totalorder %s480_s22, 0 }
  0x13   : > { %s446_s11 = scalar_select %p445_p8, %s444_s10, 0 }
  0x14   : > { %s3102_s8 = smov (!%p469_p10, %s3100_s8), 3  ;;  %p553_p4 = scmp.le.s32.totalorder %s480_s22, 3 }
  0x15   : > { %s3104_s11 = smov (!%p2104_p9, %s446_s11), 3  ;;  %s2117_s12 = sshll.u32 %s3102_s8, 2 }
  0x16   : > { %s473_s13 = sadd.s32 %s2117_s12, %s2604_s9  ;;  %p451_p13 = scmp.lt.s32.totalorder %s3104_s11, 3 }
  0x17   : > { %s2119_s14 = sshll.u32 %s473_s13, 2  ;;  %s2521_s13 = smov 127  }
  0x18   : > { %s475_s18 = scalar_lea.vmem %s3079_s1, %s2119_s14  ;;  %s3106_s11 = smov (!%p451_p13, %s3104_s11), 3 }
  0x19   : > { %v2617_v0 = vld [vmem:[%s475_s18 + $0x8] ss:$0 sps:$4 sm:$0xff]   ;;  %v2619_v1 = vld [vmem:[%s475_s18 + $0x4] ss:$0 sps:$4 sm:$0xff]   ;;  %v2621_v2 = vld [vmem:[%s475_s18 + $0xc] ss:$0 sps:$4 sm:$0xff]   ;;  %p554_p5 = pnand %p553_p4, %p552_p3 }
  0x1a   : > { %684 = vrot.lane.b32.xlu0 %v2617_v0, %s2520_s19  ;;  %v2625_v3 = vld [vmem:[%s475_s18] ss:$0 sps:$4 sm:$0xff]   ;;  %618 = vst.msk [vmem:[#allocation2 + $0x18] sm:$0xf] %vm611_vm0, %v2617_v0  ;;  %682 = vrot.lane.b32.xlu1 %v2619_v1, %s2520_s19  ;;  %s2137_s20 = scalar_select %p2610_p0, 0, 1 }
  0x1b   : > { %617 = vst.msk [vmem:[#allocation2 + $0x14] sm:$0xf] %vm611_vm0, %v2619_v1  ;;  %619 = vst.msk [vmem:[#allocation2 + $0x1c] sm:$0xf] %vm611_vm0, %v2621_v2  ;;  %s2109_s21 = sshll.u32 %s3106_s11, 2  ;;  %s2525_s8 = smov 115  }
  0x1c   : > { %616 = vst.msk [vmem:[#allocation2 + $0x10] sm:$0xf] %vm611_vm0, %v2625_v3  ;;  %s455_s23 = sadd.s32 %s2604_s9, %s2109_s21  ;;  %v537_v4 = vstv %s2137_s20  ;;  %s3112_s24 = smov (!%p2112_p7, %s2502_s24), 3 }
  0x1d   : > { %s2111_s25 = sshll.u32 %s455_s23, 2  ;;  %vm538_vm1 = vcmp.eq.s32.totalorder %v537_v4, 1  ;;  %s2523_s23 = smov 122  }
  0x1e   : > { %686 = vrot.lane.b32.xlu0 %v2621_v2, %s2520_s19  ;;  %s457_s12 = scalar_lea.vmem %s3078_s0, %s2111_s25  ;;  %s2524_s25 = smov 121  }
  0x1f   : > { %v529_v5 = vld [vmem:[%s457_s12 + $0x8] sm:$0xf]  ;;  %v530_v6 = vld [vmem:[%s457_s12 + $0xc] sm:$0xf]  ;;  %v528_v7 = vld [vmem:[%s457_s12 + $0x4] sm:$0xf] }
  0x20   : > { %v541_v8 = vsel %vm538_vm1, %v529_v5, 0  ;;  %v542_v9 = vsel %vm538_vm1, %v530_v6, 0  ;;  %v540_v10 = vsel %vm538_vm1, %v528_v7, 0  ;;  %v527_v11 = vld [vmem:[%s457_s12] sm:$0xf]  ;;  %s482_s11 = scalar_select %p481_p1, %s480_s22, 0 }
  0x21   : > { %v2650_v12 = vcombine.low %v541_v8, %v541_v8  ;;  %v2654_v13 = vcombine.low %v542_v9, %v542_v9  ;;  %v2656_v14 = vcombine.low %v540_v10, %v540_v10  ;;  %v539_v15 = vsel %vm538_vm1, %v527_v11, 0  ;;  %s2138_s14 = scalar_select %p554_p5, 0, 1 }
  0x22   : > { %680 = vrot.lane.b32.xlu0 %v2625_v3, %s2520_s19  ;;  %v2659_v16 = vcombine.low %v539_v15, %v539_v15  ;;  %s3108_s11 = smov (!%p2120_p2, %s482_s11), 3  ;;  %s2522_s22 = smov 120   ;;  %v2416_v58 = vld [vmem:[#allocation2 + $0x18] sm:$0xff]  }
  0x23   : > { %628 = vrot.lane.b32.xlu1 %v2650_v12, %s2521_s13  ;;  %613 = vst.msk [vmem:[#allocation2 + $0x4] sm:$0xf] %vm611_vm0, %v2656_v14  ;;  %614 = vst.msk [vmem:[#allocation2 + $0x8] sm:$0xf] %vm611_vm0, %v2650_v12  ;;  %p487_p6 = scmp.lt.s32.totalorder %s3108_s11, 3  ;;  %v557_v17 = vstv %s2138_s14  ;;  %v2420_v62 = vld [vmem:[#allocation2 + $0x10] sm:$0xff]  }
  0x24   : > { %615 = vst.msk [vmem:[#allocation2 + $0xc] sm:$0xf] %vm611_vm0, %v2654_v13  ;;  %612 = vst.msk [vmem:[#allocation2] sm:$0xf] %vm611_vm0, %v2659_v16  ;;  %vm558_vm2 = vcmp.eq.s32.totalorder %v557_v17, 1 }
  0x25   : > { %s3110_s11 = smov (!%p487_p6, %s3108_s11), 3 }
  0x26   : > { %624 = vrot.lane.b32.xlu0 %v2659_v16, %s2521_s13  ;;  %s2125_s15 = sshll.u32 %s3110_s11, 2  ;;  %s2526_s11 = smov 116  }
  0x27   : > { %630 = vrot.lane.b32.xlu1 %v2654_v13, %s2521_s13  ;;  %s491_s16 = sadd.s32 %s2125_s15, %s2604_s9 }
  0x28   : > { %s2127_s17 = sshll.u32 %s491_s16, 2 }
  0x29   : > { %s493_s21 = scalar_lea.vmem %s3080_s2, %s2127_s17 }
  0x2a   : > { %676 = vrot.lane.b32.xlu0 %v2650_v12, %s2520_s19  ;;  %v550_v18 = vld [vmem:[%s493_s21 + $0xc] sm:$0xf]  ;;  %v549_v19 = vld [vmem:[%s493_s21 + $0x8] sm:$0xf]  ;;  %v548_v20 = vld [vmem:[%s493_s21 + $0x4] sm:$0xf] }
  0x2b   : > { %626 = vrot.lane.b32.xlu1 %v2656_v14, %s2521_s13  ;;  %v562_v21 = vsel %vm558_vm2, %v550_v18, 0  ;;  %v561_v22 = vsel %vm558_vm2, %v549_v19, 0  ;;  %v560_v23 = vsel %vm558_vm2, %v548_v20, 0  ;;  %v547_v24 = vld [vmem:[%s493_s21] sm:$0xf]  ;;  %v2424_v15 = vld [vmem:[#allocation2 + $0x8] sm:$0xff]  }
  0x2c   : > { %v2687_v25 = vcombine.low %v562_v21, %v562_v21  ;;  %v2689_v26 = vcombine.low %v561_v22, %v561_v22  ;;  %v2691_v27 = vcombine.low %v560_v23, %v560_v23  ;;  %v559_v28 = vsel %vm558_vm2, %v547_v24, 0 }
  0x2d   : > { %v2695_v29 = vcombine.low %v559_v28, %v559_v28 }
  0x2e   : > { %672 = vrot.lane.b32.xlu0 %v2659_v16, %s2520_s19  ;;  %621 = vst.msk [vmem:[#allocation2 + $0x24] sm:$0xf] %vm611_vm0, %v2691_v27  ;;  %622 = vst.msk [vmem:[#allocation2 + $0x28] sm:$0xf] %vm611_vm0, %v2689_v26 }
  0x2f   : > { %678 = vrot.lane.b32.xlu1 %v2654_v13, %s2520_s19  ;;  %623 = vst.msk [vmem:[#allocation2 + $0x2c] sm:$0xf] %vm611_vm0, %v2687_v25  ;;  %620 = vst.msk [vmem:[#allocation2 + $0x20] sm:$0xf] %vm611_vm0, %v2695_v29 }
  0x32   : > { %644 = vrot.lane.b32.xlu0 %v2689_v26, %s2521_s13 }
  0x33   : > { %674 = vrot.lane.b32.xlu1 %v2656_v14, %s2520_s19 }
  0x36   : > { %640 = vrot.lane.b32.xlu0 %v2695_v29, %s2521_s13  ;;  %v2412_v49 = vld [vmem:[#allocation2 + $0x28] sm:$0xff]   ;;  %v2414_v54 = vld [vmem:[#allocation2 + $0x20] sm:$0xff]  }
  0x37   : > { %646 = vrot.lane.b32.xlu1 %v2687_v25, %s2521_s13 }
  0x3a   : > { %820 = vrot.lane.b32.xlu0 %v2650_v12, %s2522_s22 }
  0x3b   : > { %642 = vrot.lane.b32.xlu1 %v2691_v27, %s2521_s13 }
  0x3e   : > { %740 = vrot.lane.b32.xlu0 %v2689_v26, %s2523_s23 }
  0x3f   : > { %822 = vrot.lane.b32.xlu1 %v2654_v13, %s2522_s22 }
  0x42   : > { %636 = vrot.lane.b32.xlu0 %v2617_v0, %s2521_s13 }
  0x43   : > { %742 = vrot.lane.b32.xlu1 %v2687_v25, %s2523_s23 }
  0x46   : > { %816 = vrot.lane.b32.xlu0 %v2659_v16, %s2522_s22 }
  0x47   : > { %638 = vrot.lane.b32.xlu1 %v2621_v2, %s2521_s13 }
  0x4a   : > { %736 = vrot.lane.b32.xlu0 %v2695_v29, %s2523_s23 }
  0x4b   : > { %818 = vrot.lane.b32.xlu1 %v2656_v14, %s2522_s22 }
  0x4e   : > { %632 = vrot.lane.b32.xlu0 %v2625_v3, %s2521_s13 }
  0x4f   : > { %738 = vrot.lane.b32.xlu1 %v2691_v27, %s2523_s23 }
  0x52   : > { %788 = vrot.lane.b32.xlu0 %v2689_v26, %s2524_s25 }
  0x53   : > { %634 = vrot.lane.b32.xlu1 %v2619_v1, %s2521_s13 }
  0x56   : > { %732 = vrot.lane.b32.xlu0 %v2617_v0, %s2523_s23 }
  0x57   : > { %790 = vrot.lane.b32.xlu1 %v2687_v25, %s2524_s25 }
  0x5a   : > { %784 = vrot.lane.b32.xlu0 %v2695_v29, %s2524_s25 }
  0x5b   : > { %734 = vrot.lane.b32.xlu1 %v2621_v2, %s2523_s23 }
  0x5e   : > { %932 = vrot.lane.b32.xlu0 %v2689_v26, %s2525_s8 }
  0x5f   : > { %786 = vrot.lane.b32.xlu1 %v2691_v27, %s2524_s25 }
  0x62   : > { %728 = vrot.lane.b32.xlu0 %v2625_v3, %s2523_s23 }
  0x63   : > { %934 = vrot.lane.b32.xlu1 %v2687_v25, %s2525_s8 }
  0x66   : > { %876 = vrot.lane.b32.xlu0 %v2617_v0, %s2526_s11 }
  0x67   : > { %730 = vrot.lane.b32.xlu1 %v2619_v1, %s2523_s23 }
  0x6a   : > { %780 = vrot.lane.b32.xlu0 %v2617_v0, %s2524_s25 }
  0x6b   : > { %878 = vrot.lane.b32.xlu1 %v2621_v2, %s2526_s11 }
  0x6e   : > { %928 = vrot.lane.b32.xlu0 %v2695_v29, %s2525_s8 }
  0x6f   : > { %782 = vrot.lane.b32.xlu1 %v2621_v2, %s2524_s25 }
  0x72   : > { %724 = vrot.lane.b32.xlu0 %v2650_v12, %s2523_s23 }
  0x73   : > { %930 = vrot.lane.b32.xlu1 %v2691_v27, %s2525_s8 }
  0x76   : > { %872 = vrot.lane.b32.xlu0 %v2625_v3, %s2526_s11 }
  0x77   : > { %726 = vrot.lane.b32.xlu1 %v2654_v13, %s2523_s23 }
  0x7a   : > { %776 = vrot.lane.b32.xlu0 %v2625_v3, %s2524_s25 }
  0x7b   : > { %874 = vrot.lane.b32.xlu1 %v2619_v1, %s2526_s11 }
  0x7e   : > { %924 = vrot.lane.b32.xlu0 %v2617_v0, %s2525_s8 }
  0x7f   : > { %778 = vrot.lane.b32.xlu1 %v2619_v1, %s2524_s25 }
  0x82   : > { %720 = vrot.lane.b32.xlu0 %v2659_v16, %s2523_s23 }
  0x83   : > { %926 = vrot.lane.b32.xlu1 %v2621_v2, %s2525_s8 }
  0x86   : > { %868 = vrot.lane.b32.xlu0 %v2650_v12, %s2526_s11 }
  0x87   : > { %722 = vrot.lane.b32.xlu1 %v2656_v14, %s2523_s23 }
  0x8a   : > { %772 = vrot.lane.b32.xlu0 %v2650_v12, %s2524_s25 }
  0x8b   : > { %870 = vrot.lane.b32.xlu1 %v2654_v13, %s2526_s11 }
  0x8c   : > { %v685_v31 = vpop.permute.xlu0 %684  ;;  %v683_v32 = vpop.permute.xlu1 %682 }
  0x8d   : > { %714 = vst.msk [vmem:[#allocation2 + $0x78] sm:$0xf] %vm611_vm0, %v685_v31  ;;  %713 = vst.msk [vmem:[#allocation2 + $0x74] sm:$0xf] %vm611_vm0, %v683_v32 }
  0x8e   : > { %920 = vrot.lane.b32.xlu0 %v2625_v3, %s2525_s8 }
  0x8f   : > { %774 = vrot.lane.b32.xlu1 %v2654_v13, %s2524_s25 }
  0x90   : > { %v687_v33 = vpop.permute.xlu0 %686 }
  0x91   : > { %715 = vst.msk [vmem:[#allocation2 + $0x7c] sm:$0xf] %vm611_vm0, %v687_v33 }
  0x92   : > { %692 = vrot.lane.b32.xlu0 %v2689_v26, %s2520_s19 }
  0x93   : > { %922 = vrot.lane.b32.xlu1 %v2619_v1, %s2525_s8 }
  0x94   : > { %v681_v34 = vpop.permute.xlu0 %680 }
  0x95   : > { %712 = vst.msk [vmem:[#allocation2 + $0x70] sm:$0xf] %vm611_vm0, %v681_v34  ;;  %v629_v35 = vpop.permute.xlu1 %628 }
  0x96   : > { %864 = vrot.lane.b32.xlu0 %v2659_v16, %s2526_s11  ;;  %662 = vst.msk [vmem:[#allocation2 + $0x38] sm:$0xf] %vm611_vm0, %v629_v35 }
  0x97   : > { %694 = vrot.lane.b32.xlu1 %v2687_v25, %s2520_s19 }
  0x98   : > { %v625_v36 = vpop.permute.xlu0 %624  ;;  %v2407_v37 = vld [vmem:[#allocation2 + $0x78] sm:$0xff]  }
  0x99   : > { %660 = vst.msk [vmem:[#allocation2 + $0x30] sm:$0xf] %vm611_vm0, %v625_v36  ;;  %v631_v38 = vpop.permute.xlu1 %630  ;;  %2246 = vmatprep.subr.bf16.mxu0 %v2407_v37 }
  0x9a   : > { %768 = vrot.lane.b32.xlu0 %v2659_v16, %s2524_s25  ;;  %663 = vst.msk [vmem:[#allocation2 + $0x3c] sm:$0xf] %vm611_vm0, %v631_v38 }
  0x9b   : > { %866 = vrot.lane.b32.xlu1 %v2656_v14, %s2526_s11 }
  0x9c   : > { %v677_v39 = vpop.permute.xlu0 %676  ;;  %v2409_v42 = vld [vmem:[#allocation2 + $0x70] sm:$0xff]  }
  0x9d   : > { %710 = vst.msk [vmem:[#allocation2 + $0x68] sm:$0xf] %vm611_vm0, %v677_v39  ;;  %v627_v40 = vpop.permute.xlu1 %626 }
  0x9e   : > { %916 = vrot.lane.b32.xlu0 %v2650_v12, %s2525_s8  ;;  %661 = vst.msk [vmem:[#allocation2 + $0x34] sm:$0xf] %vm611_vm0, %v627_v40 }
  0x9f   : > { %770 = vrot.lane.b32.xlu1 %v2656_v14, %s2524_s25 }
  0xa0   : > { %v673_v41 = vpop.permute.xlu0 %672 }
  0xa1   : > { %708 = vst.msk [vmem:[#allocation2 + $0x60] sm:$0xf] %vm611_vm0, %v673_v41  ;;  %v679_v43 = vpop.permute.xlu1 %678  ;;  %v2408_v44 = vld [vmem:[#allocation2 + $0x38] sm:$0xff]  }
  0xa2   : > { %688 = vrot.lane.b32.xlu0 %v2695_v29, %s2520_s19  ;;  %711 = vst.msk [vmem:[#allocation2 + $0x6c] sm:$0xf] %vm611_vm0, %v679_v43  ;;  %2247 = vmatpush3.bf16.msra.mxu0 %v2408_v44 }
  0xa3   : > { %918 = vrot.lane.b32.xlu1 %v2654_v13, %s2525_s8  ;;  %2248 = vmatprep.subr.bf16.mxu0 %v2409_v42 }
  0xa4   : > { %v645_v45 = vpop.permute.xlu0 %644 }
  0xa5   : > { %670 = vst.msk [vmem:[#allocation2 + $0x58] sm:$0xf] %vm611_vm0, %v645_v45  ;;  %v675_v46 = vpop.permute.xlu1 %674  ;;  %v2410_v47 = vld [vmem:[#allocation2 + $0x30] sm:$0xff]  }
  0xa6   : > { %836 = vrot.lane.b32.xlu0 %v2689_v26, %s2522_s22  ;;  %709 = vst.msk [vmem:[#allocation2 + $0x64] sm:$0xf] %vm611_vm0, %v675_v46  ;;  %2249 = vmatpush3.bf16.msra.mxu0 %v2410_v47 }
  0xa7   : > { %690 = vrot.lane.b32.xlu1 %v2691_v27, %s2520_s19  ;;  %s2527_s19 = smov 114  }
  0xa8   : > { %v641_v48 = vpop.permute.xlu0 %640 }
  0xa9   : > { %668 = vst.msk [vmem:[#allocation2 + $0x50] sm:$0xf] %vm611_vm0, %v641_v48  ;;  %v647_v50 = vpop.permute.xlu1 %646  ;;  %v2411_v51 = vld [vmem:[#allocation2 + $0x68] sm:$0xff]  }
  0xaa   : > { %912 = vrot.lane.b32.xlu0 %v2659_v16, %s2525_s8  ;;  %671 = vst.msk [vmem:[#allocation2 + $0x5c] sm:$0xf] %vm611_vm0, %v647_v50  ;;  %2250 = vmatprep.subr.bf16.mxu0 %v2411_v51 }
  0xab   : > { %838 = vrot.lane.b32.xlu1 %v2687_v25, %s2522_s22  ;;  %2251 = vmatpush3.bf16.msra.mxu0 %v2412_v49 }
  0xac   : > { %v821_v52 = vpop.permute.xlu0 %820 }
  0xad   : > { %854 = vst.msk [vmem:[#allocation2 + $0xf8] sm:$0xf] %vm611_vm0, %v821_v52  ;;  %v643_v55 = vpop.permute.xlu1 %642  ;;  %v2413_v56 = vld [vmem:[#allocation2 + $0x60] sm:$0xff]  }
  0xae   : > { %980 = vrot.lane.b32.xlu0 %v2689_v26, %s2527_s19  ;;  %669 = vst.msk [vmem:[#allocation2 + $0x54] sm:$0xf] %vm611_vm0, %v643_v55  ;;  %2252 = vmatprep.subr.bf16.mxu0 %v2413_v56 }
  0xaf   : > { %914 = vrot.lane.b32.xlu1 %v2656_v14, %s2525_s8  ;;  %2253 = vmatpush3.bf16.msra.mxu0 %v2414_v54 }
  0xb0   : > { %v741_v57 = vpop.permute.xlu0 %740 }
  0xb1   : > { %766 = vst.msk [vmem:[#allocation2 + $0xb8] sm:$0xf] %vm611_vm0, %v741_v57  ;;  %v823_v59 = vpop.permute.xlu1 %822  ;;  %v2415_v60 = vld [vmem:[#allocation2 + $0x58] sm:$0xff]  }
  0xb2   : > { %832 = vrot.lane.b32.xlu0 %v2695_v29, %s2522_s22  ;;  %855 = vst.msk [vmem:[#allocation2 + $0xfc] sm:$0xf] %vm611_vm0, %v823_v59  ;;  %2254 = vmatprep.subr.bf16.mxu0 %v2415_v60 }
  0xb3   : > { %982 = vrot.lane.b32.xlu1 %v2687_v25, %s2527_s19  ;;  %2255 = vmatpush3.bf16.msra.mxu0 %v2416_v58 }
  0xb4   : > { %v637_v61 = vpop.permute.xlu0 %636 }
  0xb5   : > { %666 = vst.msk [vmem:[#allocation2 + $0x48] sm:$0xf] %vm611_vm0, %v637_v61  ;;  %v743_v63 = vpop.permute.xlu1 %742  ;;  %v2417_v4 = vld [vmem:[#allocation2 + $0x50] sm:$0xff]  }
  0xb6   : > { %884 = vrot.lane.b32.xlu0 %v2689_v26, %s2526_s11  ;;  %767 = vst.msk [vmem:[#allocation2 + $0xbc] sm:$0xf] %vm611_vm0, %v743_v63  ;;  %2256 = vmatprep.subr.bf16.mxu0 %v2417_v4 }
  0xb7   : > { %834 = vrot.lane.b32.xlu1 %v2691_v27, %s2522_s22  ;;  %2257 = vmatpush3.bf16.msra.mxu0 %v2420_v62 }
  0xb8   : > { %v817_v5 = vpop.permute.xlu0 %816 }
  0xb9   : > { %852 = vst.msk [vmem:[#allocation2 + $0xf0] sm:$0xf] %vm611_vm0, %v817_v5  ;;  %v639_v6 = vpop.permute.xlu1 %638  ;;  %v2418_v7 = vld [vmem:[#allocation2 + $0xf8] sm:$0xff]  }
  0xba   : > { %976 = vrot.lane.b32.xlu0 %v2695_v29, %s2527_s19  ;;  %667 = vst.msk [vmem:[#allocation2 + $0x4c] sm:$0xf] %vm611_vm0, %v639_v6  ;;  %2274 = vmatprep.subr.bf16.mxu1 %v2418_v7 }
  0xbb   : > { %886 = vrot.lane.b32.xlu1 %v2687_v25, %s2526_s11  ;;  %v2429_v25 = vld [vmem:[#allocation2] sm:$0xff]  }
  0xbc   : > { %v737_v8 = vpop.permute.xlu0 %736 }
  0xbd   : > { %764 = vst.msk [vmem:[#allocation2 + $0xb0] sm:$0xf] %vm611_vm0, %v737_v8  ;;  %v819_v9 = vpop.permute.xlu1 %818  ;;  %v2419_v10 = vld [vmem:[#allocation2 + $0xb8] sm:$0xff]  }
  0xbe   : > { %828 = vrot.lane.b32.xlu0 %v2617_v0, %s2522_s22  ;;  %853 = vst.msk [vmem:[#allocation2 + $0xf4] sm:$0xf] %vm611_vm0, %v819_v9  ;;  %2275 = vmatpush3.bf16.msra.mxu1 %v2419_v10 }
  0xbf   : > { %978 = vrot.lane.b32.xlu1 %v2691_v27, %s2527_s19 }
  0xc0   : > { %v633_v11 = vpop.permute.xlu0 %632 }
  0xc1   : > { %664 = vst.msk [vmem:[#allocation2 + $0x40] sm:$0xf] %vm611_vm0, %v633_v11  ;;  %v739_v17 = vpop.permute.xlu1 %738  ;;  %v2421_v18 = vld [vmem:[#allocation2 + $0x48] sm:$0xff]  }
  0xc2   : > { %880 = vrot.lane.b32.xlu0 %v2695_v29, %s2526_s11  ;;  %765 = vst.msk [vmem:[#allocation2 + $0xb4] sm:$0xf] %vm611_vm0, %v739_v17  ;;  %2258 = vmatprep.subr.bf16.mxu0 %v2421_v18 }
  0xc3   : > { %830 = vrot.lane.b32.xlu1 %v2621_v2, %s2522_s22  ;;  %2259 = vmatpush3.bf16.msra.mxu0 %v2424_v15 }
  0xc4   : > { %v789_v19 = vpop.permute.xlu0 %788 }
  0xc5   : > { %814 = vst.msk [vmem:[#allocation2 + $0xe8] sm:$0xf] %vm611_vm0, %v789_v19  ;;  %v635_v20 = vpop.permute.xlu1 %634  ;;  %v2422_v21 = vld [vmem:[#allocation2 + $0xf0] sm:$0xff]  }
  0xc6   : > { %972 = vrot.lane.b32.xlu0 %v2617_v0, %s2527_s19  ;;  %665 = vst.msk [vmem:[#allocation2 + $0x44] sm:$0xf] %vm611_vm0, %v635_v20  ;;  %2276 = vmatprep.subr.bf16.mxu1 %v2422_v21 }
  0xc7   : > { %882 = vrot.lane.b32.xlu1 %v2691_v27, %s2526_s11  ;;  %s2128_s11 = sshll.u32 %s3112_s24, 2  ;;  %s2528_s24 = smov 7  }
  0xc8   : > { %v733_v22 = vpop.permute.xlu0 %732  ;;  %s3032_s13 = sadd.s32 %s2128_s11, %s2604_s9 }
  0xc9   : > { %762 = vst.msk [vmem:[#allocation2 + $0xa8] sm:$0xf] %vm611_vm0, %v733_v22  ;;  %v791_v23 = vpop.permute.xlu1 %790  ;;  %v2423_v24 = vld [vmem:[#allocation2 + $0xb0] sm:$0xff]   ;;  %s2133_s14 = sshll.u32 %s3032_s13, 3  ;;  %s2130_s20 = sshll.u32 %s3032_s13, 2 }
  0xca   : > { %824 = vrot.lane.b32.xlu0 %v2625_v3, %s2522_s22  ;;  %815 = vst.msk [vmem:[#allocation2 + $0xec] sm:$0xf] %vm611_vm0, %v791_v23  ;;  %2277 = vmatpush3.bf16.msra.mxu1 %v2423_v24  ;;  %s516_s16 = scalar_lea.vmem %s3084_s6, %s2133_s14  ;;  %s525_s18 = scalar_lea.vmem %s3085_s7, %s2133_s14 }
  0xcb   : > { %974 = vrot.lane.b32.xlu1 %v2621_v2, %s2527_s19  ;;  %v2432_v2 = vld [vmem:[%s3081_s3] ss:$28 sps:$4 sm:$0xff]   ;;  %s507_s23 = scalar_lea.vmem %s3083_s5, %s2130_s20 }
  0xcc   : > { %v785_v0 = vpop.permute.xlu0 %784 }
  0xcd   : > { %812 = vst.msk [vmem:[#allocation2 + $0xe0] sm:$0xf] %vm611_vm0, %v785_v0  ;;  %v735_v26 = vpop.permute.xlu1 %734  ;;  %v2425_v27 = vld [vmem:[#allocation2 + $0x40] sm:$0xff]  }
  0xce   : > { %968 = vrot.lane.b32.xlu0 %v2625_v3, %s2527_s19  ;;  %763 = vst.msk [vmem:[#allocation2 + $0xac] sm:$0xf] %vm611_vm0, %v735_v26  ;;  %2260 = vmatprep.subr.bf16.mxu0 %v2425_v27  ;;  %v2464_v3 = vld [vmem:[%s3081_s3 + $0x3c] ss:$28 sps:$4 sm:$0xff]  }
  0xcf   : > { %826 = vrot.lane.b32.xlu1 %v2619_v1, %s2522_s22  ;;  %2261 = vmatpush3.bf16.msra.mxu0 %v2429_v25 }
  0xd0   : > { %v933_v28 = vpop.permute.xlu0 %932 }
  0xd1   : > { %958 = vst.msk [vmem:[#allocation2 + $0x178] sm:$0xf] %vm611_vm0, %v933_v28  ;;  %v787_v29 = vpop.permute.xlu1 %786  ;;  %v2426_v30 = vld [vmem:[#allocation2 + $0xe8] sm:$0xff]  }
  0xd2   : > { %964 = vrot.lane.b32.xlu0 %v2650_v12, %s2527_s19  ;;  %813 = vst.msk [vmem:[#allocation2 + $0xe4] sm:$0xf] %vm611_vm0, %v787_v29  ;;  %2278 = vmatprep.subr.bf16.mxu1 %v2426_v30  ;;  %v2453_v30 = vld [vmem:[%s3081_s3 + $0x8] ss:$28 sps:$4 sm:$0xff]  }
  0xd3   : > { %970 = vrot.lane.b32.xlu1 %v2619_v1, %s2527_s19  ;;  %1566 = vmatmul.mubr.bf16.vlgmr.msra.gmra.mxu0 %v2432_v2  ;;  %v2466_v1 = vld [vmem:[%s3081_s3 + $0x38] ss:$28 sps:$4 sm:$0xff]  }
  0xd4   : > { %v729_v31 = vpop.permute.xlu0 %728  ;;  %1573 = vmatprep.mubr.bf16.mxu0 %v2464_v3 }
  0xd5   : > { %760 = vst.msk [vmem:[#allocation2 + $0xa0] sm:$0xf] %vm611_vm0, %v729_v31  ;;  %v935_v32 = vpop.permute.xlu1 %934  ;;  %v2427_v33 = vld [vmem:[#allocation2 + $0xa8] sm:$0xff]   ;;  %v2462_v31 = vld [vmem:[%s3081_s3 + $0x44] ss:$28 sps:$4 sm:$0xff]  }
  0xd6   : > { %960 = vrot.lane.b32.xlu0 %v2659_v16, %s2527_s19  ;;  %959 = vst.msk [vmem:[#allocation2 + $0x17c] sm:$0xf] %vm611_vm0, %v935_v32  ;;  %2279 = vmatpush3.bf16.msra.mxu1 %v2427_v33  ;;  %v2471_v16 = vld [vmem:[%s3081_s3 + $0x14] ss:$28 sps:$4 sm:$0xff]  }
  0xd7   : > { %966 = vrot.lane.b32.xlu1 %v2654_v13, %s2527_s19 }
  0xd8   : > { %v877_v12 = vpop.permute.xlu0 %876 }
  0xd9   : > { %906 = vst.msk [vmem:[#allocation2 + $0x138] sm:$0xf] %vm611_vm0, %v877_v12  ;;  %v731_v34 = vpop.permute.xlu1 %730  ;;  %v2428_v35 = vld [vmem:[#allocation2 + $0xe0] sm:$0xff]  }
  0xda   : > { %761 = vst.msk [vmem:[#allocation2 + $0xa4] sm:$0xf] %vm611_vm0, %v731_v34  ;;  %2280 = vmatprep.subr.bf16.mxu1 %v2428_v35  ;;  %v1021_v34 = vld [vmem:[%s3081_s3 + $0x5c] sm:$0xff] }
  0xdb   : > { %962 = vrot.lane.b32.xlu1 %v2656_v14, %s2527_s19  ;;  %1574 = vmatmul.mubr.bf16.gmra.mxu0 %v2466_v1  ;;  %v1017_v1 = vld [vmem:[%s3081_s3 + $0x40] sm:$0xff] }
  0xdc   : > { %v781_v13 = vpop.permute.xlu0 %780  ;;  %1663 = vmatprep.mubr.bf16.mxu0 %v2471_v16 }
  0xdd   : > { %810 = vst.msk [vmem:[#allocation2 + $0xd8] sm:$0xf] %vm611_vm0, %v781_v13  ;;  %v879_v36 = vpop.permute.xlu1 %878  ;;  %v2430_v37 = vld [vmem:[#allocation2 + $0x178] sm:$0xff]   ;;  %v2160_v13 = vcombine.low %v1017_v1, %v1021_v34 }
  0xde   : > { %907 = vst.msk [vmem:[#allocation2 + $0x13c] sm:$0xf] %vm611_vm0, %v879_v36  ;;  %2302 = vmatprep.subr.bf16.mxu0 %v2430_v37  ;;  %v2478_v37 = vld [vmem:[%s3081_s3 + $0x18] ss:$28 sps:$4 sm:$0xff]  }
  0xe0   : > { %v929_v38 = vpop.permute.xlu0 %928 }
  0xe1   : > { %956 = vst.msk [vmem:[#allocation2 + $0x170] sm:$0xf] %vm611_vm0, %v929_v38  ;;  %v783_v39 = vpop.permute.xlu1 %782  ;;  %v2431_v40 = vld [vmem:[#allocation2 + $0xa0] sm:$0xff]  }
  0xe2   : > { %811 = vst.msk [vmem:[#allocation2 + $0xdc] sm:$0xf] %vm611_vm0, %v783_v39  ;;  %2281 = vmatpush3.bf16.msra.mxu1 %v2431_v40 }
  0xe4   : > { %v725_v14 = vpop.permute.xlu0 %724 }
  0xe5   : > { %758 = vst.msk [vmem:[#allocation2 + $0x98] sm:$0xf] %vm611_vm0, %v725_v14  ;;  %v931_v41 = vpop.permute.xlu1 %930  ;;  %v2435_v42 = vld [vmem:[#allocation2 + $0x138] sm:$0xff]  }
  0xe6   : > { %957 = vst.msk [vmem:[#allocation2 + $0x174] sm:$0xf] %vm611_vm0, %v931_v41  ;;  %2303 = vmatpush3.bf16.msra.mxu0 %v2435_v42 }
  0xe8   : > { %v873_v43 = vpop.permute.xlu0 %872 }
  0xe9   : > { %904 = vst.msk [vmem:[#allocation2 + $0x130] sm:$0xf] %vm611_vm0, %v873_v43  ;;  %v727_v44 = vpop.permute.xlu1 %726  ;;  %v2436_v45 = vld [vmem:[#allocation2 + $0xd8] sm:$0xff]  }
  0xea   : > { %759 = vst.msk [vmem:[#allocation2 + $0x9c] sm:$0xf] %vm611_vm0, %v727_v44  ;;  %2282 = vmatprep.subr.bf16.mxu1 %v2436_v45 }
  0xec   : > { %v777_v46 = vpop.permute.xlu0 %776 }
  0xed   : > { %808 = vst.msk [vmem:[#allocation2 + $0xd0] sm:$0xf] %vm611_vm0, %v777_v46  ;;  %v875_v47 = vpop.permute.xlu1 %874  ;;  %v2437_v48 = vld [vmem:[#allocation2 + $0x170] sm:$0xff]  }
  0xee   : > { %905 = vst.msk [vmem:[#allocation2 + $0x134] sm:$0xf] %vm611_vm0, %v875_v47  ;;  %2304 = vmatprep.subr.bf16.mxu0 %v2437_v48 }
  0xf0   : > { %v925_v49 = vpop.permute.xlu0 %924 }
  0xf1   : > { %954 = vst.msk [vmem:[#allocation2 + $0x168] sm:$0xf] %vm611_vm0, %v925_v49  ;;  %v779_v50 = vpop.permute.xlu1 %778  ;;  %v2438_v51 = vld [vmem:[#allocation2 + $0x98] sm:$0xff]  }
  0xf2   : > { %809 = vst.msk [vmem:[#allocation2 + $0xd4] sm:$0xf] %vm611_vm0, %v779_v50  ;;  %2283 = vmatpush3.bf16.msra.mxu1 %v2438_v51 }
  0xf4   : > { %v721_v52 = vpop.permute.xlu0 %720 }
  0xf5   : > { %756 = vst.msk [vmem:[#allocation2 + $0x90] sm:$0xf] %vm611_vm0, %v721_v52  ;;  %v927_v53 = vpop.permute.xlu1 %926  ;;  %v2439_v54 = vld [vmem:[#allocation2 + $0x130] sm:$0xff]  }
  0xf6   : > { %955 = vst.msk [vmem:[#allocation2 + $0x16c] sm:$0xf] %vm611_vm0, %v927_v53  ;;  %2305 = vmatpush3.bf16.msra.mxu0 %v2439_v54 }
  0xf8   : > { %v869_v55 = vpop.permute.xlu0 %868 }
  0xf9   : > { %902 = vst.msk [vmem:[#allocation2 + $0x128] sm:$0xf] %vm611_vm0, %v869_v55  ;;  %v723_v56 = vpop.permute.xlu1 %722  ;;  %v2440_v57 = vld [vmem:[#allocation2 + $0xd0] sm:$0xff]  }
  0xfa   : > { %757 = vst.msk [vmem:[#allocation2 + $0x94] sm:$0xf] %vm611_vm0, %v723_v56  ;;  %2284 = vmatprep.subr.bf16.mxu1 %v2440_v57 }
  0xfc   : > { %v773_v58 = vpop.permute.xlu0 %772 }
  0xfd   : > { %806 = vst.msk [vmem:[#allocation2 + $0xc8] sm:$0xf] %vm611_vm0, %v773_v58  ;;  %v871_v59 = vpop.permute.xlu1 %870  ;;  %v2441_v60 = vld [vmem:[#allocation2 + $0x168] sm:$0xff]  }
  0xfe   : > { %903 = vst.msk [vmem:[#allocation2 + $0x12c] sm:$0xf] %vm611_vm0, %v871_v59  ;;  %2306 = vmatprep.subr.bf16.mxu0 %v2441_v60  ;;  %v2469_v60 = vld [vmem:[%s3081_s3 + $0x10] ss:$28 sps:$4 sm:$0xff]  }
 0x100   : > { %v921_v61 = vpop.permute.xlu0 %920 }
 0x101   : > { %952 = vst.msk [vmem:[#allocation2 + $0x160] sm:$0xf] %vm611_vm0, %v921_v61  ;;  %v775_v62 = vpop.permute.xlu1 %774  ;;  %v2442_v63 = vld [vmem:[#allocation2 + $0x90] sm:$0xff]   ;;  %v2474_v61 = vld [vmem:[%s3081_s3 + $0x4c] ss:$28 sps:$4 sm:$0xff]  }
 0x102   : > { %807 = vst.msk [vmem:[#allocation2 + $0xcc] sm:$0xf] %vm611_vm0, %v775_v62  ;;  %2285 = vmatpush3.bf16.msra.mxu1 %v2442_v63 }
 0x104   : > { %v693_v4 = vpop.permute.xlu0 %692 }
 0x105   : > { %718 = vst.msk [vmem:[#allocation2 + $0x88] sm:$0xf] %vm611_vm0, %v693_v4  ;;  %v923_v5 = vpop.permute.xlu1 %922  ;;  %v2443_v6 = vld [vmem:[#allocation2 + $0x128] sm:$0xff]  }
 0x106   : > { %953 = vst.msk [vmem:[#allocation2 + $0x164] sm:$0xf] %vm611_vm0, %v923_v5  ;;  %2307 = vmatpush3.bf16.msra.mxu0 %v2443_v6  ;;  %v2476_v5 = vld [vmem:[%s3081_s3 + $0x48] ss:$28 sps:$4 sm:$0xff]  }
 0x108   : > { %v865_v7 = vpop.permute.xlu0 %864 }
 0x109   : > { %900 = vst.msk [vmem:[#allocation2 + $0x120] sm:$0xf] %vm611_vm0, %v865_v7  ;;  %v695_v8 = vpop.permute.xlu1 %694  ;;  %v2444_v9 = vld [vmem:[#allocation2 + $0xc8] sm:$0xff]  }
 0x10a   : > { %719 = vst.msk [vmem:[#allocation2 + $0x8c] sm:$0xf] %vm611_vm0, %v695_v8  ;;  %2286 = vmatprep.subr.bf16.mxu1 %v2444_v9  ;;  %v2479_v7 = vld [vmem:[%s3081_s3 + $0x50] ss:$28 sps:$4 sm:$0xff]  }
 0x10c   : > { %v769_v10 = vpop.permute.xlu0 %768 }
 0x10d   : > { %804 = vst.msk [vmem:[#allocation2 + $0xc0] sm:$0xf] %vm611_vm0, %v769_v10  ;;  %v867_v11 = vpop.permute.xlu1 %866  ;;  %v2445_v15 = vld [vmem:[#allocation2 + $0x160] sm:$0xff]  }
 0x10e   : > { %901 = vst.msk [vmem:[#allocation2 + $0x124] sm:$0xf] %vm611_vm0, %v867_v11  ;;  %2308 = vmatprep.subr.bf16.mxu0 %v2445_v15 }
 0x110   : > { %v917_v17 = vpop.permute.xlu0 %916 }
 0x111   : > { %950 = vst.msk [vmem:[#allocation2 + $0x158] sm:$0xf] %vm611_vm0, %v917_v17  ;;  %v771_v18 = vpop.permute.xlu1 %770  ;;  %v2446_v19 = vld [vmem:[#allocation2 + $0x88] sm:$0xff]  }
 0x112   : > { %805 = vst.msk [vmem:[#allocation2 + $0xc4] sm:$0xf] %vm611_vm0, %v771_v18  ;;  %2287 = vmatpush3.bf16.msra.mxu1 %v2446_v19 }
 0x114   : > { %v689_v20 = vpop.permute.xlu0 %688 }
 0x115   : > { %716 = vst.msk [vmem:[#allocation2 + $0x80] sm:$0xf] %vm611_vm0, %v689_v20  ;;  %v919_v21 = vpop.permute.xlu1 %918  ;;  %v2447_v22 = vld [vmem:[#allocation2 + $0x120] sm:$0xff]  }
 0x116   : > { %951 = vst.msk [vmem:[#allocation2 + $0x15c] sm:$0xf] %vm611_vm0, %v919_v21  ;;  %2309 = vmatpush3.bf16.msra.mxu0 %v2447_v22 }
 0x118   : > { %v837_v23 = vpop.permute.xlu0 %836 }
 0x119   : > { %862 = vst.msk [vmem:[#allocation2 + $0x118] sm:$0xf] %vm611_vm0, %v837_v23  ;;  %v691_v24 = vpop.permute.xlu1 %690  ;;  %v2448_v0 = vld [vmem:[#allocation2 + $0xc0] sm:$0xff]  }
 0x11a   : > { %717 = vst.msk [vmem:[#allocation2 + $0x84] sm:$0xf] %vm611_vm0, %v691_v24  ;;  %2288 = vmatprep.subr.bf16.mxu1 %v2448_v0 }
 0x11c   : > { %v913_v25 = vpop.permute.xlu0 %912 }
 0x11d   : > { %948 = vst.msk [vmem:[#allocation2 + $0x150] sm:$0xf] %vm611_vm0, %v913_v25  ;;  %v839_v26 = vpop.permute.xlu1 %838  ;;  %v2449_v27 = vld [vmem:[#allocation2 + $0x158] sm:$0xff]  }
 0x11e   : > { %863 = vst.msk [vmem:[#allocation2 + $0x11c] sm:$0xf] %vm611_vm0, %v839_v26  ;;  %2310 = vmatprep.subr.bf16.mxu0 %v2449_v27 }
 0x120   : > { %v981_v28 = vpop.permute.xlu0 %980 }
 0x121   : > { %1006 = vst.msk [vmem:[#allocation2 + $0x1a8] sm:$0xf] %vm611_vm0, %v981_v28  ;;  %v915_v2 = vpop.permute.xlu1 %914  ;;  %v2450_v29 = vld [vmem:[#allocation2 + $0x80] sm:$0xff]  }
 0x122   : > { %949 = vst.msk [vmem:[#allocation2 + $0x154] sm:$0xf] %vm611_vm0, %v915_v2  ;;  %2289 = vmatpush3.bf16.msra.mxu1 %v2450_v29 }
 0x124   : > { %v833_v3 = vpop.permute.xlu0 %832 }
 0x125   : > { %860 = vst.msk [vmem:[#allocation2 + $0x110] sm:$0xf] %vm611_vm0, %v833_v3  ;;  %v983_v32 = vpop.permute.xlu1 %982  ;;  %v2451_v33 = vld [vmem:[#allocation2 + $0x118] sm:$0xff]   ;;  %1615 = vmatmul.mubr.bf16.vlgmr.msra.gmra.mxu1 %v2453_v30 }
 0x126   : > { %1007 = vst.msk [vmem:[#allocation2 + $0x1ac] sm:$0xf] %vm611_vm0, %v983_v32  ;;  %2311 = vmatpush3.bf16.msra.mxu0 %v2451_v33  ;;  %1622 = vmatprep.mubr.bf16.mxu1 %v2462_v31 }
 0x128   : > { %v885_v12 = vpop.permute.xlu0 %884 }
 0x129   : > { %910 = vst.msk [vmem:[#allocation2 + $0x148] sm:$0xf] %vm611_vm0, %v885_v12  ;;  %v835_v35 = vpop.permute.xlu1 %834  ;;  %v2452_v16 = vld [vmem:[#allocation2 + $0x150] sm:$0xff]  }
 0x12a   : > { %861 = vst.msk [vmem:[#allocation2 + $0x114] sm:$0xf] %vm611_vm0, %v835_v35  ;;  %2312 = vmatprep.subr.bf16.mxu0 %v2452_v16 }
 0x12c   : > { %v977_v36 = vpop.permute.xlu0 %976 }
 0x12d   : > { %1004 = vst.msk [vmem:[#allocation2 + $0x1a0] sm:$0xf] %vm611_vm0, %v977_v36  ;;  %v887_v38 = vpop.permute.xlu1 %886  ;;  %v2456_v39 = vld [vmem:[#allocation2 + $0x1a8] sm:$0xff]   ;;  %1623 = vmatmul.mubr.bf16.gmra.mxu1 %v2160_v13 }
 0x12e   : > { %911 = vst.msk [vmem:[#allocation2 + $0x14c] sm:$0xf] %vm611_vm0, %v887_v38  ;;  %2338 = vmatprep.subr.bf16.mxu1 %v2456_v39  ;;  %2350 = vmatprep.mubr.msk.bf16.mxu1 %vm1526_vm3, %v2478_v37 }
 0x12f   : > { %2339 = vmatpush3.bf16.msra.mxu1 %v2456_v39 }
 0x130   : > { %v829_v40 = vpop.permute.xlu0 %828 }
 0x131   : > { %858 = vst.msk [vmem:[#allocation2 + $0x108] sm:$0xf] %vm611_vm0, %v829_v40  ;;  %v979_v14 = vpop.permute.xlu1 %978  ;;  %v2457_v41 = vld [vmem:[#allocation2 + $0x110] sm:$0xff]  }
 0x132   : > { %1005 = vst.msk [vmem:[#allocation2 + $0x1a4] sm:$0xf] %vm611_vm0, %v979_v14  ;;  %2313 = vmatpush3.bf16.msra.mxu0 %v2457_v41 }
 0x134   : > { %v881_v42 = vpop.permute.xlu0 %880 }
 0x135   : > { %908 = vst.msk [vmem:[#allocation2 + $0x140] sm:$0xf] %vm611_vm0, %v881_v42  ;;  %v831_v43 = vpop.permute.xlu1 %830  ;;  %v2458_v44 = vld [vmem:[#allocation2 + $0x148] sm:$0xff]  }
 0x136   : > { %859 = vst.msk [vmem:[#allocation2 + $0x10c] sm:$0xf] %vm611_vm0, %v831_v43  ;;  %2314 = vmatprep.subr.bf16.mxu0 %v2458_v44 }
 0x138   : > { %v973_v45 = vpop.permute.xlu0 %972 }
 0x139   : > { %1002 = vst.msk [vmem:[#allocation2 + $0x198] sm:$0xf] %vm611_vm0, %v973_v45  ;;  %v883_v46 = vpop.permute.xlu1 %882  ;;  %v2459_v47 = vld [vmem:[#allocation2 + $0x1a0] sm:$0xff]  }
 0x13a   : > { %909 = vst.msk [vmem:[#allocation2 + $0x144] sm:$0xf] %vm611_vm0, %v883_v46  ;;  %2340 = vmatprep.subr.bf16.mxu1 %v2459_v47 }
 0x13b   : > { %2341 = vmatpush3.bf16.msra.mxu1 %v2459_v47  ;;  %v2221_v47 = vld [vmem:[%s3082_s4] ss:$0 sm:$0xff] }
 0x13c   : > { %v825_v48 = vpop.permute.xlu0 %824 }
 0x13d   : > { %856 = vst.msk [vmem:[#allocation2 + $0x100] sm:$0xf] %vm611_vm0, %v825_v48  ;;  %v975_v49 = vpop.permute.xlu1 %974  ;;  %v2460_v50 = vld [vmem:[#allocation2 + $0x108] sm:$0xff]  }
 0x13e   : > { %1003 = vst.msk [vmem:[#allocation2 + $0x19c] sm:$0xf] %vm611_vm0, %v975_v49  ;;  %2315 = vmatpush3.bf16.msra.mxu0 %v2460_v50 }
 0x140   : > { %v969_v51 = vpop.permute.xlu0 %968 }
 0x141   : > { %1000 = vst.msk [vmem:[#allocation2 + $0x190] sm:$0xf] %vm611_vm0, %v969_v51  ;;  %v827_v52 = vpop.permute.xlu1 %826  ;;  %v2461_v53 = vld [vmem:[#allocation2 + $0x140] sm:$0xff]  }
 0x142   : > { %857 = vst.msk [vmem:[#allocation2 + $0x104] sm:$0xf] %vm611_vm0, %v827_v52  ;;  %2316 = vmatprep.subr.bf16.mxu0 %v2461_v53 }
 0x144   : > { %v965_v54 = vpop.permute.xlu0 %964 }
 0x145   : > { %998 = vst.msk [vmem:[#allocation2 + $0x188] sm:$0xf] %vm611_vm0, %v965_v54  ;;  %v971_v55 = vpop.permute.xlu1 %970  ;;  %v2467_v56 = vld [vmem:[#allocation2 + $0x198] sm:$0xff]  }
 0x146   : > { %1001 = vst.msk [vmem:[#allocation2 + $0x194] sm:$0xf] %vm611_vm0, %v971_v55  ;;  %2342 = vmatprep.subr.bf16.mxu1 %v2467_v56 }
 0x147   : > { %2343 = vmatpush3.bf16.msra.mxu1 %v2467_v56 }
 0x148   : > { %v961_v57 = vpop.permute.xlu0 %960 }
 0x149   : > { %996 = vst.msk [vmem:[#allocation2 + $0x180] sm:$0xf] %vm611_vm0, %v961_v57  ;;  %v967_v58 = vpop.permute.xlu1 %966  ;;  %v2468_v59 = vld [vmem:[#allocation2 + $0x100] sm:$0xff]  }
 0x14a   : > { %999 = vst.msk [vmem:[#allocation2 + $0x18c] sm:$0xf] %vm611_vm0, %v967_v58  ;;  %2317 = vmatpush3.bf16.msra.mxu0 %v2468_v59 }
 0x14d   : > { %v963_v62 = vpop.permute.xlu1 %962  ;;  %v2472_v63 = vld [vmem:[#allocation2 + $0x190] sm:$0xff]   ;;  %1664 = vmatmul.mubr.bf16.vlgmr.msra.gmra.mxu0 %v2469_v60 }
 0x14e   : > { %997 = vst.msk [vmem:[#allocation2 + $0x184] sm:$0xf] %vm611_vm0, %v963_v62  ;;  %2344 = vmatprep.subr.bf16.mxu1 %v2472_v63  ;;  %1671 = vmatprep.mubr.bf16.mxu0 %v2474_v61 }
 0x14f   : > { %2345 = vmatpush3.bf16.msra.mxu1 %v2472_v63 }
 0x151   : > { %v2473_v4 = vld [vmem:[#allocation2 + $0x188] sm:$0xff]  }
 0x152   : > { %2346 = vmatprep.subr.bf16.mxu1 %v2473_v4 }
 0x153   : > { %2347 = vmatpush3.bf16.msra.mxu1 %v2473_v4 }
 0x155   : > { %v2477_v6 = vld [vmem:[#allocation2 + $0x180] sm:$0xff]   ;;  %1672 = vmatmul.mubr.bf16.gmra.mxu0 %v2476_v5 }
 0x156   : > { %2348 = vmatprep.subr.bf16.mxu1 %v2477_v6 }
 0x157   : > { %2349 = vmatpush3.bf16.msra.mxu1 %v2477_v6 }
 0x15a   : > { %2351 = vmatmul.mubr.msk.bf16.vlgmr.msra.gmra.mxu1 %vm1526_vm3, %v2479_v7 }
 0x193   : > { %v2262_v8 = vpop.f32.mrf.mxu0 }
 0x195   : > { %v2263_v9 = vpop.f32.mrf.mxu0 }
 0x196   : > { %v2264_v3 = vadd.f32 %v2263_v9, %v2262_v8 }
 0x197   : > { %v2265_v10 = vpop.f32.mrf.mxu0 }
 0x199   : > { %v2266_v15 = vpop.f32.mrf.mxu0 }
 0x19a   : > { %v2267_v37 = vadd.f32 %v2266_v15, %v2265_v10 }
 0x19b   : > { %v2268_v17 = vpop.f32.mrf.mxu0 }
 0x19d   : > { %v2269_v19 = vpop.f32.mrf.mxu0 }
 0x19e   : > { %v2270_v29 = vadd.f32 %v2269_v19, %v2268_v17 }
 0x19f   : > { %v2271_v21 = vpop.f32.mrf.mxu0 }
 0x1a1   : > { %v2272_v24 = vpop.f32.mrf.mxu0 }
 0x1a2   : > { %v2273_v35 = vadd.f32 %v2272_v24, %v2271_v21 }
 0x1e5   : > { %v2290_v11 = vpop.f32.mrf.mxu1 }
 0x1e7   : > { %v2291_v18 = vpop.f32.mrf.mxu1 }
 0x1e8   : > { %v2292_v31 = vadd.f32 %v2291_v18, %v2290_v11 }
 0x1e9   : > { %v2293_v20 = vpop.f32.mrf.mxu1 }
 0x1ea   : > { %v1617_v36 = vadd.f32 %v2292_v31, %v2264_v3 }
 0x1eb   : > { %v2294_v22 = vpop.f32.mrf.mxu1 }
 0x1ec   : > { %v2295_v38 = vadd.f32 %v2294_v22, %v2293_v20 }
 0x1ed   : > { %v2296_v23 = vpop.f32.mrf.mxu1 }
 0x1ee   : > { %v1620_v48 = vadd.f32 %v2295_v38, %v2267_v37 }
 0x1ef   : > { %v2297_v0 = vpop.f32.mrf.mxu1 }
 0x1f0   : > { %v2298_v30 = vadd.f32 %v2297_v0, %v2296_v23 }
 0x1f1   : > { %v2299_v27 = vpop.f32.mrf.mxu1 }
 0x1f2   : > { %v1625_v34 = vadd.f32 %v2298_v30, %v2270_v29 }
 0x1f3   : > { %v2300_v32 = vpop.f32.mrf.mxu1 }
 0x1f4   : > { %v2301_v16 = vadd.f32 %v2300_v32, %v2299_v27 }
 0x1f6   : > { %v1628_v44 = vadd.f32 %v2301_v16, %v2273_v35 }
 0x20d   : > { %v2318_v25 = vpop.f32.mrf.mxu0 }
 0x20f   : > { %v2319_v26 = vpop.f32.mrf.mxu0 }
 0x210   : > { %v2320_v12 = vadd.f32 %v2319_v26, %v2318_v25 }
 0x211   : > { %v2321_v28 = vpop.f32.mrf.mxu0 }
 0x212   : > { %v1666_v43 = vadd.f32 %v2320_v12, %v1617_v36 }
 0x213   : > { %v2322_v2 = vpop.f32.mrf.mxu0 }
 0x214   : > { %v2323_v41 = vadd.f32 %v2322_v2, %v2321_v28 }
 0x215   : > { %v2324_v33 = vpop.f32.mrf.mxu0 }
 0x216   : > { %v1669_v53 = vadd.f32 %v2323_v41, %v1620_v48 }
 0x217   : > { %v2325_v1 = vpop.f32.mrf.mxu0 }
 0x218   : > { %v2326_v13 = vadd.f32 %v2325_v1, %v2324_v33 }
 0x219   : > { %v2327_v39 = vpop.f32.mrf.mxu0 }
 0x21a   : > { %v1674_v40 = vadd.f32 %v2326_v13, %v1625_v34  ;;  %v2352_v14 = vpop.f32.mrf.mxu1 }
 0x21b   : > { %v2328_v42 = vpop.f32.mrf.mxu0 }
 0x21c   : > { %v2329_v45 = vadd.f32 %v2328_v42, %v2327_v39  ;;  %v1714_v46 = vpop.f32.mrf.mxu1  ;;  %v3021_v49 = vadd.f32 %v2352_v14, %v1674_v40 }
 0x21d   : > { %v1715_v50 = vadd.f32 %v1714_v46, %v1666_v43 }
 0x21e   : > { %v1677_v51 = vadd.f32 %v2329_v45, %v1628_v44  ;;  %v2353_v52 = vpop.f32.mrf.mxu1  ;;  %v1738_v59 = vmul.f32 %v2221_v47, %v3021_v49 }
 0x21f   : > { %v1736_v54 = vmul.f32 %v2221_v47, %v1715_v50 }
 0x220   : > { %v1717_v55 = vpop.f32.mrf.mxu1  ;;  %v1726_v56 = vadd.f32 %v2353_v52, %v1677_v51  ;;  %v1747_v62 = vsel %vm1740_vm4, %v1738_v59, 0.0 }
 0x221   : > { %v1718_v57 = vadd.f32 %v1717_v55, %v1669_v53  ;;  %v1741_v58 = vsel %vm1740_vm4, %v1736_v54, 0.0 }
 0x222   : > { %1742 = vadd.xlane.f32.xlu0 %v1741_v58  ;;  %v1739_v63 = vmul.f32 %v2221_v47, %v1726_v56  ;;  %v1791_v31 = vpack.c.bf16 %v1726_v56, %v3021_v49 }
 0x223   : > { %v1737_v60 = vmul.f32 %v2221_v47, %v1718_v57  ;;  %v1790_v3 = vpack.c.bf16 %v1718_v57, %v1715_v50 }
 0x224   : > { %v1750_v4 = vsel %vm1740_vm4, %v1739_v63, 0.0 }
 0x225   : > { %v1744_v61 = vsel %vm1740_vm4, %v1737_v60, 0.0 }
 0x226   : > { %1745 = vadd.xlane.f32.xlu1 %v1744_v61  ;;  %1748 = vadd.xlane.f32.xlu0 %v1747_v62 }
 0x22a   : > { %1751 = vadd.xlane.f32.xlu0 %v1750_v4 }
 0x2ab   : > { %v1743_v5 = vpop.xlane.xlu0 %1742 }
 0x2ac   : > { %v1753_v6 = vmul.f32 0.0625, %v1743_v5  ;;  %1766 = vst.msk [vmem:[%s516_s16] sm:$0xff] %vm1765_vm5, %v1743_v5 }
 0x2ae   : > { %v1757_v7 = vsub.f32 %v1715_v50, %v1753_v6 }
 0x2af   : > { %v1746_v8 = vpop.xlane.xlu1 %1745  ;;  %v1749_v9 = vpop.xlane.xlu0 %1748 }
 0x2b0   : > { %v1754_v10 = vmul.f32 0.0625, %v1746_v8  ;;  %1767 = vst.msk [vmem:[%s516_s16 + $0x8] sm:$0xff] %vm1765_vm5, %v1746_v8  ;;  %v1755_v11 = vmul.f32 0.0625, %v1749_v9  ;;  %1768 = vst.msk [vmem:[%s516_s16 + $0x10] sm:$0xff] %vm1765_vm5, %v1749_v9  ;;  %v1761_v15 = vmul.f32 %v2221_v47, %v1757_v7 }
 0x2b2   : > { %v1758_v17 = vsub.f32 %v1718_v57, %v1754_v10  ;;  %v1759_v18 = vsub.f32 %v3021_v49, %v1755_v11  ;;  %v1770_v19 = vmul.f32 %v1761_v15, %v1761_v15 }
 0x2b3   : > { %v1752_v20 = vpop.xlane.xlu0 %1751 }
 0x2b4   : > { %v1756_v21 = vmul.f32 0.0625, %v1752_v20  ;;  %1769 = vst.msk [vmem:[%s516_s16 + $0x18] sm:$0xff] %vm1765_vm5, %v1752_v20  ;;  %v1774_v22 = vsel %vm1740_vm4, %v1770_v19, 0.0  ;;  %v1762_v23 = vmul.f32 %v2221_v47, %v1758_v17  ;;  %v1763_v24 = vmul.f32 %v2221_v47, %v1759_v18 }
 0x2b5   : > { %1775 = vadd.xlane.f32.xlu1 %v1774_v22 }
 0x2b6   : > { %v1760_v0 = vsub.f32 %v1726_v56, %v1756_v21  ;;  %v1771_v25 = vmul.f32 %v1762_v23, %v1762_v23  ;;  %v1772_v26 = vmul.f32 %v1763_v24, %v1763_v24 }
 0x2b8   : > { %v1777_v27 = vsel %vm1740_vm4, %v1771_v25, 0.0  ;;  %v1780_v28 = vsel %vm1740_vm4, %v1772_v26, 0.0  ;;  %v1764_v2 = vmul.f32 %v2221_v47, %v1760_v0 }
 0x2b9   : > { %1778 = vadd.xlane.f32.xlu0 %v1777_v27  ;;  %1781 = vadd.xlane.f32.xlu1 %v1780_v28 }
 0x2ba   : > { %v1773_v29 = vmul.f32 %v1764_v2, %v1764_v2 }
 0x2bc   : > { %v1783_v30 = vsel %vm1740_vm4, %v1773_v29, 0.0 }
 0x2bd   : > { %1784 = vadd.xlane.f32.xlu0 %v1783_v30 }
 0x2ca   : > { %1794 = vrot.lane.b32.xlu1 %v1790_v3, %s2528_s24 }
 0x2d3   : > { %1796 = vrot.lane.b32.xlu0 %v1791_v31, %s2528_s24 }
 0x33e   : > { %v1776_v32 = vpop.xlane.xlu1 %1775 }
 0x33f   : > { %1786 = vst.msk [vmem:[%s525_s18] sm:$0xff] %vm1765_vm5, %v1776_v32 }
 0x342   : > { %v1782_v33 = vpop.xlane.xlu1 %1781  ;;  %v1779_v12 = vpop.xlane.xlu0 %1778 }
 0x343   : > { %1788 = vst.msk [vmem:[%s525_s18 + $0x10] sm:$0xff] %vm1765_vm5, %v1782_v33  ;;  %1787 = vst.msk [vmem:[%s525_s18 + $0x8] sm:$0xff] %vm1765_vm5, %v1779_v12 }
 0x346   : > { %v1795_v1 = vpop.permute.xlu1 %1794  ;;  %v1785_v34 = vpop.xlane.xlu0 %1784 }
 0x347   : > { %v1801_v35 = vsel %vm1798_vm6, 0, %v1795_v1  ;;  %1789 = vst.msk [vmem:[%s525_s18 + $0x18] sm:$0xff] %vm1765_vm5, %v1785_v34 }
 0x348   : > { %v1805_v16 = vsel %vm1804_vm7, %v1801_v35, 0 }
 0x349   : > { %v2222_v13 = vcombine.low %v1805_v16, %v1805_v16  ;;  %v2223_v36 = vcombine.high %v1805_v16, %v1805_v16 }
 0x34a   : > { %v1797_v37 = vpop.permute.xlu0 %1796 }
 0x34b   : > { %1822 = vst.msk [vmem:[%s507_s23] sm:$0xf] %vm1821_vm8, %v2222_v13  ;;  %1823 = vst.msk [vmem:[%s507_s23 + $0x4] sm:$0xf] %vm1821_vm8, %v2223_v36  ;;  %v1803_v38 = vsel %vm1798_vm6, 0, %v1797_v37 }
 0x34c   : > { %v1806_v39 = vsel %vm1804_vm7, %v1803_v38, 0 }
 0x34d   : > { %v2224_v40 = vcombine.low %v1806_v39, %v1806_v39  ;;  %v2225_v14 = vcombine.high %v1806_v39, %v1806_v39 }
 0x34f   : > { %1824 = vst.msk [vmem:[%s507_s23 + $0x8] sm:$0xf] %vm1821_vm8, %v2224_v40  ;;  %1825 = vst.msk [vmem:[%s507_s23 + $0xc] sm:$0xf] %vm1821_vm8, %v2225_v14 }
 0x350 PF: > { %s18_s28 = sadd.s32 1, %s2518_s28   ;;  %s3087_s24 = smov %s2510_s26 }
 0x351   : > { %p15_p7 = scmp.ge.s32.totalorder %s18_s28, 10   ;;  %s3088_s25 = smov %s2514_s27 }
 0x352   : > { %s3089_s26 = smov %s3092_s29  ;;  %s3090_s27 = smov %s3096_s30 }
 0x353   :  { %17 = sbr.rel (!%p15_p7) target bundleno = 3 (0x3), region = 100 }

// kernel: basic_block_forward.4
= control target key start
LH: loop header
LB: loop body
LE: loop exit
PB: predicated region body
PF: predicated region fallthrough
CT: control target
= control target key end

     0   :  { %s2806_s13 = smov 0   ;;  %s2808_s14 = smov 0   ;;  %s3394_s0 = inlined_call_operand.vmem [shape: bf16[2,4,32,38], index: 0, kind: input, shape index: {}, may-alias: {0,1,2}]   ;;  %s3395_s1 = inlined_call_operand.vmem [shape: bf16[2,4,32,38], index: 1, kind: input, shape index: {}, may-alias: {0,1,2}]   ;;  %s3396_s2 = inlined_call_operand.vmem [shape: bf16[2,4,32,38], index: 2, kind: input, shape index: {}, may-alias: {0,1,2}]   ;;  %s3397_s3 = inlined_call_operand.vmem [shape: bf16[32,864], index: 3, kind: input, shape index: {}]   ;;  %s3398_s4 = inlined_call_operand.vmem [shape: f32[1,24], index: 4, kind: input, shape index: {}]   ;;  %s3399_s5 = inlined_call_operand.vmem [shape: f32[1,38], index: 5, kind: input, shape index: {}]   ;;  %s3400_s6 = inlined_call_operand.vmem [shape: f32[32,1], index: 6, kind: input, shape index: {}]   ;;  %s3401_s7 = inlined_call_operand.vmem [shape: f32[32,1], index: 7, kind: input, shape index: {}]   ;;  %s3402_s8 = inlined_call_operand.vmem [shape: bf16[2,4,32,24], index: 8, kind: output, shape index: {0}]   ;;  %s3403_s9 = inlined_call_operand.vmem [shape: f32[2,4,32,1], index: 9, kind: output, shape index: {1}]   ;;  %s3404_s10 = inlined_call_operand.vmem [shape: f32[2,4,32,1], index: 10, kind: output, shape index: {2}]  }
   0x1   :  { %3407 = sst [smem:[#allocation7_spill]] %s3400_s6  ;;  %s2810_s15 = smov 0  }
   0x2   :  { %3408 = sst [smem:[#allocation8_spill]] %s3401_s7  ;;  %s2812_s16 = smov 0  }
   0x3   :  { %s2814_s17 = smov 0  }
   0x4 LB: > { %3409 = sst [smem:[#allocation3_spill]] %s2732_s15  ;;  %s30_s18 = sadd.s32 1, %s2732_s15  ;;  %s2740_s17 = sphi %s2814_s17, %s21_s17   ;;  %s2736_s16 = sphi %s2812_s16, %s3420_s16   ;;  %s2732_s15 = sphi %s2810_s15, %s3419_s15   ;;  %s2728_s14 = sphi %s2808_s14, %s3418_s14   ;;  %s2724_s13 = sphi %s2806_s13, %s3417_s13  }
   0x5   : > { %3410 = sst [smem:[#allocation4_spill]] %s2736_s16  ;;  %s33_s19 = sadd.s32 1, %s2736_s16 }
   0x6   : > { %p31_p0 = scmp.ge.s32.totalorder %s30_s18, 4  ;;  %p2283_p1 = scmp.ge.s32.totalorder %s2740_s17, 1 }
   0x7   : > { %p429_p2 = scmp.lt.s32.totalorder %s2740_s17, 9 }
   0x8   : > { %s3422_s18 = smov (%p31_p0, %s30_s18), 0  ;;  %s3424_s19 = smov (!%p31_p0, %s33_s19), %s2736_s16 }
   0x9   : > { %3411 = sst [smem:[#allocation5_spill]] %s3422_s18  ;;  %p430_p3 = pnand %p2283_p1, %p429_p2 }
   0xa   : > { %p35_p4 = scmp.ge.s32.totalorder %s3424_s19, 2  ;;  %s3413_s7 = sld [smem:[#allocation8_spill]] (!%p430_p3) }
   0xb   : > { %433 = sbr.rel (%p430_p3) target bundleno = 970 (0x3ca), region = 52  ;;  %s3414_s6 = sld [smem:[#allocation7_spill]] (!%p430_p3) }
   0xc   : > { %s3426_s19 = smov (%p35_p4, %s3424_s19), 0  ;;  %s2865_s23 = sadd.s32 (!%p430_p3), 4294967295, %s2724_s13 }
   0xd   : > { %3412 = sst [smem:[#allocation6_spill]] %s3426_s19  ;;  %p526_p5 = scmp.gt.s32.totalorder (!%p430_p3), %s2865_s23, 0 }
   0xe   : > { %s2869_s24 = sadd.s32 (!%p430_p3), 1, %s2724_s13  ;;  %p544_p6 = scmp.gt.s32.totalorder (!%p430_p3), %s2724_s13, 0 }
   0xf   : > { %p2284_p7 = scmp.lt.s32.totalorder (!%p430_p3), %s2865_s23, 3  ;;  %p562_p8 = scmp.gt.s32.totalorder (!%p430_p3), %s2869_s24, 0 }
  0x10   : > { %v646_v0 = vld [vmem:[%s3413_s7 + $0x10] sm:$0xff]  ;;  %v2742_v2 = vmov 0   ;;  %v647_v3 = vld [vmem:[%s3413_s7 + $0x18] sm:$0xff]  ;;  %v645_v7 = vld [vmem:[%s3413_s7 + $0x8] sm:$0xff]  ;;  %s527_s25 = scalar_select %p526_p5, %s2865_s23, 0  ;;  %vm807_vm0 = vcmask 191488  }
  0x11   : > { %v618_v1 = vld [vmem:[%s3414_s6 + $0x10] sm:$0xff]  ;;  %2628 = vset.pattern.permute.xlu1 %v2742_v2  ;;  %2627 = vset.pattern.permute.xlu0 %v2742_v2  ;;  %v619_v4 = vld [vmem:[%s3414_s6 + $0x18] sm:$0xff]  ;;  %v617_v5 = vld [vmem:[%s3414_s6 + $0x8] sm:$0xff]  ;;  %s545_s26 = scalar_select %p544_p6, %s2724_s13, 0  ;;  %vm1722_vm3 = vcmask 785408   ;;  %vm1936_vm4 = vcmask 195584  }
  0x12   : > { %660 = vperm.xlu1 %2628, %v646_v0   ;;  %632 = vperm.xlu0 %2627, %v618_v1   ;;  %v616_v6 = vld [vmem:[%s3414_s6] sm:$0xff]  ;;  %p2292_p9 = scmp.lt.s32.totalorder %s2724_s13, 3  ;;  %p2300_p10 = scmp.lt.s32.totalorder %s2869_s24, 3  ;;  %vm1961_vm5 = vcmask 7168  }
  0x13   : > { %v644_v8 = vld [vmem:[%s3413_s7] sm:$0xff]  ;;  %s563_s27 = scalar_select %p562_p8, %s2869_s24, 0 }
  0x14   : > { %s3428_s25 = smov (!%p2284_p7, %s527_s25), 3  ;;  %s3430_s26 = smov (!%p2292_p9, %s545_s26), 3  ;;  %v2920_v31 = vld [vmem:[%s3399_s5] ss:$0 sm:$0xff] }
  0x15   : > { %s3432_s27 = smov (!%p2300_p10, %s563_s27), 3  ;;  %p530_p11 = scmp.lt.s32.totalorder %s2728_s14, 1 }
  0x16   : > { %665 = vperm.xlu1 %2628, %v647_v3   ;;  %637 = vperm.xlu0 %2627, %v619_v4   ;;  %p532_p12 = scmp.lt.s32.totalorder %s3428_s25, 3  ;;  %p550_p13 = scmp.lt.s32.totalorder %s3430_s26, 3 }
  0x17   : > { %p568_p0 = scmp.lt.s32.totalorder %s3432_s27, 3  ;;  %s3434_s14 = smov (!%p530_p11, %s2728_s14), 1 }
  0x18   : > { %s3436_s25 = smov (!%p532_p12, %s3428_s25), 3  ;;  %s3438_s26 = smov (!%p550_p13, %s3430_s26), 3 }
  0x19   : > { %s3440_s27 = smov (!%p568_p0, %s3432_s27), 3  ;;  %s2289_s28 = sshll.u32 %s3436_s25, 2 }
  0x1a   : > { %627 = vperm.xlu1 %2628, %v617_v5   ;;  %622 = vperm.xlu0 %2627, %v616_v6   ;;  %s2883_s29 = sshll.u32 %s3434_s14, 4  ;;  %s2297_s30 = sshll.u32 %s3438_s26, 2 }
  0x1b   : > { %s2305_s11 = sshll.u32 %s3440_s27, 2  ;;  %s536_s12 = sadd.s32 %s2883_s29, %s2289_s28 }
  0x1c   : > { %s554_s20 = sadd.s32 %s2297_s30, %s2883_s29  ;;  %s572_s21 = sadd.s32 %s2305_s11, %s2883_s29 }
  0x1d   : > { %s2291_s22 = sshll.u32 %s536_s12, 2  ;;  %p688_p1 = scmp.ge.s32.totalorder %s2865_s23, 0 }
  0x1e   : > { %655 = vperm.xlu1 %2628, %v645_v7   ;;  %650 = vperm.xlu0 %2627, %v644_v8   ;;  %s2299_s6 = sshll.u32 %s554_s20, 2  ;;  %s2307_s7 = sshll.u32 %s572_s21, 2 }
  0x1f   : > { %s538_s16 = scalar_lea.vmem %s3394_s0, %s2291_s22  ;;  %p689_p2 = scmp.le.s32.totalorder %s2865_s23, 3 }
  0x20   : > { %p752_p3 = scmp.ge.s32.totalorder %s2869_s24, 0  ;;  %p753_p4 = scmp.le.s32.totalorder %s2869_s24, 3  ;;  %v2467_v9 = vld [vmem:[%s538_s16 + $0x8] sm:$0xff]   ;;  %v2444_v22 = vld [vmem:[%s538_s16] sm:$0xff]  }
  0x21   : > { %s556_s15 = scalar_lea.vmem %s3395_s1, %s2299_s6  ;;  %s574_s28 = scalar_lea.vmem %s3396_s2, %s2307_s7  ;;  %v2449_v12 = vunpack.c.l.bf16 %v2467_v9  ;;  %v2450_v17 = vunpack.c.h.bf16 %v2467_v9  ;;  %v2446_v34 = vunpack.c.h.bf16 %v2444_v22  ;;  %v2445_v36 = vunpack.c.l.bf16 %v2444_v22 }
  0x22   : > { %p2901_p5 = pnand %p689_p2, %p688_p1  ;;  %v2468_v10 = vld [vmem:[%s556_s15 + $0x8] sm:$0xff]   ;;  %p2905_p6 = pnand %p753_p4, %p752_p3  ;;  %v2452_v23 = vld [vmem:[%s556_s15] sm:$0xff]  }
  0x23   : > { %v2469_v11 = vld [vmem:[%s574_s28 + $0x8] sm:$0xff]   ;;  %v2457_v13 = vunpack.c.l.bf16 %v2468_v10  ;;  %v2458_v24 = vunpack.c.h.bf16 %v2468_v10  ;;  %v2460_v30 = vld [vmem:[%s574_s28] sm:$0xff]   ;;  %v2454_v35 = vunpack.c.h.bf16 %v2452_v23  ;;  %v2453_v52 = vunpack.c.l.bf16 %v2452_v23  ;;  %s2743_s15 = smov 126   ;;  %s2744_s16 = smov 127  }
  0x24   : > { %s2318_s6 = scalar_select %p2901_p5, 0, 1  ;;  %v2465_v14 = vunpack.c.l.bf16 %v2469_v11  ;;  %v2466_v25 = vunpack.c.h.bf16 %v2469_v11  ;;  %v2462_v43 = vunpack.c.h.bf16 %v2460_v30  ;;  %v2461_v53 = vunpack.c.l.bf16 %v2460_v30 }
  0x25   : > { %s2319_s7 = scalar_select %p2905_p6, 0, 1 }
  0x26   : > { %v2913_v19 = vstv %s2318_s6  ;;  %s2745_s24 = smov 122   ;;  %s2746_s11 = smov 116  }
  0x27   : > { %v2915_v29 = vstv %s2319_s7  ;;  %vm694_vm1 = vcmp.eq.s32.totalorder %v2913_v19, 1  ;;  %s2747_s12 = smov 121   ;;  %s2748_s20 = smov 115   ;;  %v2656_v19 = vld [vmem:[%s3397_s3 + $0x4] ss:$28 sps:$4 sm:$0xff]  }
  0x28   : > { %vm758_vm2 = vcmp.eq.s32.totalorder %v2915_v29, 1  ;;  %s2749_s21 = smov 120   ;;  %1761 = vmatprep.mubr.bf16.mxu0 %v2656_v19  ;;  %s2750_s27 = smov 114  }
  0x29   : > { %s3442_s13 = smov (!%p2292_p9, %s2724_s13), 3 }
  0x8d   : > { %v661_v15 = vpop.permute.xlu1 %660  ;;  %v633_v16 = vpop.permute.xlu0 %632 }
  0x8e   : > { %v642_v18 = vmul.f32 %v2449_v12, %v633_v16  ;;  %v711_v20 = vmul.f32 %v2457_v13, %v633_v16  ;;  %v737_v21 = vmul.f32 %v2465_v14, %v633_v16 }
  0x90   : > { %v670_v26 = vadd.f32 %v661_v15, %v642_v18  ;;  %v715_v27 = vadd.f32 %v711_v20, %v661_v15  ;;  %v741_v28 = vadd.f32 %v737_v21, %v661_v15 }
  0x91   : > { %v666_v32 = vpop.permute.xlu1 %665  ;;  %v638_v33 = vpop.permute.xlu0 %637 }
  0x92   : > { %v674_v37 = vmax.f32 %v670_v26, 0.0  ;;  %v719_v38 = vmax.f32 %v715_v27, 0.0  ;;  %v745_v39 = vmax.f32 %v741_v28, 0.0  ;;  %v643_v40 = vmul.f32 %v2450_v17, %v638_v33 }
  0x93   : > { %v712_v41 = vmul.f32 %v2458_v24, %v638_v33  ;;  %v738_v42 = vmul.f32 %v2466_v25, %v638_v33 }
  0x94   : > { %v685_v44 = vmul.f32 %v2920_v31, %v674_v37  ;;  %v723_v45 = vmul.f32 %v2920_v31, %v719_v38  ;;  %v749_v46 = vmul.f32 %v2920_v31, %v745_v39  ;;  %v671_v47 = vadd.f32 %v666_v32, %v643_v40 }
  0x95   : > { %v716_v48 = vadd.f32 %v712_v41, %v666_v32  ;;  %v742_v49 = vadd.f32 %v738_v42, %v666_v32  ;;  %v628_v50 = vpop.permute.xlu1 %627  ;;  %v623_v51 = vpop.permute.xlu0 %622 }
  0x96   : > { %v697_v54 = vsel %vm694_vm1, %v685_v44, 0.0  ;;  %v761_v55 = vsel %vm758_vm2, %v749_v46, 0.0  ;;  %v2931_v56 = vpack.c.bf16 %v723_v45, %v723_v45  ;;  %v675_v57 = vmax.f32 %v671_v47, 0.0 }
  0x97   : > { %v2933_v58 = vpack.c.bf16 %v697_v54, %v697_v54  ;;  %v2935_v59 = vpack.c.bf16 %v761_v55, %v761_v55  ;;  %v720_v60 = vmax.f32 %v716_v48, 0.0  ;;  %v746_v61 = vmax.f32 %v742_v49, 0.0 }
  0x98   : > { %v686_v62 = vmul.f32 %v2920_v31, %v675_v57  ;;  %v641_v63 = vmul.f32 %v2446_v34, %v628_v50  ;;  %v710_v0 = vmul.f32 %v2454_v35, %v628_v50  ;;  %v736_v1 = vmul.f32 %v2462_v43, %v628_v50  ;;  %880 = vrot.lane.b32.xlu0 %v2931_v56, %s2743_s15 }
  0x99   : > { %814 = vst.msk [vmem:[#allocation2 + $0x18] sm:$0xf] %vm807_vm0, %v2931_v56  ;;  %v724_v2 = vmul.f32 %v2920_v31, %v720_v60  ;;  %v750_v3 = vmul.f32 %v2920_v31, %v746_v61  ;;  %v640_v4 = vmul.f32 %v2445_v36, %v623_v51  ;;  %v709_v5 = vmul.f32 %v2453_v52, %v623_v51  ;;  %v656_v6 = vpop.permute.xlu1 %655  ;;  %v651_v7 = vpop.permute.xlu0 %650 }
  0x9a   : > { %810 = vst.msk [vmem:[#allocation2 + $0x8] sm:$0xf] %vm807_vm0, %v2933_v58  ;;  %818 = vst.msk [vmem:[#allocation2 + $0x28] sm:$0xf] %vm807_vm0, %v2935_v59  ;;  %v698_v8 = vsel %vm694_vm1, %v686_v62, 0.0  ;;  %v735_v9 = vmul.f32 %v2461_v53, %v623_v51  ;;  %v669_v10 = vadd.f32 %v656_v6, %v641_v63  ;;  %v714_v11 = vadd.f32 %v710_v0, %v656_v6 }
  0x9b   : > { %v762_v12 = vsel %vm758_vm2, %v750_v3, 0.0  ;;  %v2952_v13 = vpack.c.bf16 %v698_v8, %v698_v8  ;;  %v2954_v14 = vpack.c.bf16 %v724_v2, %v724_v2  ;;  %v740_v15 = vadd.f32 %v736_v1, %v656_v6  ;;  %v2677_v62 = vld [vmem:[%s3397_s3 + $0xc] ss:$28 sps:$4 sm:$0xff]  }
  0x9c   : > { %v2956_v16 = vpack.c.bf16 %v762_v12, %v762_v12  ;;  %v673_v17 = vmax.f32 %v669_v10, 0.0  ;;  %v718_v18 = vmax.f32 %v714_v11, 0.0  ;;  %v668_v20 = vadd.f32 %v651_v7, %v640_v4  ;;  %1810 = vmatprep.mubr.bf16.mxu1 %v2677_v62 }
  0x9d   : > { %v744_v21 = vmax.f32 %v740_v15, 0.0  ;;  %v713_v22 = vadd.f32 %v709_v5, %v651_v7  ;;  %v739_v23 = vadd.f32 %v735_v9, %v651_v7  ;;  %882 = vrot.lane.b32.xlu1 %v2954_v14, %s2743_s15  ;;  %811 = vst.msk [vmem:[#allocation2 + $0xc] sm:$0xf] %vm807_vm0, %v2952_v13  ;;  %815 = vst.msk [vmem:[#allocation2 + $0x1c] sm:$0xf] %vm807_vm0, %v2954_v14 }
  0x9e   : > { %v684_v24 = vmul.f32 %v2920_v31, %v673_v17  ;;  %v722_v25 = vmul.f32 %v2920_v31, %v718_v18  ;;  %v672_v26 = vmax.f32 %v668_v20, 0.0  ;;  %819 = vst.msk [vmem:[#allocation2 + $0x2c] sm:$0xf] %vm807_vm0, %v2956_v16 }
  0x9f   : > { %v748_v27 = vmul.f32 %v2920_v31, %v744_v21  ;;  %v717_v28 = vmax.f32 %v713_v22, 0.0  ;;  %v743_v30 = vmax.f32 %v739_v23, 0.0 }
  0xa0   : > { %v696_v32 = vsel %vm694_vm1, %v684_v24, 0.0  ;;  %v2971_v33 = vpack.c.bf16 %v722_v25, %v722_v25  ;;  %v683_v34 = vmul.f32 %v2920_v31, %v672_v26 }
  0xa1   : > { %v760_v35 = vsel %vm758_vm2, %v748_v27, 0.0  ;;  %v2976_v36 = vpack.c.bf16 %v696_v32, %v696_v32  ;;  %v721_v37 = vmul.f32 %v2920_v31, %v717_v28  ;;  %v747_v38 = vmul.f32 %v2920_v31, %v743_v30 }
  0xa2   : > { %v2980_v39 = vpack.c.bf16 %v760_v35, %v760_v35  ;;  %v695_v40 = vsel %vm694_vm1, %v683_v34, 0.0  ;;  %878 = vrot.lane.b32.xlu1 %v2971_v33, %s2743_s15  ;;  %813 = vst.msk [vmem:[#allocation2 + $0x14] sm:$0xf] %vm807_vm0, %v2971_v33 }
  0xa3   : > { %v759_v41 = vsel %vm758_vm2, %v747_v38, 0.0  ;;  %v2990_v42 = vpack.c.bf16 %v695_v40, %v695_v40  ;;  %v2992_v43 = vpack.c.bf16 %v721_v37, %v721_v37  ;;  %809 = vst.msk [vmem:[#allocation2 + $0x4] sm:$0xf] %vm807_vm0, %v2976_v36 }
  0xa4   : > { %v2996_v31 = vpack.c.bf16 %v759_v41, %v759_v41  ;;  %817 = vst.msk [vmem:[#allocation2 + $0x24] sm:$0xf] %vm807_vm0, %v2980_v39  ;;  %v2638_v32 = vld [vmem:[#allocation2 + $0x18] sm:$0xff]   ;;  %v2643_v40 = vld [vmem:[#allocation2 + $0x8] sm:$0xff]  }
  0xa5   : > { %876 = vrot.lane.b32.xlu0 %v2992_v43, %s2743_s15  ;;  %808 = vst.msk [vmem:[#allocation2] sm:$0xf] %vm807_vm0, %v2990_v42  ;;  %812 = vst.msk [vmem:[#allocation2 + $0x10] sm:$0xf] %vm807_vm0, %v2992_v43  ;;  %v2634_v23 = vld [vmem:[#allocation2 + $0x28] sm:$0xff]  }
  0xa6   : > { %834 = vrot.lane.b32.xlu1 %v2954_v14, %s2744_s16  ;;  %816 = vst.msk [vmem:[#allocation2 + $0x20] sm:$0xf] %vm807_vm0, %v2996_v31 }
  0xa9   : > { %832 = vrot.lane.b32.xlu0 %v2931_v56, %s2744_s16 }
  0xaa   : > { %830 = vrot.lane.b32.xlu1 %v2971_v33, %s2744_s16 }
  0xac   : > { %v2640_v35 = vld [vmem:[#allocation2 + $0x10] sm:$0xff]   ;;  %v2646_v19 = vld [vmem:[#allocation2] sm:$0xff]  }
  0xad   : > { %828 = vrot.lane.b32.xlu0 %v2992_v43, %s2744_s16  ;;  %v2636_v27 = vld [vmem:[#allocation2 + $0x20] sm:$0xff]  }
  0xae   : > { %930 = vrot.lane.b32.xlu1 %v2954_v14, %s2745_s24 }
  0xb1   : > { %928 = vrot.lane.b32.xlu0 %v2931_v56, %s2745_s24 }
  0xb2   : > { %926 = vrot.lane.b32.xlu1 %v2971_v33, %s2745_s24 }
  0xb5   : > { %924 = vrot.lane.b32.xlu0 %v2992_v43, %s2745_s24 }
  0xb6   : > { %1074 = vrot.lane.b32.xlu1 %v2954_v14, %s2746_s11 }
  0xb9   : > { %1072 = vrot.lane.b32.xlu0 %v2931_v56, %s2746_s11 }
  0xba   : > { %978 = vrot.lane.b32.xlu1 %v2954_v14, %s2747_s12 }
  0xbd   : > { %976 = vrot.lane.b32.xlu0 %v2931_v56, %s2747_s12 }
  0xbe   : > { %1070 = vrot.lane.b32.xlu1 %v2971_v33, %s2746_s11 }
  0xc1   : > { %1068 = vrot.lane.b32.xlu0 %v2992_v43, %s2746_s11 }
  0xc2   : > { %974 = vrot.lane.b32.xlu1 %v2971_v33, %s2747_s12 }
  0xc5   : > { %972 = vrot.lane.b32.xlu0 %v2992_v43, %s2747_s12 }
  0xc6   : > { %1122 = vrot.lane.b32.xlu1 %v2954_v14, %s2748_s20 }
  0xc9   : > { %1120 = vrot.lane.b32.xlu0 %v2931_v56, %s2748_s20 }
  0xca   : > { %1118 = vrot.lane.b32.xlu1 %v2971_v33, %s2748_s20 }
  0xcd   : > { %1116 = vrot.lane.b32.xlu0 %v2992_v43, %s2748_s20 }
  0xce   : > { %826 = vrot.lane.b32.xlu1 %v2952_v13, %s2744_s16 }
  0xd1   : > { %824 = vrot.lane.b32.xlu0 %v2933_v58, %s2744_s16 }
  0xd2   : > { %822 = vrot.lane.b32.xlu1 %v2976_v36, %s2744_s16 }
  0xd5   : > { %820 = vrot.lane.b32.xlu0 %v2990_v42, %s2744_s16 }
  0xd6   : > { %874 = vrot.lane.b32.xlu1 %v2952_v13, %s2743_s15 }
  0xd9   : > { %872 = vrot.lane.b32.xlu0 %v2933_v58, %s2743_s15 }
  0xda   : > { %870 = vrot.lane.b32.xlu1 %v2976_v36, %s2743_s15 }
  0xdd   : > { %868 = vrot.lane.b32.xlu0 %v2990_v42, %s2743_s15 }
  0xde   : > { %842 = vrot.lane.b32.xlu1 %v2956_v16, %s2744_s16 }
  0xe1   : > { %840 = vrot.lane.b32.xlu0 %v2935_v59, %s2744_s16 }
  0xe2   : > { %838 = vrot.lane.b32.xlu1 %v2980_v39, %s2744_s16 }
  0xe5   : > { %836 = vrot.lane.b32.xlu0 %v2996_v31, %s2744_s16 }
  0xe6   : > { %1018 = vrot.lane.b32.xlu1 %v2952_v13, %s2749_s21 }
  0xe9   : > { %1016 = vrot.lane.b32.xlu0 %v2933_v58, %s2749_s21 }
  0xea   : > { %938 = vrot.lane.b32.xlu1 %v2956_v16, %s2745_s24 }
  0xed   : > { %936 = vrot.lane.b32.xlu0 %v2935_v59, %s2745_s24 }
  0xee   : > { %1014 = vrot.lane.b32.xlu1 %v2976_v36, %s2749_s21 }
  0xf1   : > { %1012 = vrot.lane.b32.xlu0 %v2990_v42, %s2749_s21 }
  0xf2   : > { %934 = vrot.lane.b32.xlu1 %v2980_v39, %s2745_s24 }
  0xf5   : > { %932 = vrot.lane.b32.xlu0 %v2996_v31, %s2745_s24 }
  0xf6   : > { %986 = vrot.lane.b32.xlu1 %v2956_v16, %s2747_s12 }
  0xf9   : > { %984 = vrot.lane.b32.xlu0 %v2935_v59, %s2747_s12 }
  0xfa   : > { %982 = vrot.lane.b32.xlu1 %v2980_v39, %s2747_s12 }
  0xfd   : > { %980 = vrot.lane.b32.xlu0 %v2996_v31, %s2747_s12 }
  0xfe   : > { %1130 = vrot.lane.b32.xlu1 %v2956_v16, %s2748_s20 }
 0x101   : > { %1128 = vrot.lane.b32.xlu0 %v2935_v59, %s2748_s20 }
 0x102   : > { %1126 = vrot.lane.b32.xlu1 %v2980_v39, %s2748_s20 }
 0x105   : > { %1124 = vrot.lane.b32.xlu0 %v2996_v31, %s2748_s20 }
 0x106   : > { %922 = vrot.lane.b32.xlu1 %v2952_v13, %s2745_s24 }
 0x109   : > { %920 = vrot.lane.b32.xlu0 %v2933_v58, %s2745_s24 }
 0x10a   : > { %v881_v29 = vpop.permute.xlu0 %880  ;;  %918 = vrot.lane.b32.xlu1 %v2976_v36, %s2745_s24 }
 0x10b   : > { %910 = vst.msk [vmem:[#allocation2 + $0x78] sm:$0xf] %vm807_vm0, %v881_v29  ;;  %v2654_v29 = vld [vmem:[%s3397_s3] ss:$28 sps:$4 sm:$0xff]  }
 0x10d   : > { %916 = vrot.lane.b32.xlu0 %v2990_v42, %s2745_s24 }
 0x10e   : > { %1066 = vrot.lane.b32.xlu1 %v2952_v13, %s2746_s11 }
 0x10f   : > { %v883_v44 = vpop.permute.xlu1 %882 }
 0x110   : > { %911 = vst.msk [vmem:[#allocation2 + $0x7c] sm:$0xf] %vm807_vm0, %v883_v44  ;;  %v2686_v44 = vld [vmem:[%s3397_s3 + $0x3c] ss:$28 sps:$4 sm:$0xff]  }
 0x111   : > { %1064 = vrot.lane.b32.xlu0 %v2933_v58, %s2746_s11 }
 0x112   : > { %970 = vrot.lane.b32.xlu1 %v2952_v13, %s2747_s12 }
 0x114   : > { %v879_v45 = vpop.permute.xlu1 %878 }
 0x115   : > { %968 = vrot.lane.b32.xlu0 %v2933_v58, %s2747_s12  ;;  %909 = vst.msk [vmem:[#allocation2 + $0x74] sm:$0xf] %vm807_vm0, %v879_v45 }
 0x116   : > { %890 = vrot.lane.b32.xlu1 %v2956_v16, %s2743_s15 }
 0x117   : > { %v877_v46 = vpop.permute.xlu0 %876  ;;  %v2629_v47 = vld [vmem:[#allocation2 + $0x78] sm:$0xff]  }
 0x118   : > { %908 = vst.msk [vmem:[#allocation2 + $0x70] sm:$0xf] %vm807_vm0, %v877_v46  ;;  %v835_v48 = vpop.permute.xlu1 %834  ;;  %2470 = vmatprep.subr.bf16.mxu0 %v2629_v47 }
 0x119   : > { %888 = vrot.lane.b32.xlu0 %v2935_v59, %s2743_s15  ;;  %863 = vst.msk [vmem:[#allocation2 + $0x4c] sm:$0xf] %vm807_vm0, %v835_v48 }
 0x11a   : > { %1062 = vrot.lane.b32.xlu1 %v2976_v36, %s2746_s11 }
 0x11b   : > { %v833_v49 = vpop.permute.xlu0 %832 }
 0x11c   : > { %862 = vst.msk [vmem:[#allocation2 + $0x48] sm:$0xf] %vm807_vm0, %v833_v49  ;;  %v831_v50 = vpop.permute.xlu1 %830 }
 0x11d   : > { %1060 = vrot.lane.b32.xlu0 %v2990_v42, %s2746_s11  ;;  %861 = vst.msk [vmem:[#allocation2 + $0x44] sm:$0xf] %vm807_vm0, %v831_v50 }
 0x11e   : > { %966 = vrot.lane.b32.xlu1 %v2976_v36, %s2747_s12 }
 0x11f   : > { %v829_v51 = vpop.permute.xlu0 %828 }
 0x120   : > { %860 = vst.msk [vmem:[#allocation2 + $0x40] sm:$0xf] %vm807_vm0, %v829_v51  ;;  %v931_v52 = vpop.permute.xlu1 %930  ;;  %v2688_v51 = vld [vmem:[%s3397_s3 + $0x38] ss:$28 sps:$4 sm:$0xff]  }
 0x121   : > { %964 = vrot.lane.b32.xlu0 %v2990_v42, %s2747_s12  ;;  %959 = vst.msk [vmem:[#allocation2 + $0xac] sm:$0xf] %vm807_vm0, %v931_v52  ;;  %v2693_v52 = vld [vmem:[%s3397_s3 + $0x14] ss:$28 sps:$4 sm:$0xff]  }
 0x122   : > { %1114 = vrot.lane.b32.xlu1 %v2952_v13, %s2748_s20 }
 0x123   : > { %v929_v53 = vpop.permute.xlu0 %928 }
 0x124   : > { %958 = vst.msk [vmem:[#allocation2 + $0xa8] sm:$0xf] %vm807_vm0, %v929_v53  ;;  %v927_v54 = vpop.permute.xlu1 %926 }
 0x125   : > { %1112 = vrot.lane.b32.xlu0 %v2933_v58, %s2748_s20  ;;  %957 = vst.msk [vmem:[#allocation2 + $0xa4] sm:$0xf] %vm807_vm0, %v927_v54 }
 0x126   : > { %886 = vrot.lane.b32.xlu1 %v2980_v39, %s2743_s15 }
 0x127   : > { %v925_v55 = vpop.permute.xlu0 %924  ;;  %v2644_v41 = vld [vmem:[#allocation2 + $0x40] sm:$0xff]  }
 0x128   : > { %956 = vst.msk [vmem:[#allocation2 + $0xa0] sm:$0xf] %vm807_vm0, %v925_v55  ;;  %v1075_v57 = vpop.permute.xlu1 %1074 }
 0x129   : > { %884 = vrot.lane.b32.xlu0 %v2996_v31, %s2743_s15  ;;  %1103 = vst.msk [vmem:[#allocation2 + $0x13c] sm:$0xf] %vm807_vm0, %v1075_v57  ;;  %s2308_s15 = sshll.u32 %s3442_s13, 2 }
 0x12a   : > { %1034 = vrot.lane.b32.xlu1 %v2956_v16, %s2749_s21  ;;  %s3339_s16 = sadd.s32 %s2308_s15, %s2883_s29 }
 0x12b   : > { %v1073_v60 = vpop.permute.xlu0 %1072  ;;  %v2650_v57 = vld [vmem:[#allocation2 + $0xa8] sm:$0xff]   ;;  %s2310_s13 = sshll.u32 %s3339_s16, 2 }
 0x12c   : > { %1102 = vst.msk [vmem:[#allocation2 + $0x138] sm:$0xf] %vm807_vm0, %v1073_v60  ;;  %v979_v61 = vpop.permute.xlu1 %978 }
 0x12d   : > { %1032 = vrot.lane.b32.xlu0 %v2935_v59, %s2749_s21  ;;  %1007 = vst.msk [vmem:[#allocation2 + $0xdc] sm:$0xf] %vm807_vm0, %v979_v61 }
 0x12e   : > { %1110 = vrot.lane.b32.xlu1 %v2976_v36, %s2748_s20 }
 0x12f   : > { %v977_v63 = vpop.permute.xlu0 %976 }
 0x130   : > { %1006 = vst.msk [vmem:[#allocation2 + $0xd8] sm:$0xf] %vm807_vm0, %v977_v63  ;;  %v1071_v0 = vpop.permute.xlu1 %1070  ;;  %v2652_v63 = vld [vmem:[#allocation2 + $0xa0] sm:$0xff]  }
 0x131   : > { %1108 = vrot.lane.b32.xlu0 %v2990_v42, %s2748_s20  ;;  %1101 = vst.msk [vmem:[#allocation2 + $0x134] sm:$0xf] %vm807_vm0, %v1071_v0  ;;  %s588_s20 = scalar_lea.vmem %s3402_s8, %s2310_s13 }
 0x132   : > { %1178 = vrot.lane.b32.xlu1 %v2956_v16, %s2750_s27 }
 0x133   : > { %v1069_v1 = vpop.permute.xlu0 %1068 }
 0x134   : > { %1100 = vst.msk [vmem:[#allocation2 + $0x130] sm:$0xf] %vm807_vm0, %v1069_v1  ;;  %v975_v2 = vpop.permute.xlu1 %974 }
 0x135   : > { %1176 = vrot.lane.b32.xlu0 %v2935_v59, %s2750_s27  ;;  %1005 = vst.msk [vmem:[#allocation2 + $0xd4] sm:$0xf] %vm807_vm0, %v975_v2 }
 0x136   : > { %1030 = vrot.lane.b32.xlu1 %v2980_v39, %s2749_s21 }
 0x137   : > { %v973_v3 = vpop.permute.xlu0 %972  ;;  %v2653_v0 = vld [vmem:[#allocation2 + $0xd8] sm:$0xff]  }
 0x138   : > { %1004 = vst.msk [vmem:[#allocation2 + $0xd0] sm:$0xf] %vm807_vm0, %v973_v3  ;;  %v1123_v4 = vpop.permute.xlu1 %1122 }
 0x139   : > { %1028 = vrot.lane.b32.xlu0 %v2996_v31, %s2749_s21  ;;  %1151 = vst.msk [vmem:[#allocation2 + $0x16c] sm:$0xf] %vm807_vm0, %v1123_v4  ;;  %v2658_v4 = vld [vmem:[#allocation2 + $0x138] sm:$0xff]  }
 0x13a   : > { %1082 = vrot.lane.b32.xlu1 %v2956_v16, %s2746_s11  ;;  %v2631_v16 = vld [vmem:[#allocation2 + $0x70] sm:$0xff]  }
 0x13b   : > { %v1121_v5 = vpop.permute.xlu0 %1120 }
 0x13c   : > { %1150 = vst.msk [vmem:[#allocation2 + $0x168] sm:$0xf] %vm807_vm0, %v1121_v5  ;;  %v1119_v6 = vpop.permute.xlu1 %1118 }
 0x13d   : > { %1080 = vrot.lane.b32.xlu0 %v2935_v59, %s2746_s11  ;;  %1149 = vst.msk [vmem:[#allocation2 + $0x164] sm:$0xf] %vm807_vm0, %v1119_v6 }
 0x13e   : > { %1174 = vrot.lane.b32.xlu1 %v2980_v39, %s2750_s27 }
 0x13f   : > { %v1117_v7 = vpop.permute.xlu0 %1116 }
 0x140   : > { %1148 = vst.msk [vmem:[#allocation2 + $0x160] sm:$0xf] %vm807_vm0, %v1117_v7  ;;  %v827_v8 = vpop.permute.xlu1 %826 }
 0x141   : > { %1172 = vrot.lane.b32.xlu0 %v2996_v31, %s2750_s27  ;;  %859 = vst.msk [vmem:[#allocation2 + $0x3c] sm:$0xf] %vm807_vm0, %v827_v8  ;;  %v2660_v8 = vld [vmem:[#allocation2 + $0x130] sm:$0xff]  }
 0x142   : > { %1026 = vrot.lane.b32.xlu1 %v2954_v14, %s2749_s21 }
 0x143   : > { %v825_v9 = vpop.permute.xlu0 %824 }
 0x144   : > { %858 = vst.msk [vmem:[#allocation2 + $0x38] sm:$0xf] %vm807_vm0, %v825_v9  ;;  %v823_v59 = vpop.permute.xlu1 %822  ;;  %v2661_v9 = vld [vmem:[#allocation2 + $0x168] sm:$0xff]  }
 0x145   : > { %1024 = vrot.lane.b32.xlu0 %v2931_v56, %s2749_s21  ;;  %857 = vst.msk [vmem:[#allocation2 + $0x34] sm:$0xf] %vm807_vm0, %v823_v59 }
 0x146   : > { %1078 = vrot.lane.b32.xlu1 %v2980_v39, %s2746_s11 }
 0x147   : > { %v821_v10 = vpop.permute.xlu0 %820 }
 0x148   : > { %856 = vst.msk [vmem:[#allocation2 + $0x30] sm:$0xf] %vm807_vm0, %v821_v10  ;;  %v875_v11 = vpop.permute.xlu1 %874 }
 0x149   : > { %1076 = vrot.lane.b32.xlu0 %v2996_v31, %s2746_s11  ;;  %907 = vst.msk [vmem:[#allocation2 + $0x6c] sm:$0xf] %vm807_vm0, %v875_v11 }
 0x14a   : > { %1170 = vrot.lane.b32.xlu1 %v2954_v14, %s2750_s27 }
 0x14b   : > { %v873_v12 = vpop.permute.xlu0 %872  ;;  %v2630_v15 = vld [vmem:[#allocation2 + $0x38] sm:$0xff]  }
 0x14c   : > { %906 = vst.msk [vmem:[#allocation2 + $0x68] sm:$0xf] %vm807_vm0, %v873_v12  ;;  %v871_v17 = vpop.permute.xlu1 %870  ;;  %2471 = vmatpush3.bf16.msra.mxu0 %v2630_v15  ;;  %v2663_v12 = vld [vmem:[#allocation2 + $0xd0] sm:$0xff]  }
 0x14d   : > { %1168 = vrot.lane.b32.xlu0 %v2931_v56, %s2750_s27  ;;  %905 = vst.msk [vmem:[#allocation2 + $0x64] sm:$0xf] %vm807_vm0, %v871_v17  ;;  %2472 = vmatprep.subr.bf16.mxu0 %v2631_v16 }
 0x14e   : > { %1022 = vrot.lane.b32.xlu1 %v2971_v33, %s2749_s21 }
 0x14f   : > { %v869_v18 = vpop.permute.xlu0 %868  ;;  %v2632_v20 = vld [vmem:[#allocation2 + $0x30] sm:$0xff]  }
 0x150   : > { %904 = vst.msk [vmem:[#allocation2 + $0x60] sm:$0xf] %vm807_vm0, %v869_v18  ;;  %v843_v14 = vpop.permute.xlu1 %842  ;;  %2473 = vmatpush3.bf16.msra.mxu0 %v2632_v20 }
 0x151   : > { %1020 = vrot.lane.b32.xlu0 %v2992_v43, %s2749_s21  ;;  %867 = vst.msk [vmem:[#allocation2 + $0x5c] sm:$0xf] %vm807_vm0, %v843_v14  ;;  %s2313_s21 = sshll.u32 %s3339_s16, 3 }
 0x152   : > { %1166 = vrot.lane.b32.xlu1 %v2971_v33, %s2750_s27  ;;  %s597_s25 = scalar_lea.vmem %s3403_s9, %s2313_s21  ;;  %s606_s28 = scalar_lea.vmem %s3404_s10, %s2313_s21 }
 0x153   : > { %v841_v56 = vpop.permute.xlu0 %840  ;;  %v2633_v21 = vld [vmem:[#allocation2 + $0x68] sm:$0xff]  }
 0x154   : > { %866 = vst.msk [vmem:[#allocation2 + $0x58] sm:$0xf] %vm807_vm0, %v841_v56  ;;  %v839_v22 = vpop.permute.xlu1 %838  ;;  %2474 = vmatprep.subr.bf16.mxu0 %v2633_v21  ;;  %v2666_v56 = vld [vmem:[#allocation2 + $0x160] sm:$0xff]  }
 0x155   : > { %1164 = vrot.lane.b32.xlu0 %v2992_v43, %s2750_s27  ;;  %865 = vst.msk [vmem:[#allocation2 + $0x54] sm:$0xf] %vm807_vm0, %v839_v22  ;;  %2475 = vmatpush3.bf16.msra.mxu0 %v2634_v23 }
 0x156   : > { %1162 = vrot.lane.b32.xlu1 %v2952_v13, %s2750_s27 }
 0x157   : > { %v837_v24 = vpop.permute.xlu0 %836  ;;  %v2635_v25 = vld [vmem:[#allocation2 + $0x60] sm:$0xff]  }
 0x158   : > { %864 = vst.msk [vmem:[#allocation2 + $0x50] sm:$0xf] %vm807_vm0, %v837_v24  ;;  %v1019_v26 = vpop.permute.xlu1 %1018  ;;  %2476 = vmatprep.subr.bf16.mxu0 %v2635_v25 }
 0x159   : > { %1160 = vrot.lane.b32.xlu0 %v2933_v58, %s2750_s27  ;;  %1051 = vst.msk [vmem:[#allocation2 + $0xfc] sm:$0xf] %vm807_vm0, %v1019_v26  ;;  %2477 = vmatpush3.bf16.msra.mxu0 %v2636_v27 }
 0x15a   : > { %1158 = vrot.lane.b32.xlu1 %v2976_v36, %s2750_s27  ;;  %v2641_v36 = vld [vmem:[#allocation2 + $0x48] sm:$0xff]  }
 0x15b   : > { %v1017_v28 = vpop.permute.xlu0 %1016  ;;  %v2637_v30 = vld [vmem:[#allocation2 + $0x58] sm:$0xff]  }
 0x15c   : > { %1050 = vst.msk [vmem:[#allocation2 + $0xf8] sm:$0xf] %vm807_vm0, %v1017_v28  ;;  %v939_v13 = vpop.permute.xlu1 %938  ;;  %2478 = vmatprep.subr.bf16.mxu0 %v2637_v30 }
 0x15d   : > { %1156 = vrot.lane.b32.xlu0 %v2990_v42, %s2750_s27  ;;  %963 = vst.msk [vmem:[#allocation2 + $0xbc] sm:$0xf] %vm807_vm0, %v939_v13  ;;  %2479 = vmatpush3.bf16.msra.mxu0 %v2638_v32 }
 0x15f   : > { %v937_v58 = vpop.permute.xlu0 %936  ;;  %v2639_v33 = vld [vmem:[#allocation2 + $0x50] sm:$0xff]  }
 0x160   : > { %962 = vst.msk [vmem:[#allocation2 + $0xb8] sm:$0xf] %vm807_vm0, %v937_v58  ;;  %v1015_v34 = vpop.permute.xlu1 %1014  ;;  %2480 = vmatprep.subr.bf16.mxu0 %v2639_v33 }
 0x161   : > { %1049 = vst.msk [vmem:[#allocation2 + $0xf4] sm:$0xf] %vm807_vm0, %v1015_v34  ;;  %2481 = vmatpush3.bf16.msra.mxu0 %v2640_v35 }
 0x162   : > { %2482 = vmatprep.subr.bf16.mxu0 %v2641_v36 }
 0x163   : > { %v1013_v37 = vpop.permute.xlu0 %1012  ;;  %v2642_v38 = vld [vmem:[#allocation2 + $0xf8] sm:$0xff]  }
 0x164   : > { %1048 = vst.msk [vmem:[#allocation2 + $0xf0] sm:$0xf] %vm807_vm0, %v1013_v37  ;;  %v935_v39 = vpop.permute.xlu1 %934  ;;  %2498 = vmatprep.subr.bf16.mxu1 %v2642_v38 }
 0x165   : > { %961 = vst.msk [vmem:[#allocation2 + $0xb4] sm:$0xf] %vm807_vm0, %v935_v39  ;;  %2483 = vmatpush3.bf16.msra.mxu0 %v2643_v40  ;;  %v2675_v39 = vld [vmem:[%s3397_s3 + $0x8] ss:$28 sps:$4 sm:$0xff]  }
 0x166   : > { %2484 = vmatprep.subr.bf16.mxu0 %v2644_v41  ;;  %v2684_v40 = vld [vmem:[%s3397_s3 + $0x44] ss:$28 sps:$4 sm:$0xff]  }
 0x167   : > { %v933_v42 = vpop.permute.xlu0 %932  ;;  %v2645_v43 = vld [vmem:[#allocation2 + $0xb8] sm:$0xff]  }
 0x168   : > { %960 = vst.msk [vmem:[#allocation2 + $0xb0] sm:$0xf] %vm807_vm0, %v933_v42  ;;  %v987_v31 = vpop.permute.xlu1 %986  ;;  %2499 = vmatpush3.bf16.msra.mxu1 %v2645_v43 }
 0x169   : > { %1011 = vst.msk [vmem:[#allocation2 + $0xec] sm:$0xf] %vm807_vm0, %v987_v31  ;;  %2485 = vmatpush3.bf16.msra.mxu0 %v2646_v19  ;;  %v1213_v31 = vld [vmem:[%s3397_s3 + $0x40] sm:$0xff] }
 0x16a   : > { %v1217_v19 = vld [vmem:[%s3397_s3 + $0x5c] sm:$0xff] }
 0x16b   : > { %v985_v45 = vpop.permute.xlu0 %984  ;;  %v2647_v46 = vld [vmem:[#allocation2 + $0xf0] sm:$0xff]  }
 0x16c   : > { %1010 = vst.msk [vmem:[#allocation2 + $0xe8] sm:$0xf] %vm807_vm0, %v985_v45  ;;  %v983_v47 = vpop.permute.xlu1 %982  ;;  %2500 = vmatprep.subr.bf16.mxu1 %v2647_v46  ;;  %1762 = vmatmul.mubr.bf16.vlgmr.msra.gmra.mxu0 %v2654_v29  ;;  %v2341_v46 = vcombine.low %v1213_v31, %v1217_v19 }
 0x16d   : > { %1009 = vst.msk [vmem:[#allocation2 + $0xe4] sm:$0xf] %vm807_vm0, %v983_v47  ;;  %1769 = vmatprep.mubr.bf16.mxu0 %v2686_v44  ;;  %v2700_v47 = vld [vmem:[%s3397_s3 + $0x18] ss:$28 sps:$4 sm:$0xff]  }
 0x16f   : > { %v981_v48 = vpop.permute.xlu0 %980  ;;  %v2648_v49 = vld [vmem:[#allocation2 + $0xb0] sm:$0xff]  }
 0x170   : > { %1008 = vst.msk [vmem:[#allocation2 + $0xe0] sm:$0xf] %vm807_vm0, %v981_v48  ;;  %v1131_v50 = vpop.permute.xlu1 %1130  ;;  %2501 = vmatpush3.bf16.msra.mxu1 %v2648_v49 }
 0x171   : > { %1155 = vst.msk [vmem:[#allocation2 + $0x17c] sm:$0xf] %vm807_vm0, %v1131_v50 }
 0x173   : > { %v1129_v53 = vpop.permute.xlu0 %1128  ;;  %v2649_v54 = vld [vmem:[#allocation2 + $0xe8] sm:$0xff]  }
 0x174   : > { %1154 = vst.msk [vmem:[#allocation2 + $0x178] sm:$0xf] %vm807_vm0, %v1129_v53  ;;  %v1127_v55 = vpop.permute.xlu1 %1126  ;;  %2502 = vmatprep.subr.bf16.mxu1 %v2649_v54  ;;  %1770 = vmatmul.mubr.bf16.gmra.mxu0 %v2688_v51 }
 0x175   : > { %1153 = vst.msk [vmem:[#allocation2 + $0x174] sm:$0xf] %vm807_vm0, %v1127_v55  ;;  %2503 = vmatpush3.bf16.msra.mxu1 %v2650_v57  ;;  %1859 = vmatprep.mubr.bf16.mxu0 %v2693_v52 }
 0x177   : > { %v1125_v60 = vpop.permute.xlu0 %1124  ;;  %v2651_v61 = vld [vmem:[#allocation2 + $0xe0] sm:$0xff]  }
 0x178   : > { %1152 = vst.msk [vmem:[#allocation2 + $0x170] sm:$0xf] %vm807_vm0, %v1125_v60  ;;  %v923_v62 = vpop.permute.xlu1 %922  ;;  %2504 = vmatprep.subr.bf16.mxu1 %v2651_v61 }
 0x179   : > { %955 = vst.msk [vmem:[#allocation2 + $0x9c] sm:$0xf] %vm807_vm0, %v923_v62  ;;  %2505 = vmatpush3.bf16.msra.mxu1 %v2652_v63 }
 0x17a   : > { %2506 = vmatprep.subr.bf16.mxu1 %v2653_v0 }
 0x17b   : > { %v921_v1 = vpop.permute.xlu0 %920  ;;  %v2657_v2 = vld [vmem:[#allocation2 + $0x178] sm:$0xff]  }
 0x17c   : > { %954 = vst.msk [vmem:[#allocation2 + $0x98] sm:$0xf] %vm807_vm0, %v921_v1  ;;  %v919_v3 = vpop.permute.xlu1 %918  ;;  %2526 = vmatprep.subr.bf16.mxu0 %v2657_v2 }
 0x17d   : > { %953 = vst.msk [vmem:[#allocation2 + $0x94] sm:$0xf] %vm807_vm0, %v919_v3  ;;  %2527 = vmatpush3.bf16.msra.mxu0 %v2658_v4 }
 0x17f   : > { %v917_v5 = vpop.permute.xlu0 %916  ;;  %v2659_v6 = vld [vmem:[#allocation2 + $0x170] sm:$0xff]  }
 0x180   : > { %952 = vst.msk [vmem:[#allocation2 + $0x90] sm:$0xf] %vm807_vm0, %v917_v5  ;;  %v1067_v7 = vpop.permute.xlu1 %1066  ;;  %2528 = vmatprep.subr.bf16.mxu0 %v2659_v6 }
 0x181   : > { %1099 = vst.msk [vmem:[#allocation2 + $0x12c] sm:$0xf] %vm807_vm0, %v1067_v7  ;;  %2529 = vmatpush3.bf16.msra.mxu0 %v2660_v8 }
 0x182   : > { %2530 = vmatprep.subr.bf16.mxu0 %v2661_v9 }
 0x183   : > { %v1065_v59 = vpop.permute.xlu0 %1064  ;;  %v2662_v10 = vld [vmem:[#allocation2 + $0x98] sm:$0xff]  }
 0x184   : > { %1098 = vst.msk [vmem:[#allocation2 + $0x128] sm:$0xf] %vm807_vm0, %v1065_v59  ;;  %v971_v11 = vpop.permute.xlu1 %970  ;;  %2507 = vmatpush3.bf16.msra.mxu1 %v2662_v10  ;;  %v2691_v10 = vld [vmem:[%s3397_s3 + $0x10] ss:$28 sps:$4 sm:$0xff]  }
 0x185   : > { %1003 = vst.msk [vmem:[#allocation2 + $0xcc] sm:$0xf] %vm807_vm0, %v971_v11  ;;  %2508 = vmatprep.subr.bf16.mxu1 %v2663_v12  ;;  %v2696_v11 = vld [vmem:[%s3397_s3 + $0x4c] ss:$28 sps:$4 sm:$0xff]  }
 0x187   : > { %v969_v15 = vpop.permute.xlu0 %968  ;;  %v2664_v16 = vld [vmem:[#allocation2 + $0x90] sm:$0xff]  }
 0x188   : > { %1002 = vst.msk [vmem:[#allocation2 + $0xc8] sm:$0xf] %vm807_vm0, %v969_v15  ;;  %v891_v17 = vpop.permute.xlu1 %890  ;;  %2509 = vmatpush3.bf16.msra.mxu1 %v2664_v16 }
 0x189   : > { %915 = vst.msk [vmem:[#allocation2 + $0x8c] sm:$0xf] %vm807_vm0, %v891_v17  ;;  %v2698_v17 = vld [vmem:[%s3397_s3 + $0x48] ss:$28 sps:$4 sm:$0xff]  }
 0x18b   : > { %v889_v18 = vpop.permute.xlu0 %888  ;;  %v2665_v20 = vld [vmem:[#allocation2 + $0x128] sm:$0xff]  }
 0x18c   : > { %914 = vst.msk [vmem:[#allocation2 + $0x88] sm:$0xf] %vm807_vm0, %v889_v18  ;;  %v1063_v14 = vpop.permute.xlu1 %1062  ;;  %2531 = vmatpush3.bf16.msra.mxu0 %v2665_v20  ;;  %v2701_v20 = vld [vmem:[%s3397_s3 + $0x50] ss:$28 sps:$4 sm:$0xff]  }
 0x18d   : > { %1097 = vst.msk [vmem:[#allocation2 + $0x124] sm:$0xf] %vm807_vm0, %v1063_v14  ;;  %2532 = vmatprep.subr.bf16.mxu0 %v2666_v56 }
 0x18f   : > { %v1061_v21 = vpop.permute.xlu0 %1060  ;;  %v2667_v22 = vld [vmem:[#allocation2 + $0xc8] sm:$0xff]  }
 0x190   : > { %1096 = vst.msk [vmem:[#allocation2 + $0x120] sm:$0xf] %vm807_vm0, %v1061_v21  ;;  %v967_v23 = vpop.permute.xlu1 %966  ;;  %2510 = vmatprep.subr.bf16.mxu1 %v2667_v22 }
 0x191   : > { %1001 = vst.msk [vmem:[#allocation2 + $0xc4] sm:$0xf] %vm807_vm0, %v967_v23 }
 0x193   : > { %v965_v24 = vpop.permute.xlu0 %964  ;;  %v2668_v25 = vld [vmem:[#allocation2 + $0x88] sm:$0xff]  }
 0x194   : > { %1000 = vst.msk [vmem:[#allocation2 + $0xc0] sm:$0xf] %vm807_vm0, %v965_v24  ;;  %v1115_v26 = vpop.permute.xlu1 %1114  ;;  %2511 = vmatpush3.bf16.msra.mxu1 %v2668_v25 }
 0x195   : > { %1147 = vst.msk [vmem:[#allocation2 + $0x15c] sm:$0xf] %vm807_vm0, %v1115_v26 }
 0x197   : > { %v1113_v27 = vpop.permute.xlu0 %1112  ;;  %v2669_v28 = vld [vmem:[#allocation2 + $0x120] sm:$0xff]  }
 0x198   : > { %1146 = vst.msk [vmem:[#allocation2 + $0x158] sm:$0xf] %vm807_vm0, %v1113_v27  ;;  %v887_v30 = vpop.permute.xlu1 %886  ;;  %2533 = vmatpush3.bf16.msra.mxu0 %v2669_v28 }
 0x199   : > { %913 = vst.msk [vmem:[#allocation2 + $0x84] sm:$0xf] %vm807_vm0, %v887_v30 }
 0x19b   : > { %v885_v13 = vpop.permute.xlu0 %884  ;;  %v2670_v32 = vld [vmem:[#allocation2 + $0xc0] sm:$0xff]  }
 0x19c   : > { %912 = vst.msk [vmem:[#allocation2 + $0x80] sm:$0xf] %vm807_vm0, %v885_v13  ;;  %v1035_v58 = vpop.permute.xlu1 %1034  ;;  %2512 = vmatprep.subr.bf16.mxu1 %v2670_v32 }
 0x19d   : > { %1059 = vst.msk [vmem:[#allocation2 + $0x11c] sm:$0xf] %vm807_vm0, %v1035_v58 }
 0x19f   : > { %v1033_v33 = vpop.permute.xlu0 %1032  ;;  %v2671_v34 = vld [vmem:[#allocation2 + $0x158] sm:$0xff]  }
 0x1a0   : > { %1058 = vst.msk [vmem:[#allocation2 + $0x118] sm:$0xf] %vm807_vm0, %v1033_v33  ;;  %v1111_v35 = vpop.permute.xlu1 %1110  ;;  %2534 = vmatprep.subr.bf16.mxu0 %v2671_v34 }
 0x1a1   : > { %1145 = vst.msk [vmem:[#allocation2 + $0x154] sm:$0xf] %vm807_vm0, %v1111_v35 }
 0x1a3   : > { %v1109_v36 = vpop.permute.xlu0 %1108  ;;  %v2672_v37 = vld [vmem:[#allocation2 + $0x80] sm:$0xff]  }
 0x1a4   : > { %1144 = vst.msk [vmem:[#allocation2 + $0x150] sm:$0xf] %vm807_vm0, %v1109_v36  ;;  %v1179_v38 = vpop.permute.xlu1 %1178  ;;  %2513 = vmatpush3.bf16.msra.mxu1 %v2672_v37 }
 0x1a5   : > { %1203 = vst.msk [vmem:[#allocation2 + $0x1ac] sm:$0xf] %vm807_vm0, %v1179_v38 }
 0x1a7   : > { %v1177_v41 = vpop.permute.xlu0 %1176  ;;  %v2673_v42 = vld [vmem:[#allocation2 + $0x118] sm:$0xff]   ;;  %1811 = vmatmul.mubr.bf16.vlgmr.msra.gmra.mxu1 %v2675_v39 }
 0x1a8   : > { %1202 = vst.msk [vmem:[#allocation2 + $0x1a8] sm:$0xf] %vm807_vm0, %v1177_v41  ;;  %v1031_v43 = vpop.permute.xlu1 %1030  ;;  %2535 = vmatpush3.bf16.msra.mxu0 %v2673_v42  ;;  %1818 = vmatprep.mubr.bf16.mxu1 %v2684_v40 }
 0x1a9   : > { %1057 = vst.msk [vmem:[#allocation2 + $0x114] sm:$0xf] %vm807_vm0, %v1031_v43 }
 0x1ab   : > { %v1029_v29 = vpop.permute.xlu0 %1028  ;;  %v2674_v44 = vld [vmem:[#allocation2 + $0x150] sm:$0xff]  }
 0x1ac   : > { %1056 = vst.msk [vmem:[#allocation2 + $0x110] sm:$0xf] %vm807_vm0, %v1029_v29  ;;  %v1083_v45 = vpop.permute.xlu1 %1082  ;;  %2536 = vmatprep.subr.bf16.mxu0 %v2674_v44 }
 0x1ad   : > { %1107 = vst.msk [vmem:[#allocation2 + $0x14c] sm:$0xf] %vm807_vm0, %v1083_v45 }
 0x1af   : > { %v1081_v48 = vpop.permute.xlu0 %1080  ;;  %v2678_v49 = vld [vmem:[#allocation2 + $0x1a8] sm:$0xff]   ;;  %1819 = vmatmul.mubr.bf16.gmra.mxu1 %v2341_v46 }
 0x1b0   : > { %1106 = vst.msk [vmem:[#allocation2 + $0x148] sm:$0xf] %vm807_vm0, %v1081_v48  ;;  %v1175_v50 = vpop.permute.xlu1 %1174  ;;  %2562 = vmatprep.subr.bf16.mxu1 %v2678_v49  ;;  %2574 = vmatprep.mubr.msk.bf16.mxu1 %vm1722_vm3, %v2700_v47 }
 0x1b1   : > { %1201 = vst.msk [vmem:[#allocation2 + $0x1a4] sm:$0xf] %vm807_vm0, %v1175_v50  ;;  %2563 = vmatpush3.bf16.msra.mxu1 %v2678_v49 }
 0x1b3   : > { %v1173_v51 = vpop.permute.xlu0 %1172  ;;  %v2679_v52 = vld [vmem:[#allocation2 + $0x110] sm:$0xff]  }
 0x1b4   : > { %1200 = vst.msk [vmem:[#allocation2 + $0x1a0] sm:$0xf] %vm807_vm0, %v1173_v51  ;;  %v1027_v53 = vpop.permute.xlu1 %1026  ;;  %2537 = vmatpush3.bf16.msra.mxu0 %v2679_v52 }
 0x1b5   : > { %1055 = vst.msk [vmem:[#allocation2 + $0x10c] sm:$0xf] %vm807_vm0, %v1027_v53 }
 0x1b7   : > { %v1025_v54 = vpop.permute.xlu0 %1024  ;;  %v2680_v55 = vld [vmem:[#allocation2 + $0x148] sm:$0xff]  }
 0x1b8   : > { %1054 = vst.msk [vmem:[#allocation2 + $0x108] sm:$0xf] %vm807_vm0, %v1025_v54  ;;  %v1079_v57 = vpop.permute.xlu1 %1078  ;;  %2538 = vmatprep.subr.bf16.mxu0 %v2680_v55 }
 0x1b9   : > { %1105 = vst.msk [vmem:[#allocation2 + $0x144] sm:$0xf] %vm807_vm0, %v1079_v57 }
 0x1bb   : > { %v1077_v60 = vpop.permute.xlu0 %1076  ;;  %v2681_v61 = vld [vmem:[#allocation2 + $0x1a0] sm:$0xff]  }
 0x1bc   : > { %1104 = vst.msk [vmem:[#allocation2 + $0x140] sm:$0xf] %vm807_vm0, %v1077_v60  ;;  %v1171_v62 = vpop.permute.xlu1 %1170  ;;  %2564 = vmatprep.subr.bf16.mxu1 %v2681_v61 }
 0x1bd   : > { %1199 = vst.msk [vmem:[#allocation2 + $0x19c] sm:$0xf] %vm807_vm0, %v1171_v62  ;;  %2565 = vmatpush3.bf16.msra.mxu1 %v2681_v61 }
 0x1bf   : > { %v1169_v63 = vpop.permute.xlu0 %1168  ;;  %v2682_v0 = vld [vmem:[#allocation2 + $0x108] sm:$0xff]  }
 0x1c0   : > { %1198 = vst.msk [vmem:[#allocation2 + $0x198] sm:$0xf] %vm807_vm0, %v1169_v63  ;;  %v1023_v1 = vpop.permute.xlu1 %1022  ;;  %2539 = vmatpush3.bf16.msra.mxu0 %v2682_v0  ;;  %v2402_v63 = vld [vmem:[%s3398_s4] ss:$0 sm:$0xff] }
 0x1c1   : > { %1053 = vst.msk [vmem:[#allocation2 + $0x104] sm:$0xf] %vm807_vm0, %v1023_v1 }
 0x1c3   : > { %v1021_v2 = vpop.permute.xlu0 %1020  ;;  %v2683_v3 = vld [vmem:[#allocation2 + $0x140] sm:$0xff]  }
 0x1c4   : > { %1052 = vst.msk [vmem:[#allocation2 + $0x100] sm:$0xf] %vm807_vm0, %v1021_v2  ;;  %v1167_v4 = vpop.permute.xlu1 %1166  ;;  %2540 = vmatprep.subr.bf16.mxu0 %v2683_v3 }
 0x1c5   : > { %1197 = vst.msk [vmem:[#allocation2 + $0x194] sm:$0xf] %vm807_vm0, %v1167_v4 }
 0x1c7   : > { %v1165_v5 = vpop.permute.xlu0 %1164  ;;  %v2689_v6 = vld [vmem:[#allocation2 + $0x198] sm:$0xff]  }
 0x1c8   : > { %1196 = vst.msk [vmem:[#allocation2 + $0x190] sm:$0xf] %vm807_vm0, %v1165_v5  ;;  %v1163_v7 = vpop.permute.xlu1 %1162  ;;  %2566 = vmatprep.subr.bf16.mxu1 %v2689_v6 }
 0x1c9   : > { %1195 = vst.msk [vmem:[#allocation2 + $0x18c] sm:$0xf] %vm807_vm0, %v1163_v7  ;;  %2567 = vmatpush3.bf16.msra.mxu1 %v2689_v6 }
 0x1cb   : > { %v1161_v8 = vpop.permute.xlu0 %1160  ;;  %v2690_v9 = vld [vmem:[#allocation2 + $0x100] sm:$0xff]  }
 0x1cc   : > { %1194 = vst.msk [vmem:[#allocation2 + $0x188] sm:$0xf] %vm807_vm0, %v1161_v8  ;;  %v1159_v59 = vpop.permute.xlu1 %1158  ;;  %2541 = vmatpush3.bf16.msra.mxu0 %v2690_v9 }
 0x1cd   : > { %1193 = vst.msk [vmem:[#allocation2 + $0x184] sm:$0xf] %vm807_vm0, %v1159_v59 }
 0x1cf   : > { %v1157_v12 = vpop.permute.xlu0 %1156  ;;  %v2694_v15 = vld [vmem:[#allocation2 + $0x190] sm:$0xff]   ;;  %1860 = vmatmul.mubr.bf16.vlgmr.msra.gmra.mxu0 %v2691_v10 }
 0x1d0   : > { %1192 = vst.msk [vmem:[#allocation2 + $0x180] sm:$0xf] %vm807_vm0, %v1157_v12  ;;  %2568 = vmatprep.subr.bf16.mxu1 %v2694_v15  ;;  %1867 = vmatprep.mubr.bf16.mxu0 %v2696_v11 }
 0x1d1   : > { %2569 = vmatpush3.bf16.msra.mxu1 %v2694_v15 }
 0x1d3   : > { %v2695_v16 = vld [vmem:[#allocation2 + $0x188] sm:$0xff]  }
 0x1d4   : > { %2570 = vmatprep.subr.bf16.mxu1 %v2695_v16 }
 0x1d5   : > { %2571 = vmatpush3.bf16.msra.mxu1 %v2695_v16 }
 0x1d7   : > { %v2699_v18 = vld [vmem:[#allocation2 + $0x180] sm:$0xff]   ;;  %1868 = vmatmul.mubr.bf16.gmra.mxu0 %v2698_v17 }
 0x1d8   : > { %2572 = vmatprep.subr.bf16.mxu1 %v2699_v18 }
 0x1d9   : > { %2573 = vmatpush3.bf16.msra.mxu1 %v2699_v18 }
 0x1dc   : > { %2575 = vmatmul.mubr.msk.bf16.vlgmr.msra.gmra.mxu1 %vm1722_vm3, %v2701_v20 }
 0x22c   : > { %v2486_v14 = vpop.f32.mrf.mxu0 }
 0x22e   : > { %v2487_v56 = vpop.f32.mrf.mxu0 }
 0x22f   : > { %v2488_v40 = vadd.f32 %v2487_v56, %v2486_v14 }
 0x230   : > { %v2489_v21 = vpop.f32.mrf.mxu0 }
 0x232   : > { %v2490_v23 = vpop.f32.mrf.mxu0 }
 0x233   : > { %v2491_v48 = vadd.f32 %v2490_v23, %v2489_v21 }
 0x234   : > { %v2492_v24 = vpop.f32.mrf.mxu0 }
 0x236   : > { %v2493_v26 = vpop.f32.mrf.mxu0 }
 0x237   : > { %v2494_v38 = vadd.f32 %v2493_v26, %v2492_v24 }
 0x238   : > { %v2495_v28 = vpop.f32.mrf.mxu0 }
 0x23a   : > { %v2496_v32 = vpop.f32.mrf.mxu0 }
 0x23b   : > { %v2497_v44 = vadd.f32 %v2496_v32, %v2495_v28 }
 0x267   : > { %v2514_v22 = vpop.f32.mrf.mxu1 }
 0x269   : > { %v2515_v25 = vpop.f32.mrf.mxu1 }
 0x26a   : > { %v2516_v41 = vadd.f32 %v2515_v25, %v2514_v22 }
 0x26b   : > { %v2517_v27 = vpop.f32.mrf.mxu1 }
 0x26c   : > { %v1813_v47 = vadd.f32 %v2516_v41, %v2488_v40 }
 0x26d   : > { %v2518_v30 = vpop.f32.mrf.mxu1 }
 0x26e   : > { %v2519_v49 = vadd.f32 %v2518_v30, %v2517_v27 }
 0x26f   : > { %v2520_v13 = vpop.f32.mrf.mxu1 }
 0x270   : > { %v1816_v0 = vadd.f32 %v2519_v49, %v2491_v48 }
 0x271   : > { %v2521_v58 = vpop.f32.mrf.mxu1 }
 0x272   : > { %v2522_v39 = vadd.f32 %v2521_v58, %v2520_v13 }
 0x273   : > { %v2523_v35 = vpop.f32.mrf.mxu1 }
 0x274   : > { %v1821_v29 = vadd.f32 %v2522_v39, %v2494_v38 }
 0x275   : > { %v2524_v42 = vpop.f32.mrf.mxu1 }
 0x276   : > { %v2525_v45 = vadd.f32 %v2524_v42, %v2523_v35 }
 0x278   : > { %v1824_v57 = vadd.f32 %v2525_v45, %v2497_v44 }
 0x28f   : > { %v2542_v33 = vpop.f32.mrf.mxu0 }
 0x291   : > { %v2543_v34 = vpop.f32.mrf.mxu0 }
 0x292   : > { %v2544_v31 = vadd.f32 %v2543_v34, %v2542_v33 }
 0x293   : > { %v2545_v36 = vpop.f32.mrf.mxu0 }
 0x294   : > { %v1862_v55 = vadd.f32 %v2544_v31, %v1813_v47 }
 0x295   : > { %v2546_v37 = vpop.f32.mrf.mxu0 }
 0x296   : > { %v2547_v53 = vadd.f32 %v2546_v37, %v2545_v36 }
 0x297   : > { %v2548_v43 = vpop.f32.mrf.mxu0 }
 0x298   : > { %v1865_v6 = vadd.f32 %v2547_v53, %v1816_v0 }
 0x299   : > { %v2549_v19 = vpop.f32.mrf.mxu0 }
 0x29a   : > { %v2550_v46 = vadd.f32 %v2549_v19, %v2548_v43 }
 0x29b   : > { %v2551_v50 = vpop.f32.mrf.mxu0 }
 0x29c   : > { %v1870_v51 = vadd.f32 %v2550_v46, %v1821_v29  ;;  %v2576_v52 = vpop.f32.mrf.mxu1 }
 0x29d   : > { %v2552_v54 = vpop.f32.mrf.mxu0 }
 0x29e   : > { %v1919_v60 = vadd.f32 %v2576_v52, %v1870_v51  ;;  %v2553_v61 = vadd.f32 %v2552_v54, %v2551_v50  ;;  %v1910_v62 = vpop.f32.mrf.mxu1 }
 0x29f   : > { %v1911_v1 = vadd.f32 %v1910_v62, %v1862_v55 }
 0x2a0   : > { %v2441_v2 = vpack.c.bf16 %v1919_v60, %v1919_v60  ;;  %v1873_v3 = vadd.f32 %v2553_v61, %v1824_v57  ;;  %v2577_v4 = vpop.f32.mrf.mxu1  ;;  %v1934_v11 = vmul.f32 %v2402_v63, %v1919_v60 }
 0x2a1   : > { %v2439_v5 = vpack.c.bf16 %v1911_v1, %v1911_v1  ;;  %v1932_v7 = vmul.f32 %v2402_v63, %v1911_v1 }
 0x2a2   : > { %v1922_v8 = vadd.f32 %v2577_v4, %v1873_v3  ;;  %v1913_v9 = vpop.f32.mrf.mxu1  ;;  %2004 = vst.msk [vmem:[%s588_s20 + $0x8] sm:$0xf] %vm807_vm0, %v2441_v2  ;;  %v1943_v18 = vsel %vm1936_vm4, %v1934_v11, 0.0 }
 0x2a3   : > { %v1914_v59 = vadd.f32 %v1913_v9, %v1865_v6  ;;  %v1937_v10 = vsel %vm1936_vm4, %v1932_v7, 0.0  ;;  %2002 = vst.msk [vmem:[%s588_s20] sm:$0xf] %vm807_vm0, %v2439_v5 }
 0x2a4   : > { %v2442_v12 = vpack.c.bf16 %v1922_v8, %v1922_v8  ;;  %1938 = vadd.xlane.f32.xlu0 %v1937_v10  ;;  %v1935_v20 = vmul.f32 %v2402_v63, %v1922_v8 }
 0x2a5   : > { %v2440_v15 = vpack.c.bf16 %v1914_v59, %v1914_v59  ;;  %v1933_v16 = vmul.f32 %v2402_v63, %v1914_v59 }
 0x2a6   : > { %2005 = vst.msk [vmem:[%s588_s20 + $0xc] sm:$0xf] %vm807_vm0, %v2442_v12  ;;  %v1946_v14 = vsel %vm1936_vm4, %v1935_v20, 0.0 }
 0x2a7   : > { %v1940_v17 = vsel %vm1936_vm4, %v1933_v16, 0.0  ;;  %2003 = vst.msk [vmem:[%s588_s20 + $0x4] sm:$0xf] %vm807_vm0, %v2440_v15 }
 0x2a8   : > { %1941 = vadd.xlane.f32.xlu1 %v1940_v17  ;;  %1944 = vadd.xlane.f32.xlu0 %v1943_v18 }
 0x2ac   : > { %1947 = vadd.xlane.f32.xlu0 %v1946_v14 }
 0x32d   : > { %v1939_v56 = vpop.xlane.xlu0 %1938 }
 0x32e   : > { %v1949_v21 = vmul.f32 0.0625, %v1939_v56  ;;  %1962 = vst.msk [vmem:[%s597_s25] sm:$0xff] %vm1961_vm5, %v1939_v56 }
 0x330   : > { %v1953_v22 = vsub.f32 %v1911_v1, %v1949_v21 }
 0x331   : > { %v1942_v23 = vpop.xlane.xlu1 %1941  ;;  %v1945_v24 = vpop.xlane.xlu0 %1944 }
 0x332   : > { %v1950_v25 = vmul.f32 0.0625, %v1942_v23  ;;  %1963 = vst.msk [vmem:[%s597_s25 + $0x8] sm:$0xff] %vm1961_vm5, %v1942_v23  ;;  %v1951_v26 = vmul.f32 0.0625, %v1945_v24  ;;  %1964 = vst.msk [vmem:[%s597_s25 + $0x10] sm:$0xff] %vm1961_vm5, %v1945_v24  ;;  %v1957_v27 = vmul.f32 %v2402_v63, %v1953_v22 }
 0x334   : > { %v1954_v28 = vsub.f32 %v1914_v59, %v1950_v25  ;;  %v1955_v30 = vsub.f32 %v1919_v60, %v1951_v26  ;;  %v1966_v13 = vmul.f32 %v1957_v27, %v1957_v27 }
 0x335   : > { %v1948_v32 = vpop.xlane.xlu0 %1947 }
 0x336   : > { %v1952_v58 = vmul.f32 0.0625, %v1948_v32  ;;  %1965 = vst.msk [vmem:[%s597_s25 + $0x18] sm:$0xff] %vm1961_vm5, %v1948_v32  ;;  %v1970_v33 = vsel %vm1936_vm4, %v1966_v13, 0.0  ;;  %v1958_v34 = vmul.f32 %v2402_v63, %v1954_v28  ;;  %v1959_v35 = vmul.f32 %v2402_v63, %v1955_v30 }
 0x337   : > { %1971 = vadd.xlane.f32.xlu1 %v1970_v33 }
 0x338   : > { %v1956_v36 = vsub.f32 %v1922_v8, %v1952_v58  ;;  %v1967_v37 = vmul.f32 %v1958_v34, %v1958_v34  ;;  %v1968_v38 = vmul.f32 %v1959_v35, %v1959_v35 }
 0x33a   : > { %v1973_v39 = vsel %vm1936_vm4, %v1967_v37, 0.0  ;;  %v1976_v40 = vsel %vm1936_vm4, %v1968_v38, 0.0  ;;  %v1960_v41 = vmul.f32 %v2402_v63, %v1956_v36 }
 0x33b   : > { %1974 = vadd.xlane.f32.xlu0 %v1973_v39  ;;  %1977 = vadd.xlane.f32.xlu1 %v1976_v40 }
 0x33c   : > { %v1969_v42 = vmul.f32 %v1960_v41, %v1960_v41 }
 0x33e   : > { %v1979_v43 = vsel %vm1936_vm4, %v1969_v42, 0.0 }
 0x33f   : > { %1980 = vadd.xlane.f32.xlu0 %v1979_v43 }
 0x3c0   : > { %v1972_v31 = vpop.xlane.xlu1 %1971 }
 0x3c1   : > { %1982 = vst.msk [vmem:[%s606_s28] sm:$0xff] %vm1961_vm5, %v1972_v31 }
 0x3c4   : > { %v1978_v19 = vpop.xlane.xlu1 %1977  ;;  %v1975_v29 = vpop.xlane.xlu0 %1974 }
 0x3c5   : > { %1984 = vst.msk [vmem:[%s606_s28 + $0x10] sm:$0xff] %vm1961_vm5, %v1978_v19  ;;  %1983 = vst.msk [vmem:[%s606_s28 + $0x8] sm:$0xff] %vm1961_vm5, %v1975_v29 }
 0x3c8   : > { %v1981_v44 = vpop.xlane.xlu0 %1980 }
 0x3c9   : > { %1985 = vst.msk [vmem:[%s606_s28 + $0x18] sm:$0xff] %vm1961_vm5, %v1981_v44 }
 0x3ca PF: > { %s21_s17 = sadd.s32 1, %s2740_s17   ;;  %s3417_s13 = sld [smem:[#allocation3_spill]] }
 0x3cb   : > { %p18_p7 = scmp.ge.s32.totalorder %s21_s17, 10   ;;  %s3418_s14 = sld [smem:[#allocation4_spill]] }
 0x3cc   : > { %s3419_s15 = sld [smem:[#allocation5_spill]] }
 0x3cd   : > { %s3420_s16 = sld [smem:[#allocation6_spill]]  ;;  %20 = sbr.rel (!%p18_p7) target bundleno = 4 (0x4), region = 112 }

</bundles_post_ra>
